<compile_context>
chip_gen: v7x
topology: tpu7x:2x2x1
jax: 0.10.0
libtpu: 0.0.40
codegen_flags: <defaults>
</compile_context>

<pallas_src>
import functools

import jax
import jax.numpy as jnp
from jax.experimental import pallas as pl
from jax.experimental.pallas import tpu as pltpu

F_PAD = 128          # lane-width padding for all feature dims
F_PAD2 = 2 * F_PAD   # merged-modality K dimension

# [8, 128, 128] weight-stack indices (merge weight is a separate [256,128] slab)
W_IT, W_IC1, W_IC2, W_IC3, W_C1, W_C2, W_C3, W_PRED = range(8)
# [9, 128] bias-stack indices
B_IT, B_IC1, B_IC2, B_IC3, B_M, B_C1, B_C2, B_C3, B_PRED = range(9)
# [6, 128] batch-norm stack indices
BN_I1, BN_I2, BN_I3, BN_G1, BN_G2, BN_G3 = range(6)


# ----------------------------- Pallas kernel --------------------------------

def _gcn_decoder_kernel(adj_int_ref, adj_all_ref, rs_int_ref, rs_all_ref,
                        x_ref, pool_ref, w_ref, wm_ref, b_ref, g_ref, be_ref,
                        o_ref, *, n_real, inv_num_node, eps=1e-5,
                        leaky_slope=0.1):
    inv_n = jnp.float32(1.0 / n_real)

    def bias(i):                       # [1, F_PAD] f32
        return b_ref[i:i + 1, :]

    def gcn_bn_act(adj_bf16, rowsum_f32, h_bf16, wi, bi, bni, slope):
        # GCNConv (dense, 'add' aggr) with the bias folded through A:
        #   y = A @ (h @ W) + rowsum(A) * b     (bias stays exact f32)
        z = jnp.dot(h_bf16, w_ref[wi], preferred_element_type=jnp.float32)
        y = jnp.dot(adj_bf16, z.astype(jnp.bfloat16),
                    preferred_element_type=jnp.float32)
        y = y + rowsum_f32 * bias(bi)
        # BatchNorm1d, batch stats, biased var, one-pass E[y^2]-mean^2 with
        # gamma folded into the rsqrt scale.  INVARIANT: padded rows of y are
        # exactly zero (zero adjacency rows + zero rowsum), so dividing the
        # padded-inclusive sums by n_real gives the exact real-node stats.
        mean = jnp.sum(y, axis=0, keepdims=True) * inv_n
        msq = jnp.sum(y * y, axis=0, keepdims=True) * inv_n
        var = jnp.maximum(msq - mean * mean, 0.0)
        scale = g_ref[bni:bni + 1, :] * jax.lax.rsqrt(var + eps)
        yn = y * scale + (be_ref[bni:bni + 1, :] - mean * scale)
        # trace-time branch: slope is a Python constant
        if slope == 0.0:
            return jnp.maximum(yn, 0.0)                 # ReLU
        return jnp.maximum(yn, slope * yn)              # LeakyReLU (0<slope<1)

    adj_i = adj_int_ref[...]                            # bf16 [Np, Np]
    adj_a = adj_all_ref[...]                            # bf16 [Np, Np]
    rs_i = rs_int_ref[...]                              # f32  [Np, 1]
    rs_a = rs_all_ref[...]                              # f32  [Np, 1]
    x = x_ref[...]                                      # bf16 [Np, 128]

    # ---- internal branch (ReLU) --------------------------------------------
    xi = (jnp.dot(x, w_ref[W_IT], preferred_element_type=jnp.float32)
          + bias(B_IT)).astype(jnp.bfloat16)
    xi = gcn_bn_act(adj_i, rs_i, xi, W_IC1, B_IC1, BN_I1, 0.0).astype(jnp.bfloat16)
    xi = gcn_bn_act(adj_i, rs_i, xi, W_IC2, B_IC2, BN_I2, 0.0).astype(jnp.bfloat16)
    xi = gcn_bn_act(adj_i, rs_i, xi, W_IC3, B_IC3, BN_I3, 0.0).astype(jnp.bfloat16)

    # ---- merge modalities: one K=256 matmul on the concatenated lanes ------
    xcat = jnp.concatenate([x, xi], axis=-1)            # bf16 [Np, 256]
    xc = (jnp.dot(xcat, wm_ref[...], preferred_element_type=jnp.float32)
          + bias(B_M)).astype(jnp.bfloat16)

    # ---- global branch (LeakyReLU 0.1) -------------------------------------
    xg = gcn_bn_act(adj_a, rs_a, xc, W_C1, B_C1, BN_G1, leaky_slope).astype(jnp.bfloat16)
    xg = gcn_bn_act(adj_a, rs_a, xg, W_C2, B_C2, BN_G2, leaky_slope).astype(jnp.bfloat16)
    xg = gcn_bn_act(adj_a, rs_a, xg, W_C3, B_C3, BN_G3, leaky_slope).astype(jnp.bfloat16)

    # ---- PowerMean(p=1) pooling (== per-graph mean) + prediction head ------
    # pool is 0/1 bf16; the 1/num_node scale is applied in f32 afterwards.
    pooled = jnp.dot(pool_ref[...], xg,
                     preferred_element_type=jnp.float32) * jnp.float32(inv_num_node)
    logits = (jnp.dot(pooled.astype(jnp.bfloat16), w_ref[W_PRED],
                      preferred_element_type=jnp.float32) + bias(B_PRED))
    o_ref[...] = logits                                  # [B_pad, 128] lane-dense


# ------------------------------ glue / host ----------------------------------

def _pad2(a, rows, cols):
    out = jnp.zeros((rows, cols), a.dtype)
    return out.at[:a.shape[0], :a.shape[1]].set(a)


def _pad1(a, cols):
    out = jnp.zeros((cols,), a.dtype)
    return out.at[:a.shape[0]].set(a)


def _round_up(v, m):
    return max(m, -(-v // m) * m)


def _vmem_limit_bytes(n_pad, b_pad):
    """Scoped-VMEM request sized to the actual resident footprint."""
    bf16, f32 = 2, 4
    resident = (
        2 * n_pad * n_pad * bf16            # both adjacencies
        + n_pad * F_PAD * bf16              # x
        + b_pad * n_pad * bf16              # pooling matrix
        + (8 * F_PAD + F_PAD2) * F_PAD * bf16   # weight stack + merge slab
        + (9 + 6 + 6) * F_PAD * f32         # biases / gamma / beta
        + 2 * n_pad * F_PAD * f32           # rowsums (lane-padded layout)
        + b_pad * F_PAD * f32               # output
    )
    temps = 10 * n_pad * F_PAD * f32        # f32 activations in flight
    total = 2 * resident + temps + (4 << 20)
    # floor for compiler internal scratch, cap at v7x physical VMEM (64 MiB)
    return int(min(max(total, 16 << 20), 64 << 20))


def normalized_adjacency_padded(edge_index, num_nodes, n_pad):
    """Dense D^-1/2 (A + I) D^-1/2 (A[i,j] accumulates edges j->i), scattered
    directly into the padded buffer, returned as (bf16 adjacency, f32 rowsum).
    """
    # TODO(synk): at scale keep this sparse / build it in a scalar-prefetch
    # Pallas kernel instead of an XLA dense scatter into an N^2 buffer.
    row, col = edge_index[0], edge_index[1]        # row = source, col = target
    loop = jnp.arange(num_nodes, dtype=edge_index.dtype)
    row = jnp.concatenate([row, loop])
    col = jnp.concatenate([col, loop])
    deg = jnp.zeros((num_nodes,), jnp.float32).at[col].add(1.0)
    dinv = deg ** -0.5
    norm = dinv[row] * dinv[col]
    adj = jnp.zeros((n_pad, n_pad), jnp.float32).at[col, row].add(norm)
    rowsum = jnp.sum(adj, axis=1, keepdims=True)   # f32 [n_pad, 1]
    return adj.astype(jnp.bfloat16), rowsum


def prepare_kernel_params(params, input_dim, hidden_dim):
    """Pad all feature dims to 128, stack, cast weights to bf16."""
    wm, bm = params["merge_modality"]
    w_mx, w_mxi = wm[:input_dim], wm[input_dim:]
    # single [256,128] merge slab: rows [0:input_dim] <- x part,
    # rows [128:128+hidden_dim] <- x_internal part
    w_merge = jnp.zeros((F_PAD2, F_PAD), jnp.float32)
    w_merge = w_merge.at[:input_dim, :hidden_dim].set(w_mx)
    w_merge = w_merge.at[F_PAD:F_PAD + hidden_dim, :hidden_dim].set(w_mxi)

    w_list = [params["internal_transform"][0],
              params["internal_conv_first"][0],
              params["internal_conv_block"][0],
              params["internal_conv_last"][0],
              params["conv_first"][0],
              params["conv_block"][0],
              params["conv_last"][0],
              params["graph_prediction"][0]]
    b_list = [params["internal_transform"][1],
              params["internal_conv_first"][1],
              params["internal_conv_block"][1],
              params["internal_conv_last"][1],
              bm,
              params["conv_first"][1],
              params["conv_block"][1],
              params["conv_last"][1],
              params["graph_prediction"][1]]
    bn_names = ["x_internal_norm_first", "x_internal_norm_block",
                "x_internal_norm_last", "x_norm_first", "x_norm_block",
                "x_norm_last"]
    W = jnp.stack([_pad2(w, F_PAD, F_PAD) for w in w_list]).astype(jnp.bfloat16)
    Wm = w_merge.astype(jnp.bfloat16)
    B = jnp.stack([_pad1(b, F_PAD) for b in b_list]).astype(jnp.float32)
    G = jnp.stack([_pad1(params[n][0], F_PAD) for n in bn_names]).astype(jnp.float32)
    Be = jnp.stack([_pad1(params[n][1], F_PAD) for n in bn_names]).astype(jnp.float32)
    return W, Wm, B, G, Be


def init_params(key, input_dim, hidden_dim, embedding_dim, num_class):
    """Deterministic synthetic parameters (weights stored as [in, out])."""
    def lin(k, din, dout):
        kw, kb = jax.random.split(k)
        bound = 1.0 / jnp.sqrt(din)
        w = jax.random.uniform(kw, (din, dout), jnp.float32, -bound, bound)
        b = jax.random.uniform(kb, (dout,), jnp.float32, -bound, bound)
        return w, b

    keys = jax.random.split(key, 16)
    p = {}
    p["internal_transform"] = lin(keys[0], input_dim, hidden_dim)
    p["internal_conv_first"] = lin(keys[1], hidden_dim, hidden_dim)
    p["internal_conv_block"] = lin(keys[2], hidden_dim, hidden_dim)
    p["internal_conv_last"] = lin(keys[3], hidden_dim, hidden_dim)
    p["merge_modality"] = lin(keys[4], input_dim + hidden_dim, hidden_dim)
    p["conv_first"] = lin(keys[5], hidden_dim, hidden_dim)
    p["conv_block"] = lin(keys[6], hidden_dim, hidden_dim)
    p["conv_last"] = lin(keys[7], hidden_dim, embedding_dim)
    p["graph_prediction"] = lin(keys[8], embedding_dim, num_class)
    # BatchNorm params: gamma=1, beta=0 (PyTorch default init)
    for name, dim in [
        ("x_internal_norm_first", hidden_dim),
        ("x_internal_norm_block", hidden_dim),
        ("x_internal_norm_last", hidden_dim),
        ("x_norm_first", hidden_dim),
        ("x_norm_block", hidden_dim),
        ("x_norm_last", embedding_dim),
    ]:
        p[name] = (jnp.ones((dim,), jnp.float32), jnp.zeros((dim,), jnp.float32))
    # PowerMeanAggregation(learn=True): p initialized to 1.0 -> mean pooling.
    p["powermean_p"] = jnp.float32(1.0)
    return p


def gcn_decoder_forward(params, x, internal_edge_index, all_edge_index,
                        num_node, num_class):
    n, input_dim = x.shape
    hidden_dim = params["internal_transform"][0].shape[1]
    assert input_dim <= F_PAD and hidden_dim <= F_PAD
    batch = n // num_node
    n_pad = _round_up(n, 128)       # lane-dense adjacency / pool last dims
    b_pad = _round_up(batch, 8)

    # normalized adjacencies + rowsums (glue), padded + bf16-cast in one step
    adj_int, rs_int = normalized_adjacency_padded(internal_edge_index, n, n_pad)
    adj_all, rs_all = normalized_adjacency_padded(all_edge_index, n, n_pad)
    x_pad = _pad2(x, n_pad, F_PAD).astype(jnp.bfloat16)

    # pooling matrix: 0/1 graph membership (PowerMean p=1 == mean); the
    # 1/num_node scale is applied in f32 inside the kernel.
    graph_id = jnp.repeat(jnp.arange(batch), num_node)
    pool = (jnp.arange(b_pad)[:, None] == graph_id[None, :]).astype(jnp.float32)
    pool = _pad2(pool, b_pad, n_pad).astype(jnp.bfloat16)

    W, Wm, B, G, Be = prepare_kernel_params(params, input_dim, hidden_dim)

    kern = functools.partial(_gcn_decoder_kernel, n_real=n,
                             inv_num_node=1.0 / num_node)
    logits_pad = pl.pallas_call(
        kern,
        out_shape=jax.ShapeDtypeStruct((b_pad, F_PAD), jnp.float32),
        compiler_params=pltpu.CompilerParams(
            vmem_limit_bytes=_vmem_limit_bytes(n_pad, b_pad)),
    )(adj_int, adj_all, rs_int, rs_all, x_pad, pool, W, Wm, B, G, Be)

    output = logits_pad[:batch, :num_class]
    ypred = jnp.argmax(output, axis=1)
    return output, ypred


# ------------------------------ main -----------------------------------------

if __name__ == "__main__":
    # small deterministic shapes
    input_dim = 8
    hidden_dim = 32
    embedding_dim = 16
    num_node = 8
    num_class = 4
    batch = 2
    n_nodes = batch * num_node           # total nodes across the batch
    n_int_edges = 24
    n_all_edges = 40

    key = jax.random.PRNGKey(0)
    k_x, k_e1, k_e2, k_p = jax.random.split(key, 4)

    x = jax.random.normal(k_x, (n_nodes, input_dim), jnp.float32)
    internal_edge_index = jax.random.randint(
        k_e1, (2, n_int_edges), 0, n_nodes, dtype=jnp.int32)
    all_edge_index = jax.random.randint(
        k_e2, (2, n_all_edges), 0, n_nodes, dtype=jnp.int32)

    params = init_params(k_p, input_dim, hidden_dim, embedding_dim, num_class)

    forward = jax.jit(gcn_decoder_forward,
                      static_argnames=("num_node", "num_class"))
    output, ypred = forward(params, x, internal_edge_index, all_edge_index,
                            num_node, num_class)
    jax.block_until_ready((output, ypred))

    assert output.shape == (batch, num_class)
    assert ypred.shape == (batch,)
    assert bool(jnp.all(jnp.isfinite(output)))
    print("KERNEL_OK")
</pallas_src>

<mosaic_0001>
module attributes {stable_mosaic.version = 11 : i64} {
  func.func @_gcn_decoder_kernel(%arg0: memref<128x128xbf16, #tpu.memory_space<vmem>>, %arg1: memref<128x128xbf16, #tpu.memory_space<vmem>>, %arg2: memref<128x1xf32, #tpu.memory_space<vmem>>, %arg3: memref<128x1xf32, #tpu.memory_space<vmem>>, %arg4: memref<128x128xbf16, #tpu.memory_space<vmem>>, %arg5: memref<8x128xbf16, #tpu.memory_space<vmem>>, %arg6: memref<8x128x128xbf16, #tpu.memory_space<vmem>>, %arg7: memref<256x128xbf16, #tpu.memory_space<vmem>>, %arg8: memref<9x128xf32, #tpu.memory_space<vmem>>, %arg9: memref<6x128xf32, #tpu.memory_space<vmem>>, %arg10: memref<6x128xf32, #tpu.memory_space<vmem>>, %arg11: memref<8x128xf32, #tpu.memory_space<vmem>>) attributes {dimension_semantics = [], scalar_prefetch = 0 : i64, scratch_operands = 0 : i64, tpu.core_type = #tpu.core_type<tc>} {
    %c0 = arith.constant 0 : index
    %c0_0 = arith.constant 0 : index
    %0 = vector.load %arg0[%c0, %c0_0] : memref<128x128xbf16, #tpu.memory_space<vmem>>, vector<128x128xbf16>
    %c0_1 = arith.constant 0 : index
    %c0_2 = arith.constant 0 : index
    %1 = vector.load %arg1[%c0_1, %c0_2] : memref<128x128xbf16, #tpu.memory_space<vmem>>, vector<128x128xbf16>
    %c0_3 = arith.constant 0 : index
    %c0_4 = arith.constant 0 : index
    %2 = vector.load %arg2[%c0_3, %c0_4] : memref<128x1xf32, #tpu.memory_space<vmem>>, vector<128x1xf32>
    %c0_5 = arith.constant 0 : index
    %c0_6 = arith.constant 0 : index
    %3 = vector.load %arg3[%c0_5, %c0_6] : memref<128x1xf32, #tpu.memory_space<vmem>>, vector<128x1xf32>
    %c0_7 = arith.constant 0 : index
    %c0_8 = arith.constant 0 : index
    %4 = vector.load %arg4[%c0_7, %c0_8] : memref<128x128xbf16, #tpu.memory_space<vmem>>, vector<128x128xbf16>
    %c0_9 = arith.constant 0 : index
    %c0_10 = arith.constant 0 : index
    %c0_11 = arith.constant 0 : index
    %5 = vector.load %arg6[%c0_9, %c0_10, %c0_11] : memref<8x128x128xbf16, #tpu.memory_space<vmem>>, vector<1x128x128xbf16>
    %6 = vector.shape_cast %5 : vector<1x128x128xbf16> to vector<128x128xbf16>
    %cst = arith.constant dense<0.000000e+00> : vector<128x128xf32>
    %7 = tpu.matmul %4, %6, %cst {dimension_numbers = #tpu.dot_dimension_numbers<[1], [0], [0], [1], [0, 0, 1, 1], [], []>} : vector<128x128xbf16>, vector<128x128xbf16>, vector<128x128xf32> -> vector<128x128xf32>
    %c0_12 = arith.constant 0 : index
    %c0_13 = arith.constant 0 : index
    %8 = vector.load %arg8[%c0_12, %c0_13] : memref<9x128xf32, #tpu.memory_space<vmem>>, vector<1x128xf32>
    %9 = vector.broadcast %8 : vector<1x128xf32> to vector<128x128xf32>
    %10 = arith.addf %7, %9 : vector<128x128xf32>
    %11 = arith.truncf %10 : vector<128x128xf32> to vector<128x128xbf16>
    %c1 = arith.constant 1 : index
    %c0_14 = arith.constant 0 : index
    %c0_15 = arith.constant 0 : index
    %12 = vector.load %arg6[%c1, %c0_14, %c0_15] : memref<8x128x128xbf16, #tpu.memory_space<vmem>>, vector<1x128x128xbf16>
    %13 = vector.shape_cast %12 : vector<1x128x128xbf16> to vector<128x128xbf16>
    %cst_16 = arith.constant dense<0.000000e+00> : vector<128x128xf32>
    %14 = tpu.matmul %11, %13, %cst_16 {dimension_numbers = #tpu.dot_dimension_numbers<[1], [0], [0], [1], [0, 0, 1, 1], [], []>} : vector<128x128xbf16>, vector<128x128xbf16>, vector<128x128xf32> -> vector<128x128xf32>
    %15 = arith.truncf %14 : vector<128x128xf32> to vector<128x128xbf16>
    %cst_17 = arith.constant dense<0.000000e+00> : vector<128x128xf32>
    %16 = tpu.matmul %0, %15, %cst_17 {dimension_numbers = #tpu.dot_dimension_numbers<[1], [0], [0], [1], [0, 0, 1, 1], [], []>} : vector<128x128xbf16>, vector<128x128xbf16>, vector<128x128xf32> -> vector<128x128xf32>
    %c1_18 = arith.constant 1 : index
    %c0_19 = arith.constant 0 : index
    %17 = vector.load %arg8[%c1_18, %c0_19] : memref<9x128xf32, #tpu.memory_space<vmem>>, vector<1x128xf32>
    %18 = vector.broadcast %2 : vector<128x1xf32> to vector<128x128xf32>
    %19 = vector.broadcast %17 : vector<1x128xf32> to vector<128x128xf32>
    %20 = arith.mulf %18, %19 : vector<128x128xf32>
    %21 = arith.addf %16, %20 : vector<128x128xf32>
    %cst_20 = arith.constant dense<0.000000e+00> : vector<128xf32>
    %22 = vector.multi_reduction <add>, %21, %cst_20 [0] : vector<128x128xf32> to vector<128xf32>
    %23 = vector.shape_cast %22 : vector<128xf32> to vector<1x128xf32>
    %cst_21 = arith.constant 6.250000e-02 : f32
    %24 = vector.broadcast %cst_21 : f32 to vector<1x128xf32>
    %25 = arith.mulf %23, %24 : vector<1x128xf32>
    %26 = arith.mulf %21, %21 : vector<128x128xf32>
    %cst_22 = arith.constant dense<0.000000e+00> : vector<128xf32>
    %27 = vector.multi_reduction <add>, %26, %cst_22 [0] : vector<128x128xf32> to vector<128xf32>
    %28 = vector.shape_cast %27 : vector<128xf32> to vector<1x128xf32>
    %cst_23 = arith.constant 6.250000e-02 : f32
    %29 = vector.broadcast %cst_23 : f32 to vector<1x128xf32>
    %30 = arith.mulf %28, %29 : vector<1x128xf32>
    %31 = arith.mulf %25, %25 : vector<1x128xf32>
    %32 = arith.subf %30, %31 : vector<1x128xf32>
    %cst_24 = arith.constant 0.000000e+00 : f32
    %33 = vector.broadcast %cst_24 : f32 to vector<1x128xf32>
    %34 = arith.maximumf %32, %33 : vector<1x128xf32>
    %c0_25 = arith.constant 0 : index
    %c0_26 = arith.constant 0 : index
    %35 = vector.load %arg9[%c0_25, %c0_26] : memref<6x128xf32, #tpu.memory_space<vmem>>, vector<1x128xf32>
    %cst_27 = arith.constant 9.99999974E-6 : f32
    %36 = vector.broadcast %cst_27 : f32 to vector<1x128xf32>
    %37 = arith.addf %34, %36 : vector<1x128xf32>
    %38 = math.rsqrt %37 : vector<1x128xf32>
    %39 = arith.mulf %35, %38 : vector<1x128xf32>
    %40 = vector.broadcast %39 : vector<1x128xf32> to vector<128x128xf32>
    %41 = arith.mulf %21, %40 : vector<128x128xf32>
    %c0_28 = arith.constant 0 : index
    %c0_29 = arith.constant 0 : index
    %42 = vector.load %arg10[%c0_28, %c0_29] : memref<6x128xf32, #tpu.memory_space<vmem>>, vector<1x128xf32>
    %43 = arith.mulf %25, %39 : vector<1x128xf32>
    %44 = arith.subf %42, %43 : vector<1x128xf32>
    %45 = vector.broadcast %44 : vector<1x128xf32> to vector<128x128xf32>
    %46 = arith.addf %41, %45 : vector<128x128xf32>
    %cst_30 = arith.constant 0.000000e+00 : f32
    %47 = vector.broadcast %cst_30 : f32 to vector<128x128xf32>
    %48 = arith.maximumf %46, %47 : vector<128x128xf32>
    %49 = arith.truncf %48 : vector<128x128xf32> to vector<128x128xbf16>
    %c2 = arith.constant 2 : index
    %c0_31 = arith.constant 0 : index
    %c0_32 = arith.constant 0 : index
    %50 = vector.load %arg6[%c2, %c0_31, %c0_32] : memref<8x128x128xbf16, #tpu.memory_space<vmem>>, vector<1x128x128xbf16>
    %51 = vector.shape_cast %50 : vector<1x128x128xbf16> to vector<128x128xbf16>
    %cst_33 = arith.constant dense<0.000000e+00> : vector<128x128xf32>
    %52 = tpu.matmul %49, %51, %cst_33 {dimension_numbers = #tpu.dot_dimension_numbers<[1], [0], [0], [1], [0, 0, 1, 1], [], []>} : vector<128x128xbf16>, vector<128x128xbf16>, vector<128x128xf32> -> vector<128x128xf32>
    %53 = arith.truncf %52 : vector<128x128xf32> to vector<128x128xbf16>
    %cst_34 = arith.constant dense<0.000000e+00> : vector<128x128xf32>
    %54 = tpu.matmul %0, %53, %cst_34 {dimension_numbers = #tpu.dot_dimension_numbers<[1], [0], [0], [1], [0, 0, 1, 1], [], []>} : vector<128x128xbf16>, vector<128x128xbf16>, vector<128x128xf32> -> vector<128x128xf32>
    %c2_35 = arith.constant 2 : index
    %c0_36 = arith.constant 0 : index
    %55 = vector.load %arg8[%c2_35, %c0_36] : memref<9x128xf32, #tpu.memory_space<vmem>>, vector<1x128xf32>
    %56 = vector.broadcast %2 : vector<128x1xf32> to vector<128x128xf32>
    %57 = vector.broadcast %55 : vector<1x128xf32> to vector<128x128xf32>
    %58 = arith.mulf %56, %57 : vector<128x128xf32>
    %59 = arith.addf %54, %58 : vector<128x128xf32>
    %cst_37 = arith.constant dense<0.000000e+00> : vector<128xf32>
    %60 = vector.multi_reduction <add>, %59, %cst_37 [0] : vector<128x128xf32> to vector<128xf32>
    %61 = vector.shape_cast %60 : vector<128xf32> to vector<1x128xf32>
    %cst_38 = arith.constant 6.250000e-02 : f32
    %62 = vector.broadcast %cst_38 : f32 to vector<1x128xf32>
    %63 = arith.mulf %61, %62 : vector<1x128xf32>
    %64 = arith.mulf %59, %59 : vector<128x128xf32>
    %cst_39 = arith.constant dense<0.000000e+00> : vector<128xf32>
    %65 = vector.multi_reduction <add>, %64, %cst_39 [0] : vector<128x128xf32> to vector<128xf32>
    %66 = vector.shape_cast %65 : vector<128xf32> to vector<1x128xf32>
    %cst_40 = arith.constant 6.250000e-02 : f32
    %67 = vector.broadcast %cst_40 : f32 to vector<1x128xf32>
    %68 = arith.mulf %66, %67 : vector<1x128xf32>
    %69 = arith.mulf %63, %63 : vector<1x128xf32>
    %70 = arith.subf %68, %69 : vector<1x128xf32>
    %cst_41 = arith.constant 0.000000e+00 : f32
    %71 = vector.broadcast %cst_41 : f32 to vector<1x128xf32>
    %72 = arith.maximumf %70, %71 : vector<1x128xf32>
    %c1_42 = arith.constant 1 : index
    %c0_43 = arith.constant 0 : index
    %73 = vector.load %arg9[%c1_42, %c0_43] : memref<6x128xf32, #tpu.memory_space<vmem>>, vector<1x128xf32>
    %cst_44 = arith.constant 9.99999974E-6 : f32
    %74 = vector.broadcast %cst_44 : f32 to vector<1x128xf32>
    %75 = arith.addf %72, %74 : vector<1x128xf32>
    %76 = math.rsqrt %75 : vector<1x128xf32>
    %77 = arith.mulf %73, %76 : vector<1x128xf32>
    %78 = vector.broadcast %77 : vector<1x128xf32> to vector<128x128xf32>
    %79 = arith.mulf %59, %78 : vector<128x128xf32>
    %c1_45 = arith.constant 1 : index
    %c0_46 = arith.constant 0 : index
    %80 = vector.load %arg10[%c1_45, %c0_46] : memref<6x128xf32, #tpu.memory_space<vmem>>, vector<1x128xf32>
    %81 = arith.mulf %63, %77 : vector<1x128xf32>
    %82 = arith.subf %80, %81 : vector<1x128xf32>
    %83 = vector.broadcast %82 : vector<1x128xf32> to vector<128x128xf32>
    %84 = arith.addf %79, %83 : vector<128x128xf32>
    %cst_47 = arith.constant 0.000000e+00 : f32
    %85 = vector.broadcast %cst_47 : f32 to vector<128x128xf32>
    %86 = arith.maximumf %84, %85 : vector<128x128xf32>
    %87 = arith.truncf %86 : vector<128x128xf32> to vector<128x128xbf16>
    %c3 = arith.constant 3 : index
    %c0_48 = arith.constant 0 : index
    %c0_49 = arith.constant 0 : index
    %88 = vector.load %arg6[%c3, %c0_48, %c0_49] : memref<8x128x128xbf16, #tpu.memory_space<vmem>>, vector<1x128x128xbf16>
    %89 = vector.shape_cast %88 : vector<1x128x128xbf16> to vector<128x128xbf16>
    %cst_50 = arith.constant dense<0.000000e+00> : vector<128x128xf32>
    %90 = tpu.matmul %87, %89, %cst_50 {dimension_numbers = #tpu.dot_dimension_numbers<[1], [0], [0], [1], [0, 0, 1, 1], [], []>} : vector<128x128xbf16>, vector<128x128xbf16>, vector<128x128xf32> -> vector<128x128xf32>
    %91 = arith.truncf %90 : vector<128x128xf32> to vector<128x128xbf16>
    %cst_51 = arith.constant dense<0.000000e+00> : vector<128x128xf32>
    %92 = tpu.matmul %0, %91, %cst_51 {dimension_numbers = #tpu.dot_dimension_numbers<[1], [0], [0], [1], [0, 0, 1, 1], [], []>} : vector<128x128xbf16>, vector<128x128xbf16>, vector<128x128xf32> -> vector<128x128xf32>
    %c3_52 = arith.constant 3 : index
    %c0_53 = arith.constant 0 : index
    %93 = vector.load %arg8[%c3_52, %c0_53] : memref<9x128xf32, #tpu.memory_space<vmem>>, vector<1x128xf32>
    %94 = vector.broadcast %2 : vector<128x1xf32> to vector<128x128xf32>
    %95 = vector.broadcast %93 : vector<1x128xf32> to vector<128x128xf32>
    %96 = arith.mulf %94, %95 : vector<128x128xf32>
    %97 = arith.addf %92, %96 : vector<128x128xf32>
    %cst_54 = arith.constant dense<0.000000e+00> : vector<128xf32>
    %98 = vector.multi_reduction <add>, %97, %cst_54 [0] : vector<128x128xf32> to vector<128xf32>
    %99 = vector.shape_cast %98 : vector<128xf32> to vector<1x128xf32>
    %cst_55 = arith.constant 6.250000e-02 : f32
    %100 = vector.broadcast %cst_55 : f32 to vector<1x128xf32>
    %101 = arith.mulf %99, %100 : vector<1x128xf32>
    %102 = arith.mulf %97, %97 : vector<128x128xf32>
    %cst_56 = arith.constant dense<0.000000e+00> : vector<128xf32>
    %103 = vector.multi_reduction <add>, %102, %cst_56 [0] : vector<128x128xf32> to vector<128xf32>
    %104 = vector.shape_cast %103 : vector<128xf32> to vector<1x128xf32>
    %cst_57 = arith.constant 6.250000e-02 : f32
    %105 = vector.broadcast %cst_57 : f32 to vector<1x128xf32>
    %106 = arith.mulf %104, %105 : vector<1x128xf32>
    %107 = arith.mulf %101, %101 : vector<1x128xf32>
    %108 = arith.subf %106, %107 : vector<1x128xf32>
    %cst_58 = arith.constant 0.000000e+00 : f32
    %109 = vector.broadcast %cst_58 : f32 to vector<1x128xf32>
    %110 = arith.maximumf %108, %109 : vector<1x128xf32>
    %c2_59 = arith.constant 2 : index
    %c0_60 = arith.constant 0 : index
    %111 = vector.load %arg9[%c2_59, %c0_60] : memref<6x128xf32, #tpu.memory_space<vmem>>, vector<1x128xf32>
    %cst_61 = arith.constant 9.99999974E-6 : f32
    %112 = vector.broadcast %cst_61 : f32 to vector<1x128xf32>
    %113 = arith.addf %110, %112 : vector<1x128xf32>
    %114 = math.rsqrt %113 : vector<1x128xf32>
    %115 = arith.mulf %111, %114 : vector<1x128xf32>
    %116 = vector.broadcast %115 : vector<1x128xf32> to vector<128x128xf32>
    %117 = arith.mulf %97, %116 : vector<128x128xf32>
    %c2_62 = arith.constant 2 : index
    %c0_63 = arith.constant 0 : index
    %118 = vector.load %arg10[%c2_62, %c0_63] : memref<6x128xf32, #tpu.memory_space<vmem>>, vector<1x128xf32>
    %119 = arith.mulf %101, %115 : vector<1x128xf32>
    %120 = arith.subf %118, %119 : vector<1x128xf32>
    %121 = vector.broadcast %120 : vector<1x128xf32> to vector<128x128xf32>
    %122 = arith.addf %117, %121 : vector<128x128xf32>
    %cst_64 = arith.constant 0.000000e+00 : f32
    %123 = vector.broadcast %cst_64 : f32 to vector<128x128xf32>
    %124 = arith.maximumf %122, %123 : vector<128x128xf32>
    %125 = arith.truncf %124 : vector<128x128xf32> to vector<128x128xbf16>
    %126 = tpu.concatenate %4, %125 in 1 : vector<128x128xbf16>, vector<128x128xbf16> -> vector<128x256xbf16>
    %c0_65 = arith.constant 0 : index
    %c0_66 = arith.constant 0 : index
    %127 = vector.load %arg7[%c0_65, %c0_66] : memref<256x128xbf16, #tpu.memory_space<vmem>>, vector<256x128xbf16>
    %cst_67 = arith.constant dense<0.000000e+00> : vector<128x128xf32>
    %128 = tpu.matmul %126, %127, %cst_67 {dimension_numbers = #tpu.dot_dimension_numbers<[1], [0], [0], [1], [0, 0, 1, 1], [], []>} : vector<128x256xbf16>, vector<256x128xbf16>, vector<128x128xf32> -> vector<128x128xf32>
    %c4 = arith.constant 4 : index
    %c0_68 = arith.constant 0 : index
    %129 = vector.load %arg8[%c4, %c0_68] : memref<9x128xf32, #tpu.memory_space<vmem>>, vector<1x128xf32>
    %130 = vector.broadcast %129 : vector<1x128xf32> to vector<128x128xf32>
    %131 = arith.addf %128, %130 : vector<128x128xf32>
    %132 = arith.truncf %131 : vector<128x128xf32> to vector<128x128xbf16>
    %c4_69 = arith.constant 4 : index
    %c0_70 = arith.constant 0 : index
    %c0_71 = arith.constant 0 : index
    %133 = vector.load %arg6[%c4_69, %c0_70, %c0_71] : memref<8x128x128xbf16, #tpu.memory_space<vmem>>, vector<1x128x128xbf16>
    %134 = vector.shape_cast %133 : vector<1x128x128xbf16> to vector<128x128xbf16>
    %cst_72 = arith.constant dense<0.000000e+00> : vector<128x128xf32>
    %135 = tpu.matmul %132, %134, %cst_72 {dimension_numbers = #tpu.dot_dimension_numbers<[1], [0], [0], [1], [0, 0, 1, 1], [], []>} : vector<128x128xbf16>, vector<128x128xbf16>, vector<128x128xf32> -> vector<128x128xf32>
    %136 = arith.truncf %135 : vector<128x128xf32> to vector<128x128xbf16>
    %cst_73 = arith.constant dense<0.000000e+00> : vector<128x128xf32>
    %137 = tpu.matmul %1, %136, %cst_73 {dimension_numbers = #tpu.dot_dimension_numbers<[1], [0], [0], [1], [0, 0, 1, 1], [], []>} : vector<128x128xbf16>, vector<128x128xbf16>, vector<128x128xf32> -> vector<128x128xf32>
    %c5 = arith.constant 5 : index
    %c0_74 = arith.constant 0 : index
    %138 = vector.load %arg8[%c5, %c0_74] : memref<9x128xf32, #tpu.memory_space<vmem>>, vector<1x128xf32>
    %139 = vector.broadcast %3 : vector<128x1xf32> to vector<128x128xf32>
    %140 = vector.broadcast %138 : vector<1x128xf32> to vector<128x128xf32>
    %141 = arith.mulf %139, %140 : vector<128x128xf32>
    %142 = arith.addf %137, %141 : vector<128x128xf32>
    %cst_75 = arith.constant dense<0.000000e+00> : vector<128xf32>
    %143 = vector.multi_reduction <add>, %142, %cst_75 [0] : vector<128x128xf32> to vector<128xf32>
    %144 = vector.shape_cast %143 : vector<128xf32> to vector<1x128xf32>
    %cst_76 = arith.constant 6.250000e-02 : f32
    %145 = vector.broadcast %cst_76 : f32 to vector<1x128xf32>
    %146 = arith.mulf %144, %145 : vector<1x128xf32>
    %147 = arith.mulf %142, %142 : vector<128x128xf32>
    %cst_77 = arith.constant dense<0.000000e+00> : vector<128xf32>
    %148 = vector.multi_reduction <add>, %147, %cst_77 [0] : vector<128x128xf32> to vector<128xf32>
    %149 = vector.shape_cast %148 : vector<128xf32> to vector<1x128xf32>
    %cst_78 = arith.constant 6.250000e-02 : f32
    %150 = vector.broadcast %cst_78 : f32 to vector<1x128xf32>
    %151 = arith.mulf %149, %150 : vector<1x128xf32>
    %152 = arith.mulf %146, %146 : vector<1x128xf32>
    %153 = arith.subf %151, %152 : vector<1x128xf32>
    %cst_79 = arith.constant 0.000000e+00 : f32
    %154 = vector.broadcast %cst_79 : f32 to vector<1x128xf32>
    %155 = arith.maximumf %153, %154 : vector<1x128xf32>
    %c3_80 = arith.constant 3 : index
    %c0_81 = arith.constant 0 : index
    %156 = vector.load %arg9[%c3_80, %c0_81] : memref<6x128xf32, #tpu.memory_space<vmem>>, vector<1x128xf32>
    %cst_82 = arith.constant 9.99999974E-6 : f32
    %157 = vector.broadcast %cst_82 : f32 to vector<1x128xf32>
    %158 = arith.addf %155, %157 : vector<1x128xf32>
    %159 = math.rsqrt %158 : vector<1x128xf32>
    %160 = arith.mulf %156, %159 : vector<1x128xf32>
    %161 = vector.broadcast %160 : vector<1x128xf32> to vector<128x128xf32>
    %162 = arith.mulf %142, %161 : vector<128x128xf32>
    %c3_83 = arith.constant 3 : index
    %c0_84 = arith.constant 0 : index
    %163 = vector.load %arg10[%c3_83, %c0_84] : memref<6x128xf32, #tpu.memory_space<vmem>>, vector<1x128xf32>
    %164 = arith.mulf %146, %160 : vector<1x128xf32>
    %165 = arith.subf %163, %164 : vector<1x128xf32>
    %166 = vector.broadcast %165 : vector<1x128xf32> to vector<128x128xf32>
    %167 = arith.addf %162, %166 : vector<128x128xf32>
    %cst_85 = arith.constant 1.000000e-01 : f32
    %168 = vector.broadcast %cst_85 : f32 to vector<128x128xf32>
    %169 = arith.mulf %168, %167 : vector<128x128xf32>
    %170 = arith.maximumf %167, %169 : vector<128x128xf32>
    %171 = arith.truncf %170 : vector<128x128xf32> to vector<128x128xbf16>
    %c5_86 = arith.constant 5 : index
    %c0_87 = arith.constant 0 : index
    %c0_88 = arith.constant 0 : index
    %172 = vector.load %arg6[%c5_86, %c0_87, %c0_88] : memref<8x128x128xbf16, #tpu.memory_space<vmem>>, vector<1x128x128xbf16>
    %173 = vector.shape_cast %172 : vector<1x128x128xbf16> to vector<128x128xbf16>
    %cst_89 = arith.constant dense<0.000000e+00> : vector<128x128xf32>
    %174 = tpu.matmul %171, %173, %cst_89 {dimension_numbers = #tpu.dot_dimension_numbers<[1], [0], [0], [1], [0, 0, 1, 1], [], []>} : vector<128x128xbf16>, vector<128x128xbf16>, vector<128x128xf32> -> vector<128x128xf32>
    %175 = arith.truncf %174 : vector<128x128xf32> to vector<128x128xbf16>
    %cst_90 = arith.constant dense<0.000000e+00> : vector<128x128xf32>
    %176 = tpu.matmul %1, %175, %cst_90 {dimension_numbers = #tpu.dot_dimension_numbers<[1], [0], [0], [1], [0, 0, 1, 1], [], []>} : vector<128x128xbf16>, vector<128x128xbf16>, vector<128x128xf32> -> vector<128x128xf32>
    %c6 = arith.constant 6 : index
    %c0_91 = arith.constant 0 : index
    %177 = vector.load %arg8[%c6, %c0_91] : memref<9x128xf32, #tpu.memory_space<vmem>>, vector<1x128xf32>
    %178 = vector.broadcast %3 : vector<128x1xf32> to vector<128x128xf32>
    %179 = vector.broadcast %177 : vector<1x128xf32> to vector<128x128xf32>
    %180 = arith.mulf %178, %179 : vector<128x128xf32>
    %181 = arith.addf %176, %180 : vector<128x128xf32>
    %cst_92 = arith.constant dense<0.000000e+00> : vector<128xf32>
    %182 = vector.multi_reduction <add>, %181, %cst_92 [0] : vector<128x128xf32> to vector<128xf32>
    %183 = vector.shape_cast %182 : vector<128xf32> to vector<1x128xf32>
    %cst_93 = arith.constant 6.250000e-02 : f32
    %184 = vector.broadcast %cst_93 : f32 to vector<1x128xf32>
    %185 = arith.mulf %183, %184 : vector<1x128xf32>
    %186 = arith.mulf %181, %181 : vector<128x128xf32>
    %cst_94 = arith.constant dense<0.000000e+00> : vector<128xf32>
    %187 = vector.multi_reduction <add>, %186, %cst_94 [0] : vector<128x128xf32> to vector<128xf32>
    %188 = vector.shape_cast %187 : vector<128xf32> to vector<1x128xf32>
    %cst_95 = arith.constant 6.250000e-02 : f32
    %189 = vector.broadcast %cst_95 : f32 to vector<1x128xf32>
    %190 = arith.mulf %188, %189 : vector<1x128xf32>
    %191 = arith.mulf %185, %185 : vector<1x128xf32>
    %192 = arith.subf %190, %191 : vector<1x128xf32>
    %cst_96 = arith.constant 0.000000e+00 : f32
    %193 = vector.broadcast %cst_96 : f32 to vector<1x128xf32>
    %194 = arith.maximumf %192, %193 : vector<1x128xf32>
    %c4_97 = arith.constant 4 : index
    %c0_98 = arith.constant 0 : index
    %195 = vector.load %arg9[%c4_97, %c0_98] : memref<6x128xf32, #tpu.memory_space<vmem>>, vector<1x128xf32>
    %cst_99 = arith.constant 9.99999974E-6 : f32
    %196 = vector.broadcast %cst_99 : f32 to vector<1x128xf32>
    %197 = arith.addf %194, %196 : vector<1x128xf32>
    %198 = math.rsqrt %197 : vector<1x128xf32>
    %199 = arith.mulf %195, %198 : vector<1x128xf32>
    %200 = vector.broadcast %199 : vector<1x128xf32> to vector<128x128xf32>
    %201 = arith.mulf %181, %200 : vector<128x128xf32>
    %c4_100 = arith.constant 4 : index
    %c0_101 = arith.constant 0 : index
    %202 = vector.load %arg10[%c4_100, %c0_101] : memref<6x128xf32, #tpu.memory_space<vmem>>, vector<1x128xf32>
    %203 = arith.mulf %185, %199 : vector<1x128xf32>
    %204 = arith.subf %202, %203 : vector<1x128xf32>
    %205 = vector.broadcast %204 : vector<1x128xf32> to vector<128x128xf32>
    %206 = arith.addf %201, %205 : vector<128x128xf32>
    %cst_102 = arith.constant 1.000000e-01 : f32
    %207 = vector.broadcast %cst_102 : f32 to vector<128x128xf32>
    %208 = arith.mulf %207, %206 : vector<128x128xf32>
    %209 = arith.maximumf %206, %208 : vector<128x128xf32>
    %210 = arith.truncf %209 : vector<128x128xf32> to vector<128x128xbf16>
    %c6_103 = arith.constant 6 : index
    %c0_104 = arith.constant 0 : index
    %c0_105 = arith.constant 0 : index
    %211 = vector.load %arg6[%c6_103, %c0_104, %c0_105] : memref<8x128x128xbf16, #tpu.memory_space<vmem>>, vector<1x128x128xbf16>
    %212 = vector.shape_cast %211 : vector<1x128x128xbf16> to vector<128x128xbf16>
    %cst_106 = arith.constant dense<0.000000e+00> : vector<128x128xf32>
    %213 = tpu.matmul %210, %212, %cst_106 {dimension_numbers = #tpu.dot_dimension_numbers<[1], [0], [0], [1], [0, 0, 1, 1], [], []>} : vector<128x128xbf16>, vector<128x128xbf16>, vector<128x128xf32> -> vector<128x128xf32>
    %214 = arith.truncf %213 : vector<128x128xf32> to vector<128x128xbf16>
    %cst_107 = arith.constant dense<0.000000e+00> : vector<128x128xf32>
    %215 = tpu.matmul %1, %214, %cst_107 {dimension_numbers = #tpu.dot_dimension_numbers<[1], [0], [0], [1], [0, 0, 1, 1], [], []>} : vector<128x128xbf16>, vector<128x128xbf16>, vector<128x128xf32> -> vector<128x128xf32>
    %c7 = arith.constant 7 : index
    %c0_108 = arith.constant 0 : index
    %216 = vector.load %arg8[%c7, %c0_108] : memref<9x128xf32, #tpu.memory_space<vmem>>, vector<1x128xf32>
    %217 = vector.broadcast %3 : vector<128x1xf32> to vector<128x128xf32>
    %218 = vector.broadcast %216 : vector<1x128xf32> to vector<128x128xf32>
    %219 = arith.mulf %217, %218 : vector<128x128xf32>
    %220 = arith.addf %215, %219 : vector<128x128xf32>
    %cst_109 = arith.constant dense<0.000000e+00> : vector<128xf32>
    %221 = vector.multi_reduction <add>, %220, %cst_109 [0] : vector<128x128xf32> to vector<128xf32>
    %222 = vector.shape_cast %221 : vector<128xf32> to vector<1x128xf32>
    %cst_110 = arith.constant 6.250000e-02 : f32
    %223 = vector.broadcast %cst_110 : f32 to vector<1x128xf32>
    %224 = arith.mulf %222, %223 : vector<1x128xf32>
    %225 = arith.mulf %220, %220 : vector<128x128xf32>
    %cst_111 = arith.constant dense<0.000000e+00> : vector<128xf32>
    %226 = vector.multi_reduction <add>, %225, %cst_111 [0] : vector<128x128xf32> to vector<128xf32>
    %227 = vector.shape_cast %226 : vector<128xf32> to vector<1x128xf32>
    %cst_112 = arith.constant 6.250000e-02 : f32
    %228 = vector.broadcast %cst_112 : f32 to vector<1x128xf32>
    %229 = arith.mulf %227, %228 : vector<1x128xf32>
    %230 = arith.mulf %224, %224 : vector<1x128xf32>
    %231 = arith.subf %229, %230 : vector<1x128xf32>
    %cst_113 = arith.constant 0.000000e+00 : f32
    %232 = vector.broadcast %cst_113 : f32 to vector<1x128xf32>
    %233 = arith.maximumf %231, %232 : vector<1x128xf32>
    %c5_114 = arith.constant 5 : index
    %c0_115 = arith.constant 0 : index
    %234 = vector.load %arg9[%c5_114, %c0_115] : memref<6x128xf32, #tpu.memory_space<vmem>>, vector<1x128xf32>
    %cst_116 = arith.constant 9.99999974E-6 : f32
    %235 = vector.broadcast %cst_116 : f32 to vector<1x128xf32>
    %236 = arith.addf %233, %235 : vector<1x128xf32>
    %237 = math.rsqrt %236 : vector<1x128xf32>
    %238 = arith.mulf %234, %237 : vector<1x128xf32>
    %239 = vector.broadcast %238 : vector<1x128xf32> to vector<128x128xf32>
    %240 = arith.mulf %220, %239 : vector<128x128xf32>
    %c5_117 = arith.constant 5 : index
    %c0_118 = arith.constant 0 : index
    %241 = vector.load %arg10[%c5_117, %c0_118] : memref<6x128xf32, #tpu.memory_space<vmem>>, vector<1x128xf32>
    %242 = arith.mulf %224, %238 : vector<1x128xf32>
    %243 = arith.subf %241, %242 : vector<1x128xf32>
    %244 = vector.broadcast %243 : vector<1x128xf32> to vector<128x128xf32>
    %245 = arith.addf %240, %244 : vector<128x128xf32>
    %cst_119 = arith.constant 1.000000e-01 : f32
    %246 = vector.broadcast %cst_119 : f32 to vector<128x128xf32>
    %247 = arith.mulf %246, %245 : vector<128x128xf32>
    %248 = arith.maximumf %245, %247 : vector<128x128xf32>
    %249 = arith.truncf %248 : vector<128x128xf32> to vector<128x128xbf16>
    %c0_120 = arith.constant 0 : index
    %c0_121 = arith.constant 0 : index
    %250 = vector.load %arg5[%c0_120, %c0_121] : memref<8x128xbf16, #tpu.memory_space<vmem>>, vector<8x128xbf16>
    %cst_122 = arith.constant dense<0.000000e+00> : vector<8x128xf32>
    %251 = tpu.matmul %250, %249, %cst_122 {dimension_numbers = #tpu.dot_dimension_numbers<[1], [0], [0], [1], [0, 0, 1, 1], [], []>} : vector<8x128xbf16>, vector<128x128xbf16>, vector<8x128xf32> -> vector<8x128xf32>
    %cst_123 = arith.constant 1.250000e-01 : f32
    %252 = vector.broadcast %cst_123 : f32 to vector<8x128xf32>
    %253 = arith.mulf %251, %252 : vector<8x128xf32>
    %254 = arith.truncf %253 : vector<8x128xf32> to vector<8x128xbf16>
    %c7_124 = arith.constant 7 : index
    %c0_125 = arith.constant 0 : index
    %c0_126 = arith.constant 0 : index
    %255 = vector.load %arg6[%c7_124, %c0_125, %c0_126] : memref<8x128x128xbf16, #tpu.memory_space<vmem>>, vector<1x128x128xbf16>
    %256 = vector.shape_cast %255 : vector<1x128x128xbf16> to vector<128x128xbf16>
    %cst_127 = arith.constant dense<0.000000e+00> : vector<8x128xf32>
    %257 = tpu.matmul %254, %256, %cst_127 {dimension_numbers = #tpu.dot_dimension_numbers<[1], [0], [0], [1], [0, 0, 1, 1], [], []>} : vector<8x128xbf16>, vector<128x128xbf16>, vector<8x128xf32> -> vector<8x128xf32>
    %c8 = arith.constant 8 : index
    %c0_128 = arith.constant 0 : index
    %258 = vector.load %arg8[%c8, %c0_128] : memref<9x128xf32, #tpu.memory_space<vmem>>, vector<1x128xf32>
    %259 = vector.broadcast %258 : vector<1x128xf32> to vector<8x128xf32>
    %260 = arith.addf %257, %259 : vector<8x128xf32>
    %c0_129 = arith.constant 0 : index
    %c0_130 = arith.constant 0 : index
    %261 = vector.load %arg11[%c0_129, %c0_130] : memref<8x128xf32, #tpu.memory_space<vmem>>, vector<8x128xf32>
    tpu.vector_store %arg11[%c0_129, %c0_130], %260 {strides = array<i32>} : memref<8x128xf32, #tpu.memory_space<vmem>>, vector<8x128xf32>,
    return
  }
}

</mosaic_0001>

<bundles_post_ra>
// kernel: mul.2
= control target key start
LH: loop header
LB: loop body
LE: loop exit
PB: predicated region body
PF: predicated region fallthrough
CT: control target
= control target key end

     0   :  { %s34_s0 = inlined_call_operand.vmem [shape: f32[40], index: 0, kind: input, shape index: {}]   ;;  %s35_s1 = inlined_call_operand.vmem [shape: f32[40], index: 1, kind: input, shape index: {}]   ;;  %s36_s2 = inlined_call_operand.vmem [shape: f32[40], index: 2, kind: output, shape index: {}]  }
   0x1   :  { %v3_v0 = vld [vmem:[%s34_s0] sm:$0x1] }
   0x2   :  { %v4_v1 = vld [vmem:[%s35_s1] sm:$0x1] }
   0x3   :  { %v7_v2 = vmul.f32 %v4_v1, %v3_v0 }
   0x5   :  { %9 = vst [vmem:[%s36_s2] sm:$0x1] %v7_v2 }

// kernel: mul.3
= control target key start
LH: loop header
LB: loop body
LE: loop exit
PB: predicated region body
PF: predicated region fallthrough
CT: control target
= control target key end

     0   :  { %s34_s0 = inlined_call_operand.vmem [shape: f32[56], index: 0, kind: input, shape index: {}]   ;;  %s35_s1 = inlined_call_operand.vmem [shape: f32[56], index: 1, kind: input, shape index: {}]   ;;  %s36_s2 = inlined_call_operand.vmem [shape: f32[56], index: 2, kind: output, shape index: {}]  }
   0x1   :  { %v3_v0 = vld [vmem:[%s34_s0] sm:$0x1] }
   0x2   :  { %v4_v1 = vld [vmem:[%s35_s1] sm:$0x1] }
   0x3   :  { %v7_v2 = vmul.f32 %v4_v1, %v3_v0 }
   0x5   :  { %9 = vst [vmem:[%s36_s2] sm:$0x1] %v7_v2 }

// kernel: eq.13
= control target key start
LH: loop header
LB: loop body
LE: loop exit
PB: predicated region body
PF: predicated region fallthrough
CT: control target
= control target key end

     0   :  { %vm7_vm0 = vcmask 64512   ;;  %vm13_vm1 = vcmask 130112   ;;  %s39_s0 = inlined_call_operand.vmem [shape: s32[2,8], index: 0, kind: input, shape index: {}]   ;;  %s40_s1 = inlined_call_operand.vmem [shape: s32[16], index: 1, kind: output, shape index: {}]  }
   0x1   :  { %v4_v0 = vld [vmem:[%s39_s0] sm:$0x3]  ;;  %s22_s0 = smov 8  }
   0x2   :  { %5 = vst [vmem:[#allocation1] sm:$0x3] %v4_v0 }
   0x9   :  { %v10_v1 = vld [vmem:[#allocation1 + $0x1] sm:$0x1]   ;;  %v6_v2 = vld [vmem:[#allocation1] sm:$0x1]  }
   0xa   :  { %11 = vrot.lane.b32.xlu0 %v10_v1, %s22_s0  ;;  %8 = vst.msk [vmem:[#allocation0] sm:$0x1] %vm7_vm0, %v6_v2  }
  0x7c   :  { %v12_v3 = vpop.permute.xlu0 %11  }
  0x7d   :  { %14 = vst.msk [vmem:[#allocation0] sm:$0x1] %vm13_vm1, %v12_v3  }
  0x84   :  { %v18_v4 = vld [vmem:[#allocation0] sm:$0x1] }
  0x85   :  { %20 = vst [vmem:[%s40_s1] sm:$0x1] %v18_v4 }

// kernel: gcn_decoder_forward.1
= control target key start
LH: loop header
LB: loop body
LE: loop exit
PB: predicated region body
PF: predicated region fallthrough
CT: control target
= control target key end

     0   :  { %vm4689_vm0 = vmmov 0   ;;  %s6223_s6 = inlined_call_operand.vmem [shape: bf16[8,128,128], index: 6, kind: input, shape index: {}]   ;;  %s6224_s4 = inlined_call_operand.vmem [shape: bf16[128,128], index: 4, kind: input, shape index: {}]   ;;  %s6225_s8 = inlined_call_operand.vmem [shape: f32[9,128], index: 8, kind: input, shape index: {}]   ;;  %s6226_s0 = inlined_call_operand.vmem [shape: bf16[128,128], index: 0, kind: input, shape index: {}]   ;;  %s6227_s2 = inlined_call_operand.vmem [shape: f32[128,1], index: 2, kind: input, shape index: {}]   ;;  %s6228_s3 = inlined_call_operand.vmem [shape: f32[128,1], index: 3, kind: input, shape index: {}]   ;;  %s6229_s9 = inlined_call_operand.vmem [shape: f32[6,128], index: 9, kind: input, shape index: {}]   ;;  %s6230_s10 = inlined_call_operand.vmem [shape: f32[6,128], index: 10, kind: input, shape index: {}]   ;;  %s6231_s7 = inlined_call_operand.vmem [shape: bf16[256,128], index: 7, kind: input, shape index: {}]   ;;  %s6232_s1 = inlined_call_operand.vmem [shape: bf16[128,128], index: 1, kind: input, shape index: {}]   ;;  %s6233_s5 = inlined_call_operand.vmem [shape: bf16[8,128], index: 5, kind: input, shape index: {}]   ;;  %s6234_s11 = inlined_call_operand.vmem [shape: f32[8,128], index: 11, kind: output, shape index: {}]  }
   0x1   :  { %v4549_v0 = vld [vmem:[%s6223_s6] sm:$0xff]   ;;  %v4550_v1 = vld [vmem:[%s6223_s6 + $0x8] sm:$0xff]   ;;  %v4551_v2 = vld [vmem:[%s6223_s6 + $0x10] sm:$0xff]  }
   0x2   :  { %4088 = vmatprep.subr.bf16.mxu0 %v4549_v0  ;;  %v4552_v3 = vld [vmem:[%s6223_s6 + $0x18] sm:$0xff]   ;;  %v4557_v4 = vld [vmem:[%s6224_s4] sm:$0xff]   ;;  %v4554_v6 = vld [vmem:[%s6223_s6 + $0x28] sm:$0xff]  }
   0x3   :  { %4089 = vmatpush3.bf16.msra.mxu0 %v4549_v0  ;;  %4104 = vmatprep.mubr.bf16.mxu0 %v4557_v4  ;;  %v4553_v5 = vld [vmem:[%s6223_s6 + $0x20] sm:$0xff]   ;;  %v4566_v8 = vld [vmem:[%s6223_s6 + $0x48] sm:$0xff]   ;;  %v4555_v9 = vld [vmem:[%s6223_s6 + $0x30] sm:$0xff]  }
   0x4   :  { %4090 = vmatprep.subr.bf16.mxu0 %v4550_v1  ;;  %v4565_v7 = vld [vmem:[%s6223_s6 + $0x40] sm:$0xff]   ;;  %v4567_v10 = vld [vmem:[%s6223_s6 + $0x50] sm:$0xff]   ;;  %v4556_v11 = vld [vmem:[%s6223_s6 + $0x38] sm:$0xff]  }
   0x5   :  { %4120 = vmatprep.subr.bf16.mxu1 %v4565_v7  ;;  %v4568_v12 = vld [vmem:[%s6223_s6 + $0x58] sm:$0xff]   ;;  %v4569_v13 = vld [vmem:[%s6223_s6 + $0x60] sm:$0xff]   ;;  %v4558_v14 = vld [vmem:[%s6224_s4 + $0x8] sm:$0xff]  }
   0x6   :  { %4121 = vmatpush3.bf16.msra.mxu1 %v4565_v7  ;;  %v4559_v15 = vld [vmem:[%s6224_s4 + $0x10] sm:$0xff]   ;;  %v4570_v16 = vld [vmem:[%s6223_s6 + $0x68] sm:$0xff]   ;;  %v4560_v17 = vld [vmem:[%s6224_s4 + $0x18] sm:$0xff]  }
   0x7   :  { %4091 = vmatpush3.bf16.msra.mxu0 %v4550_v1  ;;  %4122 = vmatprep.subr.bf16.mxu1 %v4566_v8  ;;  %v4561_v18 = vld [vmem:[%s6224_s4 + $0x20] sm:$0xff]   ;;  %v4562_v19 = vld [vmem:[%s6224_s4 + $0x28] sm:$0xff]   ;;  %v4563_v20 = vld [vmem:[%s6224_s4 + $0x30] sm:$0xff]  }
   0x8   :  { %4092 = vmatprep.subr.bf16.mxu0 %v4551_v2  ;;  %v4564_v21 = vld [vmem:[%s6224_s4 + $0x38] sm:$0xff]   ;;  %v4571_v22 = vld [vmem:[%s6223_s6 + $0x70] sm:$0xff]   ;;  %v3573_v25 = vld [vmem:[%s6225_s8] ss:$0 sm:$0xff] }
   0x9   :  { %v4572_v23 = vld [vmem:[%s6223_s6 + $0x78] sm:$0xff]   ;;  %v4828_v1 = vld [vmem:[%s6226_s0] sm:$0xff]   ;;  %v73_v4 = vld [vmem:[%s6227_s2 + $0x10] sm:$0xff] }
   0xa   :  { %4123 = vmatpush3.bf16.msra.mxu1 %v4566_v8  ;;  %v75_v7 = vld [vmem:[%s6227_s2 + $0x20] sm:$0xff]  ;;  %v76_v8 = vld [vmem:[%s6227_s2 + $0x28] sm:$0xff] }
   0xb   :  { %4093 = vmatpush3.bf16.msra.mxu0 %v4551_v2  ;;  %4124 = vmatprep.subr.bf16.mxu1 %v4567_v10  ;;  %v4687_v2 = vmov 0  }
   0xc   :  { %4094 = vmatprep.subr.bf16.mxu0 %v4552_v3  ;;  %4547 = vset.pattern.permute.xlu0 %v4687_v2 }
   0xd   :  { %4548 = vset.pattern.permute.xlu1 %v4687_v2  ;;  %v4966_v2 = vld [vmem:[%s6226_s0 + $0x38] sm:$0xff]  }
   0xe   :  { %4125 = vmatpush3.bf16.msra.mxu1 %v4567_v10  ;;  %524 = vperm.xlu1 %4548, %v73_v4   ;;  %v78_v10 = vld [vmem:[%s6227_s2 + $0x38] sm:$0xff]  ;;  %v4582_v4 = vld [vmem:[%s6223_s6 + $0x88] sm:$0xff]  }
   0xf   :  { %4095 = vmatpush3.bf16.msra.mxu0 %v4552_v3  ;;  %4126 = vmatprep.subr.bf16.mxu1 %v4568_v12  ;;  %v71_v3 = vld [vmem:[%s6227_s2] sm:$0xff] }
  0x10   :  { %4096 = vmatprep.subr.bf16.mxu0 %v4553_v5  ;;  %514 = vperm.xlu0 %4547, %v71_v3   ;;  %v4581_v3 = vld [vmem:[%s6223_s6 + $0x80] sm:$0xff]  }
  0x12   :  { %4127 = vmatpush3.bf16.msra.mxu1 %v4568_v12  ;;  %v80_v12 = vld [vmem:[%s6227_s2 + $0x48] sm:$0xff] }
  0x13   :  { %4097 = vmatpush3.bf16.msra.mxu0 %v4553_v5  ;;  %4128 = vmatprep.subr.bf16.mxu1 %v4569_v13  ;;  %v72_v5 = vld [vmem:[%s6227_s2 + $0x8] sm:$0xff] }
  0x14   :  { %4098 = vmatprep.subr.bf16.mxu0 %v4554_v6  ;;  %519 = vperm.xlu0 %4547, %v72_v5   ;;  %v4583_v5 = vld [vmem:[%s6223_s6 + $0x90] sm:$0xff]  }
  0x16   :  { %4129 = vmatpush3.bf16.msra.mxu1 %v4569_v13  ;;  %v81_v13 = vld [vmem:[%s6227_s2 + $0x50] sm:$0xff] }
  0x17   :  { %4099 = vmatpush3.bf16.msra.mxu0 %v4554_v6  ;;  %4130 = vmatprep.subr.bf16.mxu1 %v4570_v16  ;;  %v74_v6 = vld [vmem:[%s6227_s2 + $0x18] sm:$0xff] }
  0x18   :  { %4100 = vmatprep.subr.bf16.mxu0 %v4555_v9  ;;  %529 = vperm.xlu1 %4548, %v74_v6   ;;  %v4584_v6 = vld [vmem:[%s6223_s6 + $0x98] sm:$0xff]  }
  0x19   :  { %534 = vperm.xlu0 %4547, %v75_v7   ;;  %v4585_v7 = vld [vmem:[%s6223_s6 + $0xa0] sm:$0xff]  }
  0x1a   :  { %4131 = vmatpush3.bf16.msra.mxu1 %v4570_v16  ;;  %v84_v16 = vld [vmem:[%s6227_s2 + $0x68] sm:$0xff] }
  0x1b   :  { %4101 = vmatpush3.bf16.msra.mxu0 %v4555_v9  ;;  %4132 = vmatprep.subr.bf16.mxu1 %v4571_v22  ;;  %v77_v9 = vld [vmem:[%s6227_s2 + $0x30] sm:$0xff] }
  0x1c   :  { %4102 = vmatprep.subr.bf16.mxu0 %v4556_v11  ;;  %539 = vperm.xlu1 %4548, %v76_v8   ;;  %v4586_v8 = vld [vmem:[%s6223_s6 + $0xa8] sm:$0xff]  }
  0x1d   :  { %544 = vperm.xlu0 %4547, %v77_v9   ;;  %v4587_v9 = vld [vmem:[%s6223_s6 + $0xb0] sm:$0xff]  }
  0x1e   :  { %4133 = vmatpush3.bf16.msra.mxu1 %v4571_v22  ;;  %v90_v22 = vld [vmem:[%s6228_s3 + $0x18] sm:$0xff] }
  0x1f   :  { %4103 = vmatpush3.bf16.msra.mxu0 %v4556_v11  ;;  %4134 = vmatprep.subr.bf16.mxu1 %v4572_v23  ;;  %v79_v11 = vld [vmem:[%s6227_s2 + $0x40] sm:$0xff] }
  0x20   :  { %549 = vperm.xlu1 %4548, %v78_v10   ;;  %v4588_v10 = vld [vmem:[%s6223_s6 + $0xb8] sm:$0xff]  }
  0x21   :  { %554 = vperm.xlu0 %4547, %v79_v11  }
  0x22   :  { %4105 = vmatmul.mubr.bf16.vlgmr.msra.gmra.mrb[0].mxu0 %v4558_v14  ;;  %4135 = vmatpush3.bf16.msra.mxu1 %v4572_v23  ;;  %v82_v14 = vld [vmem:[%s6227_s2 + $0x58] sm:$0xff]  ;;  %v91_v23 = vld [vmem:[%s6228_s3 + $0x20] sm:$0xff] }
  0x23   :  { %4108 = vmatprep.mubr.bf16.mxu0 %v4559_v15  ;;  %v83_v15 = vld [vmem:[%s6227_s2 + $0x60] sm:$0xff]  ;;  %4184 = vmatprep.subr.bf16.mxu1 %v4581_v3 }
  0x24   :  { %559 = vperm.xlu1 %4548, %v80_v12  }
  0x25   :  { %564 = vperm.xlu0 %4547, %v81_v13  }
  0x28   :  { %569 = vperm.xlu1 %4548, %v82_v14  }
  0x29   :  { %574 = vperm.xlu0 %4547, %v83_v15  }
  0x2a   :  { %4109 = vmatmul.mubr.bf16.gmra.mrb[4].mxu0 %v4560_v17  ;;  %v85_v17 = vld [vmem:[%s6227_s2 + $0x70] sm:$0xff] }
  0x2b   :  { %4112 = vmatprep.mubr.bf16.mxu0 %v4561_v18  ;;  %v86_v18 = vld [vmem:[%s6227_s2 + $0x78] sm:$0xff] }
  0x2c   :  { %579 = vperm.xlu1 %4548, %v84_v16  }
  0x2d   :  { %584 = vperm.xlu0 %4547, %v85_v17   ;;  %v5009_v17 = vld [vmem:[%s6225_s8 + $0x1] ss:$0 sm:$0xff] }
  0x30   :  { %589 = vperm.xlu1 %4548, %v86_v18  }
  0x32   :  { %4113 = vmatmul.mubr.bf16.gmra.mrb[8].mxu0 %v4562_v19  ;;  %v87_v19 = vld [vmem:[%s6228_s3] sm:$0xff] }
  0x33   :  { %4116 = vmatprep.mubr.bf16.mxu0 %v4563_v20  ;;  %2146 = vperm.xlu0 %4547, %v87_v19   ;;  %v88_v20 = vld [vmem:[%s6228_s3 + $0x8] sm:$0xff] }
  0x34   :  { %2151 = vperm.xlu1 %4548, %v88_v20  }
  0x38   :  { %2161 = vperm.xlu1 %4548, %v90_v22  }
  0x3a   :  { %4117 = vmatmul.mubr.bf16.gmra.mrb[12].mxu0 %v4564_v21  ;;  %v89_v21 = vld [vmem:[%s6228_s3 + $0x10] sm:$0xff] }
  0x3b   :  { %4168 = vmatprep.mubr.bf16.mxu0 %v4828_v1  ;;  %2156 = vperm.xlu0 %4547, %v89_v21  }
  0x3f   :  { %2166 = vperm.xlu0 %4547, %v91_v23  }
  0x8d   :  { %v4996_v12 = vpop.permute.xlu1 %524 }
  0x8e   :  { %v598_v19 = vmul.f32 %v5009_v17, %v4996_v12 }
  0x8f   :  { %v4994_v11 = vpop.permute.xlu0 %514 }
  0x90   :  { %v596_v21 = vmul.f32 %v5009_v17, %v4994_v11 }
  0x93   :  { %v4998_v13 = vpop.permute.xlu0 %519 }
  0x97   :  { %v5000_v14 = vpop.permute.xlu1 %529 }
  0x98   :  { %v5002_v15 = vpop.permute.xlu0 %534 }
  0x9b   :  { %v5004_v16 = vpop.permute.xlu1 %539 }
  0x9c   :  { %v5011_v18 = vpop.permute.xlu0 %544 }
  0x9f   :  { %v5017_v23 = vpop.permute.xlu1 %549 }
  0xf5   :  { %v4106_v24 = vpop.f32.mrb[0].mxu0 }
  0xf6   :  { %v270_v26 = vpop.f32.mrb[1].mxu0  ;;  %v279_v28 = vadd.f32 %v4106_v24, %v3573_v25  ;;  %v92_v24 = vld [vmem:[%s6228_s3 + $0x28] sm:$0xff] }
  0xf7   :  { %v4107_v27 = vpop.f32.mrb[2].mxu0  ;;  %v271_v31 = vadd.f32 %v3573_v25, %v270_v26  ;;  %2171 = vperm.xlu1 %4548, %v92_v24   ;;  %v94_v26 = vld [vmem:[%s6228_s3 + $0x38] sm:$0xff] }
  0xf8   :  { %v282_v29 = vadd.f32 %v4107_v27, %v3573_v25  ;;  %v273_v30 = vpop.f32.mrb[3].mxu0  ;;  %v95_v27 = vld [vmem:[%s6228_s3 + $0x40] sm:$0xff] }
  0xf9   :  { %v274_v32 = vadd.f32 %v3573_v25, %v273_v30  ;;  %v98_v30 = vld [vmem:[%s6228_s3 + $0x58] sm:$0xff] }
  0xfa   :  { %v334_v33 = vpack.c.bf16 %v282_v29, %v279_v28  ;;  %v96_v28 = vld [vmem:[%s6228_s3 + $0x48] sm:$0xff]  ;;  %v97_v29 = vld [vmem:[%s6228_s3 + $0x50] sm:$0xff] }
  0xfb   :  { %v333_v34 = vpack.c.bf16 %v274_v32, %v271_v31  ;;  %2181 = vperm.xlu1 %4548, %v94_v26   ;;  %v99_v31 = vld [vmem:[%s6228_s3 + $0x60] sm:$0xff]  ;;  %v100_v32 = vld [vmem:[%s6228_s3 + $0x68] sm:$0xff] }
  0xfd   :  { %v4110_v35 = vpop.f32.mrb[4].mxu0  ;;  %4136 = vmatprep.mubr.bf16.mxu1 %v333_v34  ;;  %v102_v34 = vld [vmem:[%s6228_s3 + $0x78] sm:$0xff] }
  0xfe   :  { %v286_v36 = vpop.f32.mrb[5].mxu0  ;;  %4137 = vmatmul.mubr.bf16.vlgmr.msra.gmra.mrb[0].mxu1 %v334_v33  ;;  %v295_v38 = vadd.f32 %v4110_v35, %v3573_v25  ;;  %v101_v33 = vld [vmem:[%s6228_s3 + $0x70] sm:$0xff] }
  0xff   :  { %v4111_v37 = vpop.f32.mrb[6].mxu0  ;;  %v287_v41 = vadd.f32 %v3573_v25, %v286_v36  ;;  %2191 = vperm.xlu1 %4548, %v96_v28   ;;  %4185 = vmatpush3.bf16.msra.mxu1 %v4581_v3 }
 0x100   :  { %v298_v39 = vadd.f32 %v4111_v37, %v3573_v25  ;;  %v289_v40 = vpop.f32.mrb[7].mxu0  ;;  %4186 = vmatprep.subr.bf16.mxu1 %v4582_v4 }
 0x101   :  { %v290_v42 = vadd.f32 %v3573_v25, %v289_v40 }
 0x102   :  { %v336_v43 = vpack.c.bf16 %v298_v39, %v295_v38 }
 0x103   :  { %v335_v44 = vpack.c.bf16 %v290_v42, %v287_v41  ;;  %2201 = vperm.xlu1 %4548, %v98_v30   ;;  %4187 = vmatpush3.bf16.msra.mxu1 %v4582_v4 }
 0x104   :  { %4188 = vmatprep.subr.bf16.mxu1 %v4583_v5 }
 0x105   :  { %v4114_v45 = vpop.f32.mrb[8].mxu0  ;;  %4140 = vmatprep.mubr.bf16.mxu1 %v335_v44 }
 0x106   :  { %v302_v46 = vpop.f32.mrb[9].mxu0  ;;  %4141 = vmatmul.mubr.bf16.gmra.mrb[4].mxu1 %v336_v43  ;;  %v311_v48 = vadd.f32 %v4114_v45, %v3573_v25 }
 0x107   :  { %v4115_v47 = vpop.f32.mrb[10].mxu0  ;;  %v303_v51 = vadd.f32 %v3573_v25, %v302_v46  ;;  %2211 = vperm.xlu1 %4548, %v100_v32   ;;  %4189 = vmatpush3.bf16.msra.mxu1 %v4583_v5 }
 0x108   :  { %v314_v49 = vadd.f32 %v4115_v47, %v3573_v25  ;;  %v305_v50 = vpop.f32.mrb[11].mxu0  ;;  %4190 = vmatprep.subr.bf16.mxu1 %v4584_v6 }
 0x109   :  { %v306_v52 = vadd.f32 %v3573_v25, %v305_v50 }
 0x10a   :  { %v338_v53 = vpack.c.bf16 %v314_v49, %v311_v48 }
 0x10b   :  { %v337_v54 = vpack.c.bf16 %v306_v52, %v303_v51  ;;  %2221 = vperm.xlu1 %4548, %v102_v34   ;;  %4191 = vmatpush3.bf16.msra.mxu1 %v4584_v6 }
 0x10c   :  { %4192 = vmatprep.subr.bf16.mxu1 %v4585_v7 }
 0x10d   :  { %v4118_v55 = vpop.f32.mrb[12].mxu0  ;;  %4144 = vmatprep.mubr.bf16.mxu1 %v337_v54 }
 0x10e   :  { %v318_v56 = vpop.f32.mrb[13].mxu0  ;;  %4145 = vmatmul.mubr.bf16.gmra.mrb[8].mxu1 %v338_v53  ;;  %v327_v58 = vadd.f32 %v4118_v55, %v3573_v25 }
 0x10f   :  { %v4119_v57 = vpop.f32.mrb[14].mxu0  ;;  %v319_v61 = vadd.f32 %v3573_v25, %v318_v56  ;;  %4193 = vmatpush3.bf16.msra.mxu1 %v4585_v7 }
 0x110   :  { %v330_v59 = vadd.f32 %v4119_v57, %v3573_v25  ;;  %v321_v60 = vpop.f32.mrb[15].mxu0  ;;  %4194 = vmatprep.subr.bf16.mxu1 %v4586_v8 }
 0x111   :  { %v322_v62 = vadd.f32 %v3573_v25, %v321_v60  ;;  %v93_v25 = vld [vmem:[%s6228_s3 + $0x30] sm:$0xff] }
 0x112   :  { %v340_v63 = vpack.c.bf16 %v330_v59, %v327_v58  ;;  %2176 = vperm.xlu0 %4547, %v93_v25   ;;  %v4930_v59 = vld [vmem:[%s6226_s0 + $0x8] sm:$0xff]   ;;  %v4935_v60 = vld [vmem:[%s6226_s0 + $0x10] sm:$0xff]   ;;  %v599_v25 = vmul.f32 %v5009_v17, %v5000_v14 }
 0x113   :  { %v339_v0 = vpack.c.bf16 %v322_v62, %v319_v61  ;;  %v4942_v61 = vld [vmem:[%s6226_s0 + $0x18] sm:$0xff]   ;;  %v4947_v62 = vld [vmem:[%s6226_s0 + $0x20] sm:$0xff]   ;;  %4195 = vmatpush3.bf16.msra.mxu1 %v4586_v8 }
 0x114   :  { %4196 = vmatprep.subr.bf16.mxu1 %v4587_v9 }
 0x115   :  { %4148 = vmatprep.mubr.bf16.mxu1 %v339_v0  ;;  %v4959_v0 = vld [vmem:[%s6226_s0 + $0x30] sm:$0xff]  }
 0x116   :  { %4149 = vmatmul.mubr.bf16.gmra.mrb[12].mxu1 %v340_v63  ;;  %2186 = vperm.xlu0 %4547, %v95_v27   ;;  %v4954_v63 = vld [vmem:[%s6226_s0 + $0x28] sm:$0xff]   ;;  %v597_v27 = vmul.f32 %v5009_v17, %v4998_v13 }
 0x117   :  { %4197 = vmatpush3.bf16.msra.mxu1 %v4587_v9 }
 0x118   :  { %4198 = vmatprep.subr.bf16.mxu1 %v4588_v10 }
 0x11a   :  { %2196 = vperm.xlu0 %4547, %v97_v29  }
 0x11b   :  { %4199 = vmatpush3.bf16.msra.mxu1 %v4588_v10 }
 0x11e   :  { %2206 = vperm.xlu0 %4547, %v99_v31   ;;  %v5029_v31 = vpop.permute.xlu0 %554 }
 0x122   :  { %2216 = vperm.xlu0 %4547, %v101_v33  }
 0x1d1   :  { %v4138_v35 = vpop.f32.mrb[0].mxu1 }
 0x1d2   :  { %v440_v36 = vpop.f32.mrb[1].mxu1 }
 0x1d3   :  { %v4139_v37 = vpop.f32.mrb[2].mxu1 }
 0x1d4   :  { %v504_v38 = vpack.c.bf16 %v4139_v37, %v4138_v35  ;;  %v443_v39 = vpop.f32.mrb[3].mxu1 }
 0x1d5   :  { %v503_v40 = vpack.c.bf16 %v443_v39, %v440_v36  ;;  %v5039_v36 = vpop.permute.xlu1 %559 }
 0x1d7   :  { %4152 = vmatprep.subr.bf16.mxu0 %v503_v40 }
 0x1d8   :  { %4153 = vmatpush3.bf16.msra.mxu0 %v503_v40 }
 0x1d9   :  { %v4142_v41 = vpop.f32.mrb[4].mxu1  ;;  %4154 = vmatprep.subr.bf16.mxu0 %v504_v38 }
 0x1da   :  { %v456_v42 = vpop.f32.mrb[5].mxu1 }
 0x1db   :  { %v4143_v43 = vpop.f32.mrb[6].mxu1 }
 0x1dc   :  { %v506_v44 = vpack.c.bf16 %v4143_v43, %v4142_v41  ;;  %v459_v45 = vpop.f32.mrb[7].mxu1  ;;  %4155 = vmatpush3.bf16.msra.mxu0 %v504_v38  ;;  %v600_v41 = vmul.f32 %v5009_v17, %v5002_v15 }
 0x1dd   :  { %v505_v46 = vpack.c.bf16 %v459_v45, %v456_v42  ;;  %v602_v42 = vmul.f32 %v5009_v17, %v5011_v18 }
 0x1df   :  { %4156 = vmatprep.subr.bf16.mxu0 %v505_v46 }
 0x1e0   :  { %4157 = vmatpush3.bf16.msra.mxu0 %v505_v46 }
 0x1e1   :  { %v4146_v47 = vpop.f32.mrb[8].mxu1  ;;  %4158 = vmatprep.subr.bf16.mxu0 %v506_v44 }
 0x1e2   :  { %v472_v48 = vpop.f32.mrb[9].mxu1 }
 0x1e3   :  { %v4147_v49 = vpop.f32.mrb[10].mxu1 }
 0x1e4   :  { %v508_v50 = vpack.c.bf16 %v4147_v49, %v4146_v47  ;;  %v475_v51 = vpop.f32.mrb[11].mxu1  ;;  %4159 = vmatpush3.bf16.msra.mxu0 %v506_v44  ;;  %v601_v44 = vmul.f32 %v5009_v17, %v5004_v16 }
 0x1e5   :  { %v507_v52 = vpack.c.bf16 %v475_v51, %v472_v48  ;;  %v603_v51 = vmul.f32 %v5009_v17, %v5017_v23 }
 0x1e7   :  { %4160 = vmatprep.subr.bf16.mxu0 %v507_v52 }
 0x1e8   :  { %4161 = vmatpush3.bf16.msra.mxu0 %v507_v52 }
 0x1e9   :  { %v4150_v53 = vpop.f32.mrb[12].mxu1  ;;  %4162 = vmatprep.subr.bf16.mxu0 %v508_v50 }
 0x1ea   :  { %v488_v54 = vpop.f32.mrb[13].mxu1 }
 0x1eb   :  { %v4151_v55 = vpop.f32.mrb[14].mxu1 }
 0x1ec   :  { %v510_v56 = vpack.c.bf16 %v4151_v55, %v4150_v53  ;;  %v491_v57 = vpop.f32.mrb[15].mxu1  ;;  %4163 = vmatpush3.bf16.msra.mxu0 %v508_v50  ;;  %v5059_v53 = vpop.permute.xlu0 %564 }
 0x1ed   :  { %v509_v58 = vpack.c.bf16 %v491_v57, %v488_v54 }
 0x1ef   :  { %4164 = vmatprep.subr.bf16.mxu0 %v509_v58 }
 0x1f0   :  { %4165 = vmatpush3.bf16.msra.mxu0 %v509_v58  ;;  %v5066_v58 = vpop.permute.xlu1 %569 }
 0x1f1   :  { %4166 = vmatprep.subr.bf16.mxu0 %v510_v56 }
 0x1f4   :  { %4167 = vmatpush3.bf16.msra.mxu0 %v510_v56 }
 0x1f7   :  { %4169 = vmatmul.mubr.bf16.vlgmr.msra.gmra.mrb[16].mxu0 %v4930_v59 }
 0x1f8   :  { %4172 = vmatprep.mubr.bf16.mxu0 %v4935_v60 }
 0x1ff   :  { %4173 = vmatmul.mubr.bf16.gmra.mrb[20].mxu0 %v4942_v61 }
 0x200   :  { %4176 = vmatprep.mubr.bf16.mxu0 %v4947_v62 }
 0x207   :  { %4177 = vmatmul.mubr.bf16.gmra.mrb[24].mxu0 %v4954_v63 }
 0x208   :  { %4180 = vmatprep.mubr.bf16.mxu0 %v4959_v0 }
 0x20f   :  { %4181 = vmatmul.mubr.bf16.gmra.mrb[28].mxu0 %v4966_v2 }
 0x210   :  { %4232 = vmatprep.mubr.bf16.mxu0 %v4828_v1 }
 0x2ca   :  { %v4170_v20 = vpop.f32.mrb[16].mxu0 }
 0x2cb   :  { %v694_v22 = vpop.f32.mrb[17].mxu0  ;;  %v5025_v29 = vadd.f32 %v4170_v20, %v598_v19  ;;  %v604_v19 = vmul.f32 %v5009_v17, %v5029_v31  ;;  %v606_v20 = vmul.f32 %v5009_v17, %v5059_v53 }
 0x2cc   :  { %v5019_v24 = vadd.f32 %v694_v22, %v596_v21  ;;  %v4171_v26 = vpop.f32.mrb[18].mxu0  ;;  %v605_v22 = vmul.f32 %v5009_v17, %v5039_v36 }
 0x2cd   :  { %v697_v28 = vpop.f32.mrb[19].mxu0  ;;  %v5033_v33 = vadd.f32 %v4171_v26, %v599_v25  ;;  %v781_v37 = vmul.f32 %v5025_v29, %v5025_v29  ;;  %v5082_v25 = vpop.permute.xlu0 %574 }
 0x2ce   :  { %v5027_v30 = vadd.f32 %v697_v28, %v597_v27  ;;  %v779_v32 = vmul.f32 %v5019_v24, %v5019_v24 }
 0x2cf   :  { %v782_v45 = vmul.f32 %v5033_v33, %v5033_v33 }
 0x2d0   :  { %v757_v34 = vadd.f32 %v5027_v30, %v5019_v24  ;;  %v780_v35 = vmul.f32 %v5027_v30, %v5027_v30 }
 0x2d2   :  { %v758_v38 = vadd.f32 %v757_v34, %v5025_v29  ;;  %v795_v39 = vadd.f32 %v780_v35, %v779_v32  ;;  %v4174_v40 = vpop.f32.mrb[20].mxu0 }
 0x2d3   :  { %v710_v43 = vpop.f32.mrb[21].mxu0  ;;  %v5055_v50 = vadd.f32 %v4174_v40, %v602_v42 }
 0x2d4   :  { %v796_v46 = vadd.f32 %v795_v39, %v781_v37  ;;  %v5052_v47 = vadd.f32 %v710_v43, %v600_v41  ;;  %v759_v48 = vadd.f32 %v758_v38, %v5033_v33  ;;  %v4175_v49 = vpop.f32.mrb[22].mxu0  ;;  %v607_v37 = vmul.f32 %v5009_v17, %v5066_v58  ;;  %v5093_v39 = vpop.permute.xlu1 %579 }
 0x2d5   :  { %v713_v52 = vpop.f32.mrb[23].mxu0  ;;  %v5068_v4 = vadd.f32 %v4175_v49, %v603_v51  ;;  %v785_v7 = vmul.f32 %v5055_v50, %v5055_v50  ;;  %v5105_v49 = vpop.permute.xlu0 %584 }
 0x2d6   :  { %v760_v54 = vadd.f32 %v759_v48, %v5052_v47  ;;  %v783_v55 = vmul.f32 %v5052_v47, %v5052_v47  ;;  %v797_v56 = vadd.f32 %v796_v46, %v782_v45  ;;  %v5064_v57 = vadd.f32 %v713_v52, %v601_v44 }
 0x2d7   :  { %v786_v26 = vmul.f32 %v5068_v4, %v5068_v4 }
 0x2d8   :  { %v798_v3 = vadd.f32 %v797_v56, %v783_v55  ;;  %v761_v5 = vadd.f32 %v760_v54, %v5064_v57  ;;  %v784_v6 = vmul.f32 %v5064_v57, %v5064_v57  ;;  %v608_v56 = vmul.f32 %v5009_v17, %v5082_v25 }
 0x2da   :  { %v762_v8 = vadd.f32 %v761_v5, %v5055_v50  ;;  %v799_v9 = vadd.f32 %v798_v3, %v784_v6  ;;  %v4178_v10 = vpop.f32.mrb[24].mxu0  ;;  %v610_v3 = vmul.f32 %v5009_v17, %v5105_v49  ;;  %v609_v6 = vmul.f32 %v5009_v17, %v5093_v39 }
 0x2db   :  { %v726_v21 = vpop.f32.mrb[25].mxu0  ;;  %v5089_v35 = vadd.f32 %v4178_v10, %v606_v20 }
 0x2dc   :  { %v800_v27 = vadd.f32 %v799_v9, %v785_v7  ;;  %v5086_v28 = vadd.f32 %v726_v21, %v604_v19  ;;  %v763_v32 = vadd.f32 %v762_v8, %v5068_v4  ;;  %v4179_v34 = vpop.f32.mrb[26].mxu0  ;;  %v5116_v7 = vpop.permute.xlu1 %589 }
 0x2dd   :  { %v729_v38 = vpop.f32.mrb[27].mxu0  ;;  %v5100_v45 = vadd.f32 %v4179_v34, %v607_v37  ;;  %v789_v51 = vmul.f32 %v5089_v35, %v5089_v35 }
 0x2de   :  { %v764_v40 = vadd.f32 %v763_v32, %v5086_v28  ;;  %v787_v41 = vmul.f32 %v5086_v28, %v5086_v28  ;;  %v801_v42 = vadd.f32 %v800_v27, %v786_v26  ;;  %v5098_v43 = vadd.f32 %v729_v38, %v605_v22 }
 0x2df   :  { %v790_v8 = vmul.f32 %v5100_v45, %v5100_v45  ;;  %v611_v22 = vmul.f32 %v5009_v17, %v5116_v7 }
 0x2e0   :  { %v802_v44 = vadd.f32 %v801_v42, %v787_v41  ;;  %v765_v46 = vadd.f32 %v764_v40, %v5098_v43  ;;  %v788_v48 = vmul.f32 %v5098_v43, %v5098_v43 }
 0x2e2   :  { %v766_v52 = vadd.f32 %v765_v46, %v5089_v35  ;;  %v803_v54 = vadd.f32 %v802_v44, %v788_v48  ;;  %v4182_v55 = vpop.f32.mrb[28].mxu0 }
 0x2e3   :  { %v742_v5 = vpop.f32.mrb[29].mxu0  ;;  %v5123_v21 = vadd.f32 %v4182_v55, %v610_v3 }
 0x2e4   :  { %v804_v9 = vadd.f32 %v803_v54, %v789_v51  ;;  %v5120_v10 = vadd.f32 %v742_v5, %v608_v56  ;;  %v767_v19 = vadd.f32 %v766_v52, %v5100_v45  ;;  %v4183_v20 = vpop.f32.mrb[30].mxu0 }
 0x2e5   :  { %v745_v26 = vpop.f32.mrb[31].mxu0  ;;  %v5130_v40 = vadd.f32 %v4183_v20, %v611_v22  ;;  %v793_v44 = vmul.f32 %v5123_v21, %v5123_v21 }
 0x2e6   :  { %v768_v27 = vadd.f32 %v767_v19, %v5120_v10  ;;  %v791_v32 = vmul.f32 %v5120_v10, %v5120_v10  ;;  %v805_v34 = vadd.f32 %v804_v9, %v790_v8  ;;  %v746_v37 = vadd.f32 %v745_v26, %v609_v6 }
 0x2e7   :  { %v794_v17 = vmul.f32 %v5130_v40, %v5130_v40 }
 0x2e8   :  { %v806_v38 = vadd.f32 %v805_v34, %v791_v32  ;;  %v769_v41 = vadd.f32 %v768_v27, %v746_v37  ;;  %v792_v42 = vmul.f32 %v746_v37, %v746_v37 }
 0x2ea   :  { %v770_v46 = vadd.f32 %v769_v41, %v5123_v21  ;;  %v807_v48 = vadd.f32 %v806_v38, %v792_v42 }
 0x2ec   :  { %v771_v51 = vadd.f32 %v770_v46, %v5130_v40  ;;  %v808_v52 = vadd.f32 %v807_v48, %v793_v44  ;;  %v824_v44 = vlaneseq }
 0x2ee   :  { %v772_v54 = vrot.slane %v771_v51, 4  ;;  %v809_v55 = vadd.f32 %v808_v52, %v794_v17  ;;  %v825_v48 = vshrl.u32 %v824_v44, 7  ;;  %v820_v17 = vld [vmem:[%s6229_s9] sm:$0x1] }
 0x2f0   :  { %v773_v56 = vadd.f32 %v772_v54, %v771_v51  ;;  %v810_v3 = vrot.slane %v809_v55, 4  ;;  %v5141_v51 = vsub.s32 0, %v825_v48 }
 0x2f2   :  { %v774_v5 = vrot.slane %v773_v56, 2  ;;  %v811_v6 = vadd.f32 %v810_v3, %v809_v55  ;;  %6243 = vst [vmem:[#allocation2_spill] sm:$0xff] %v5141_v51  ;;  %v844_v55 = vld [vmem:[%s6230_s10] sm:$0x1] }
 0x2f4   :  { %v775_v8 = vadd.f32 %v774_v5, %v773_v56  ;;  %v812_v9 = vrot.slane %v811_v6, 2 }
 0x2f6   :  { %v776_v19 = vrot.slane %v775_v8, 1  ;;  %v813_v20 = vadd.f32 %v812_v9, %v811_v6 }
 0x2f8   :  { %v777_v22 = vadd.f32 %v776_v19, %v775_v8  ;;  %v814_v26 = vrot.slane %v813_v20, 1 }
 0x2fa   :  { %v778_v27 = vmul.f32 0.0625, %v777_v22  ;;  %v815_v32 = vadd.f32 %v814_v26, %v813_v20 }
 0x2fc   :  { %v816_v34 = vmul.f32 0.0625, %v815_v32  ;;  %v817_v38 = vmul.f32 %v778_v27, %v778_v27 }
 0x2fe   :  { %v818_v41 = vsub.f32 %v816_v34, %v817_v38 }
 0x300   :  { %v819_v42 = vmax.f32 %v818_v41, 0.0 }
 0x302   :  { %v821_v46 = vadd.f32 1e-05, %v819_v42 }
 0x304   :  { %4653 = vrsqrt.f32 %v821_v46 }
 0x30e   :  { %v4654_v52 = vpop.eup %4653 }
 0x30f   :  { %v823_v54 = vmul.f32 %v4654_v52, %v820_v17 }
 0x311   :  { %v827_v56 = vrot.slane %v823_v54, %v5141_v51  ;;  %v845_v3 = vmul.f32 %v823_v54, %v778_v27 }
 0x313   :  { %v841_v5 = vmul.f32 %v827_v56, %v746_v37  ;;  %v846_v6 = vsub.f32 %v844_v55, %v845_v3  ;;  %v828_v8 = vmul.f32 %v827_v56, %v5019_v24  ;;  %v829_v9 = vmul.f32 %v827_v56, %v5027_v30 }
 0x314   :  { %v830_v19 = vmul.f32 %v827_v56, %v5025_v29  ;;  %v831_v20 = vmul.f32 %v827_v56, %v5033_v33  ;;  %v832_v22 = vmul.f32 %v827_v56, %v5052_v47  ;;  %v833_v26 = vmul.f32 %v827_v56, %v5064_v57 }
 0x315   :  { %v850_v32 = vrot.slane %v846_v6, %v5141_v51  ;;  %v834_v34 = vmul.f32 %v827_v56, %v5055_v50  ;;  %v835_v27 = vmul.f32 %v827_v56, %v5068_v4  ;;  %v836_v37 = vmul.f32 %v827_v56, %v5086_v28 }
 0x316   :  { %v837_v24 = vmul.f32 %v827_v56, %v5098_v43  ;;  %v838_v30 = vmul.f32 %v827_v56, %v5089_v35  ;;  %v839_v29 = vmul.f32 %v827_v56, %v5100_v45  ;;  %v840_v33 = vmul.f32 %v827_v56, %v5120_v10 }
 0x317   :  { %v851_v38 = vadd.f32 %v850_v32, %v828_v8  ;;  %v852_v47 = vadd.f32 %v850_v32, %v829_v9  ;;  %v853_v41 = vadd.f32 %v850_v32, %v830_v19  ;;  %v854_v57 = vadd.f32 %v850_v32, %v831_v20 }
 0x318   :  { %v855_v42 = vadd.f32 %v850_v32, %v832_v22  ;;  %v856_v46 = vadd.f32 %v850_v32, %v833_v26  ;;  %v857_v44 = vadd.f32 %v850_v32, %v834_v34  ;;  %v858_v50 = vadd.f32 %v850_v32, %v835_v27 }
 0x319   :  { %v867_v48 = vmax.f32 %v851_v38, 0.0  ;;  %v868_v4 = vmax.f32 %v852_v47, 0.0  ;;  %v869_v17 = vmax.f32 %v853_v41, 0.0  ;;  %v870_v28 = vmax.f32 %v854_v57, 0.0 }
 0x31a   :  { %v871_v52 = vmax.f32 %v855_v42, 0.0  ;;  %v872_v43 = vmax.f32 %v856_v46, 0.0  ;;  %v873_v54 = vmax.f32 %v857_v44, 0.0  ;;  %v874_v35 = vmax.f32 %v858_v50, 0.0 }
 0x31b   :  { %v883_v55 = vpack.c.bf16 %v868_v4, %v867_v48  ;;  %v884_v45 = vpack.c.bf16 %v870_v28, %v869_v17  ;;  %v859_v3 = vadd.f32 %v850_v32, %v836_v37  ;;  %v860_v10 = vadd.f32 %v850_v32, %v837_v24 }
 0x31c   :  { %v885_v6 = vpack.c.bf16 %v872_v43, %v871_v52  ;;  %v886_v8 = vpack.c.bf16 %v874_v35, %v873_v54  ;;  %v861_v9 = vadd.f32 %v850_v32, %v838_v30  ;;  %v862_v19 = vadd.f32 %v850_v32, %v839_v29 }
 0x31d   :  { %4200 = vmatprep.mubr.bf16.mxu1 %v883_v55  ;;  %v875_v20 = vmax.f32 %v859_v3, 0.0  ;;  %v876_v22 = vmax.f32 %v860_v10, 0.0  ;;  %v863_v26 = vadd.f32 %v850_v32, %v840_v33  ;;  %v864_v34 = vadd.f32 %v850_v32, %v841_v5 }
 0x31e   :  { %4201 = vmatmul.mubr.bf16.vlgmr.msra.gmra.mrb[16].mxu1 %v884_v45  ;;  %v877_v27 = vmax.f32 %v861_v9, 0.0  ;;  %v878_v38 = vmax.f32 %v862_v19, 0.0  ;;  %v842_v47 = vmul.f32 %v827_v56, %v5123_v21  ;;  %v843_v41 = vmul.f32 %v827_v56, %v5130_v40 }
 0x31f   :  { %4204 = vmatprep.mubr.bf16.mxu1 %v885_v6  ;;  %v887_v57 = vpack.c.bf16 %v876_v22, %v875_v20  ;;  %v879_v37 = vmax.f32 %v863_v26, 0.0  ;;  %v880_v24 = vmax.f32 %v864_v34, 0.0  ;;  %v4589_v34 = vld [vmem:[%s6223_s6 + $0xc0] sm:$0xff]  }
 0x320   :  { %v888_v42 = vpack.c.bf16 %v878_v38, %v877_v27  ;;  %v865_v46 = vadd.f32 %v850_v32, %v842_v47  ;;  %v866_v30 = vadd.f32 %v850_v32, %v843_v41  ;;  %4248 = vmatprep.subr.bf16.mxu1 %v4589_v34 }
 0x321   :  { %v889_v29 = vpack.c.bf16 %v880_v24, %v879_v37  ;;  %4249 = vmatpush3.bf16.msra.mxu1 %v4589_v34 }
 0x322   :  { %v881_v44 = vmax.f32 %v865_v46, 0.0  ;;  %v882_v50 = vmax.f32 %v866_v30, 0.0 }
 0x324   :  { %v890_v48 = vpack.c.bf16 %v882_v50, %v881_v44 }
 0x326   :  { %4205 = vmatmul.mubr.bf16.gmra.mrb[20].mxu1 %v886_v8 }
 0x327   :  { %4208 = vmatprep.mubr.bf16.mxu1 %v887_v57 }
 0x32e   :  { %4209 = vmatmul.mubr.bf16.gmra.mrb[24].mxu1 %v888_v42 }
 0x32f   :  { %4212 = vmatprep.mubr.bf16.mxu1 %v889_v29 }
 0x336   :  { %4213 = vmatmul.mubr.bf16.gmra.mrb[28].mxu1 %v890_v48 }
 0x3f1   :  { %v4202_v5 = vpop.f32.mrb[16].mxu1 }
 0x3f2   :  { %v990_v21 = vpop.f32.mrb[17].mxu1 }
 0x3f3   :  { %v4203_v33 = vpop.f32.mrb[18].mxu1 }
 0x3f4   :  { %v1054_v40 = vpack.c.bf16 %v4203_v33, %v4202_v5  ;;  %v993_v56 = vpop.f32.mrb[19].mxu1 }
 0x3f5   :  { %v1053_v4 = vpack.c.bf16 %v993_v56, %v990_v21 }
 0x3f7   :  { %4216 = vmatprep.subr.bf16.mxu0 %v1053_v4 }
 0x3f8   :  { %4217 = vmatpush3.bf16.msra.mxu0 %v1053_v4 }
 0x3f9   :  { %v4206_v17 = vpop.f32.mrb[20].mxu1  ;;  %4218 = vmatprep.subr.bf16.mxu0 %v1054_v40 }
 0x3fa   :  { %v1006_v32 = vpop.f32.mrb[21].mxu1 }
 0x3fb   :  { %v4207_v28 = vpop.f32.mrb[22].mxu1 }
 0x3fc   :  { %v1056_v52 = vpack.c.bf16 %v4207_v28, %v4206_v17  ;;  %v1009_v43 = vpop.f32.mrb[23].mxu1  ;;  %4219 = vmatpush3.bf16.msra.mxu0 %v1054_v40 }
 0x3fd   :  { %v1055_v54 = vpack.c.bf16 %v1009_v43, %v1006_v32 }
 0x3ff   :  { %4220 = vmatprep.subr.bf16.mxu0 %v1055_v54 }
 0x400   :  { %4221 = vmatpush3.bf16.msra.mxu0 %v1055_v54 }
 0x401   :  { %v4210_v35 = vpop.f32.mrb[24].mxu1  ;;  %4222 = vmatprep.subr.bf16.mxu0 %v1056_v52 }
 0x402   :  { %v1022_v55 = vpop.f32.mrb[25].mxu1 }
 0x403   :  { %v4211_v45 = vpop.f32.mrb[26].mxu1 }
 0x404   :  { %v1058_v3 = vpack.c.bf16 %v4211_v45, %v4210_v35  ;;  %v1025_v10 = vpop.f32.mrb[27].mxu1  ;;  %4223 = vmatpush3.bf16.msra.mxu0 %v1056_v52 }
 0x405   :  { %v1057_v6 = vpack.c.bf16 %v1025_v10, %v1022_v55 }
 0x407   :  { %4224 = vmatprep.subr.bf16.mxu0 %v1057_v6 }
 0x408   :  { %4225 = vmatpush3.bf16.msra.mxu0 %v1057_v6 }
 0x409   :  { %v4214_v8 = vpop.f32.mrb[28].mxu1  ;;  %4226 = vmatprep.subr.bf16.mxu0 %v1058_v3 }
 0x40a   :  { %v1038_v9 = vpop.f32.mrb[29].mxu1 }
 0x40b   :  { %v4215_v19 = vpop.f32.mrb[30].mxu1 }
 0x40c   :  { %v1060_v20 = vpack.c.bf16 %v4215_v19, %v4214_v8  ;;  %v1041_v22 = vpop.f32.mrb[31].mxu1  ;;  %4227 = vmatpush3.bf16.msra.mxu0 %v1058_v3 }
 0x40d   :  { %v1059_v26 = vpack.c.bf16 %v1041_v22, %v1038_v9 }
 0x40f   :  { %4228 = vmatprep.subr.bf16.mxu0 %v1059_v26 }
 0x410   :  { %4229 = vmatpush3.bf16.msra.mxu0 %v1059_v26 }
 0x411   :  { %4230 = vmatprep.subr.bf16.mxu0 %v1060_v20 }
 0x414   :  { %4231 = vmatpush3.bf16.msra.mxu0 %v1060_v20 }
 0x417   :  { %4233 = vmatmul.mubr.bf16.vlgmr.msra.gmra.mrb[32].mxu0 %v4930_v59  ;;  %v4590_v59 = vld [vmem:[%s6223_s6 + $0xc8] sm:$0xff]  }
 0x418   :  { %4236 = vmatprep.mubr.bf16.mxu0 %v4935_v60  ;;  %4250 = vmatprep.subr.bf16.mxu1 %v4590_v59  ;;  %v4591_v60 = vld [vmem:[%s6223_s6 + $0xd0] sm:$0xff]  }
 0x419   :  { %4251 = vmatpush3.bf16.msra.mxu1 %v4590_v59 }
 0x41a   :  { %4252 = vmatprep.subr.bf16.mxu1 %v4591_v60 }
 0x41d   :  { %4253 = vmatpush3.bf16.msra.mxu1 %v4591_v60 }
 0x41f   :  { %4237 = vmatmul.mubr.bf16.gmra.mrb[36].mxu0 %v4942_v61  ;;  %v4593_v61 = vld [vmem:[%s6223_s6 + $0xe0] sm:$0xff]  }
 0x420   :  { %4240 = vmatprep.mubr.bf16.mxu0 %v4947_v62  ;;  %v4594_v62 = vld [vmem:[%s6223_s6 + $0xe8] sm:$0xff]  }
 0x427   :  { %4241 = vmatmul.mubr.bf16.gmra.mrb[40].mxu0 %v4954_v63  ;;  %v4595_v63 = vld [vmem:[%s6223_s6 + $0xf0] sm:$0xff]  }
 0x428   :  { %4244 = vmatprep.mubr.bf16.mxu0 %v4959_v0  ;;  %v4596_v0 = vld [vmem:[%s6223_s6 + $0xf8] sm:$0xff]  }
 0x42f   :  { %4245 = vmatmul.mubr.bf16.gmra.mrb[44].mxu0 %v4966_v2  ;;  %v5198_v2 = vld [vmem:[%s6225_s8 + $0x2] ss:$0 sm:$0xff] }
 0x430   :  { %4296 = vmatprep.mubr.bf16.mxu0 %v4828_v1  ;;  %v4592_v1 = vld [vmem:[%s6223_s6 + $0xd8] sm:$0xff]   ;;  %v1066_v38 = vmul.f32 %v5198_v2, %v4994_v11  ;;  %v1068_v41 = vmul.f32 %v5198_v2, %v4996_v12  ;;  %v1067_v24 = vmul.f32 %v5198_v2, %v4998_v13  ;;  %v1069_v30 = vmul.f32 %v5198_v2, %v5000_v14 }
 0x431   :  { %4254 = vmatprep.subr.bf16.mxu1 %v4592_v1  ;;  %v1072_v21 = vmul.f32 %v5198_v2, %v5011_v18  ;;  %v1070_v17 = vmul.f32 %v5198_v2, %v5002_v15  ;;  %v1073_v52 = vmul.f32 %v5198_v2, %v5017_v23  ;;  %v1071_v43 = vmul.f32 %v5198_v2, %v5004_v16 }
 0x432   :  { %4255 = vmatpush3.bf16.msra.mxu1 %v4592_v1  ;;  %v1076_v59 = vmul.f32 %v5198_v2, %v5059_v53 }
 0x433   :  { %4256 = vmatprep.subr.bf16.mxu1 %v4593_v61 }
 0x436   :  { %4257 = vmatpush3.bf16.msra.mxu1 %v4593_v61 }
 0x437   :  { %4258 = vmatprep.subr.bf16.mxu1 %v4594_v62 }
 0x43a   :  { %4259 = vmatpush3.bf16.msra.mxu1 %v4594_v62 }
 0x43b   :  { %4260 = vmatprep.subr.bf16.mxu1 %v4595_v63 }
 0x43e   :  { %4261 = vmatpush3.bf16.msra.mxu1 %v4595_v63  ;;  %v1074_v63 = vmul.f32 %v5198_v2, %v5029_v31 }
 0x43f   :  { %4262 = vmatprep.subr.bf16.mxu1 %v4596_v0 }
 0x442   :  { %4263 = vmatpush3.bf16.msra.mxu1 %v4596_v0 }
 0x4ea   :  { %v4234_v27 = vpop.f32.mrb[32].mxu0 }
 0x4eb   :  { %v1116_v47 = vpop.f32.mrb[33].mxu0  ;;  %v5208_v46 = vadd.f32 %v4234_v27, %v1068_v41 }
 0x4ec   :  { %v5204_v57 = vadd.f32 %v1116_v47, %v1066_v38  ;;  %v4235_v37 = vpop.f32.mrb[34].mxu0  ;;  %v1077_v38 = vmul.f32 %v5198_v2, %v5066_v58  ;;  %v1075_v47 = vmul.f32 %v5198_v2, %v5039_v36 }
 0x4ed   :  { %v1119_v42 = vpop.f32.mrb[35].mxu0  ;;  %v5216_v50 = vadd.f32 %v4235_v37, %v1069_v30  ;;  %v1203_v33 = vmul.f32 %v5208_v46, %v5208_v46 }
 0x4ee   :  { %v5212_v29 = vadd.f32 %v1119_v42, %v1067_v24  ;;  %v1201_v44 = vmul.f32 %v5204_v57, %v5204_v57 }
 0x4ef   :  { %v1204_v54 = vmul.f32 %v5216_v50, %v5216_v50 }
 0x4f0   :  { %v1179_v48 = vadd.f32 %v5212_v29, %v5204_v57  ;;  %v1202_v5 = vmul.f32 %v5212_v29, %v5212_v29 }
 0x4f2   :  { %v1180_v40 = vadd.f32 %v1179_v48, %v5208_v46  ;;  %v1217_v56 = vadd.f32 %v1202_v5, %v1201_v44  ;;  %v4238_v4 = vpop.f32.mrb[36].mxu0 }
 0x4f3   :  { %v5229_v32 = vadd.f32 %v4238_v4, %v1072_v21  ;;  %v1132_v28 = vpop.f32.mrb[37].mxu0 }
 0x4f4   :  { %v1218_v35 = vadd.f32 %v1217_v56, %v1203_v33  ;;  %v5237_v55 = vadd.f32 %v1132_v28, %v1070_v17  ;;  %v1181_v45 = vadd.f32 %v1180_v40, %v5216_v50  ;;  %v4239_v3 = vpop.f32.mrb[38].mxu0  ;;  %v1080_v28 = vmul.f32 %v5198_v2, %v5105_v49 }
 0x4f5   :  { %v5240_v10 = vadd.f32 %v4239_v3, %v1073_v52  ;;  %v1135_v6 = vpop.f32.mrb[39].mxu0  ;;  %v1207_v60 = vmul.f32 %v5229_v32, %v5229_v32 }
 0x4f6   :  { %v1182_v8 = vadd.f32 %v1181_v45, %v5237_v55  ;;  %v1205_v9 = vmul.f32 %v5237_v55, %v5237_v55  ;;  %v1219_v19 = vadd.f32 %v1218_v35, %v1204_v54  ;;  %v5245_v20 = vadd.f32 %v1135_v6, %v1071_v43 }
 0x4f7   :  { %v1208_v41 = vmul.f32 %v5240_v10, %v5240_v10  ;;  %v1078_v45 = vmul.f32 %v5198_v2, %v5082_v25 }
 0x4f8   :  { %v1220_v22 = vadd.f32 %v1219_v19, %v1205_v9  ;;  %v1183_v26 = vadd.f32 %v1182_v8, %v5245_v20  ;;  %v1206_v34 = vmul.f32 %v5245_v20, %v5245_v20  ;;  %v1081_v8 = vmul.f32 %v5198_v2, %v5116_v7 }
 0x4f9   :  { %v1079_v9 = vmul.f32 %v5198_v2, %v5093_v39 }
 0x4fa   :  { %v1184_v1 = vadd.f32 %v1183_v26, %v5229_v32  ;;  %v1221_v61 = vadd.f32 %v1220_v22, %v1206_v34  ;;  %v4242_v62 = vpop.f32.mrb[40].mxu0 }
 0x4fb   :  { %v5257_v0 = vadd.f32 %v4242_v62, %v1076_v59  ;;  %v1148_v27 = vpop.f32.mrb[41].mxu0 }
 0x4fc   :  { %v1222_v37 = vadd.f32 %v1221_v61, %v1207_v60  ;;  %v5265_v24 = vadd.f32 %v1148_v27, %v1074_v63  ;;  %v1185_v42 = vadd.f32 %v1184_v1, %v5240_v10  ;;  %v4243_v30 = vpop.f32.mrb[42].mxu0 }
 0x4fd   :  { %v5268_v44 = vadd.f32 %v4243_v30, %v1077_v38  ;;  %v1151_v48 = vpop.f32.mrb[43].mxu0  ;;  %v1211_v52 = vmul.f32 %v5257_v0, %v5257_v0 }
 0x4fe   :  { %v1186_v5 = vadd.f32 %v1185_v42, %v5265_v24  ;;  %v1209_v21 = vmul.f32 %v5265_v24, %v5265_v24  ;;  %v1223_v33 = vadd.f32 %v1222_v37, %v1208_v41  ;;  %v5273_v40 = vadd.f32 %v1151_v48, %v1075_v47 }
 0x4ff   :  { %v1212_v19 = vmul.f32 %v5268_v44, %v5268_v44 }
 0x500   :  { %v1224_v56 = vadd.f32 %v1223_v33, %v1209_v21  ;;  %v1187_v4 = vadd.f32 %v1186_v5, %v5273_v40  ;;  %v1210_v17 = vmul.f32 %v5273_v40, %v5273_v40 }
 0x502   :  { %v1188_v43 = vadd.f32 %v1187_v4, %v5257_v0  ;;  %v1225_v54 = vadd.f32 %v1224_v56, %v1210_v17  ;;  %v4246_v35 = vpop.f32.mrb[44].mxu0 }
 0x503   :  { %v5285_v3 = vadd.f32 %v4246_v35, %v1080_v28  ;;  %v1164_v6 = vpop.f32.mrb[45].mxu0 }
 0x504   :  { %v1226_v22 = vadd.f32 %v1225_v54, %v1211_v52  ;;  %v1165_v26 = vadd.f32 %v1164_v6, %v1078_v45  ;;  %v1189_v34 = vadd.f32 %v1188_v43, %v5268_v44  ;;  %v4247_v59 = vpop.f32.mrb[46].mxu0 }
 0x505   :  { %v5294_v60 = vadd.f32 %v4247_v59, %v1081_v8  ;;  %v1167_v1 = vpop.f32.mrb[47].mxu0  ;;  %v1215_v2 = vmul.f32 %v5285_v3, %v5285_v3 }
 0x506   :  { %v1190_v61 = vadd.f32 %v1189_v34, %v1165_v26  ;;  %v1213_v62 = vmul.f32 %v1165_v26, %v1165_v26  ;;  %v1227_v63 = vadd.f32 %v1226_v22, %v1212_v19  ;;  %v1168_v27 = vadd.f32 %v1167_v1, %v1079_v9 }
 0x507   :  { %v1216_v30 = vmul.f32 %v5294_v60, %v5294_v60 }
 0x508   :  { %v1228_v38 = vadd.f32 %v1227_v63, %v1213_v62  ;;  %v1191_v47 = vadd.f32 %v1190_v61, %v1168_v27  ;;  %v1214_v41 = vmul.f32 %v1168_v27, %v1168_v27  ;;  %v1242_v61 = vld [vmem:[%s6229_s9 + $0x1] sm:$0x1] }
 0x50a   :  { %v1192_v37 = vadd.f32 %v1191_v47, %v5285_v3  ;;  %v1229_v42 = vadd.f32 %v1228_v38, %v1214_v41  ;;  %v1266_v38 = vld [vmem:[%s6230_s10 + $0x1] sm:$0x1] }
 0x50c   :  { %v1193_v48 = vadd.f32 %v1192_v37, %v5294_v60  ;;  %v1230_v5 = vadd.f32 %v1229_v42, %v1215_v2 }
 0x50e   :  { %v1194_v21 = vrot.slane %v1193_v48, 4  ;;  %v1231_v33 = vadd.f32 %v1230_v5, %v1216_v30 }
 0x510   :  { %v1195_v56 = vadd.f32 %v1194_v21, %v1193_v48  ;;  %v1232_v4 = vrot.slane %v1231_v33, 4 }
 0x512   :  { %v1196_v17 = vrot.slane %v1195_v56, 2  ;;  %v1233_v28 = vadd.f32 %v1232_v4, %v1231_v33 }
 0x514   :  { %v1197_v52 = vadd.f32 %v1196_v17, %v1195_v56  ;;  %v1234_v43 = vrot.slane %v1233_v28, 2 }
 0x516   :  { %v1198_v54 = vrot.slane %v1197_v52, 1  ;;  %v1235_v35 = vadd.f32 %v1234_v43, %v1233_v28 }
 0x518   :  { %v1199_v45 = vadd.f32 %v1198_v54, %v1197_v52  ;;  %v1236_v6 = vrot.slane %v1235_v35, 1 }
 0x51a   :  { %v1200_v8 = vmul.f32 0.0625, %v1199_v45  ;;  %v1237_v9 = vadd.f32 %v1236_v6, %v1235_v35 }
 0x51c   :  { %v1238_v19 = vmul.f32 0.0625, %v1237_v9  ;;  %v1239_v22 = vmul.f32 %v1200_v8, %v1200_v8 }
 0x51e   :  { %v1240_v34 = vsub.f32 %v1238_v19, %v1239_v22 }
 0x520   :  { %v1241_v59 = vmax.f32 %v1240_v34, 0.0 }
 0x522   :  { %v1243_v1 = vadd.f32 1e-05, %v1241_v59 }
 0x524   :  { %4655 = vrsqrt.f32 %v1243_v1 }
 0x52e   :  { %v4656_v62 = vpop.eup %4655 }
 0x52f   :  { %v1245_v63 = vmul.f32 %v4656_v62, %v1242_v61 }
 0x531   :  { %v1249_v47 = vrot.slane %v1245_v63, %v5141_v51  ;;  %v1267_v41 = vmul.f32 %v1245_v63, %v1200_v8 }
 0x533   :  { %v1263_v2 = vmul.f32 %v1249_v47, %v1168_v27  ;;  %v1268_v37 = vsub.f32 %v1266_v38, %v1267_v41  ;;  %v1250_v42 = vmul.f32 %v1249_v47, %v5204_v57  ;;  %v1251_v30 = vmul.f32 %v1249_v47, %v5212_v29 }
 0x534   :  { %v1252_v48 = vmul.f32 %v1249_v47, %v5208_v46  ;;  %v1253_v5 = vmul.f32 %v1249_v47, %v5216_v50  ;;  %v1254_v21 = vmul.f32 %v1249_v47, %v5237_v55  ;;  %v1255_v33 = vmul.f32 %v1249_v47, %v5245_v20 }
 0x535   :  { %v1272_v56 = vrot.slane %v1268_v37, %v5141_v51  ;;  %v1256_v4 = vmul.f32 %v1249_v47, %v5229_v32  ;;  %v1257_v17 = vmul.f32 %v1249_v47, %v5240_v10  ;;  %v1258_v27 = vmul.f32 %v1249_v47, %v5265_v24 }
 0x536   :  { %v1259_v57 = vmul.f32 %v1249_v47, %v5273_v40  ;;  %v1260_v29 = vmul.f32 %v1249_v47, %v5257_v0  ;;  %v1261_v46 = vmul.f32 %v1249_v47, %v5268_v44  ;;  %v1262_v28 = vmul.f32 %v1249_v47, %v1165_v26 }
 0x537   :  { %v1273_v50 = vadd.f32 %v1272_v56, %v1250_v42  ;;  %v1274_v52 = vadd.f32 %v1272_v56, %v1251_v30  ;;  %v1275_v55 = vadd.f32 %v1272_v56, %v1252_v48  ;;  %v1276_v43 = vadd.f32 %v1272_v56, %v1253_v5 }
 0x538   :  { %v1277_v20 = vadd.f32 %v1272_v56, %v1254_v21  ;;  %v1278_v54 = vadd.f32 %v1272_v56, %v1255_v33  ;;  %v1279_v35 = vadd.f32 %v1272_v56, %v1256_v4  ;;  %v1280_v45 = vadd.f32 %v1272_v56, %v1257_v17 }
 0x539   :  { %v1289_v32 = vmax.f32 %v1273_v50, 0.0  ;;  %v1290_v6 = vmax.f32 %v1274_v52, 0.0  ;;  %v1291_v10 = vmax.f32 %v1275_v55, 0.0  ;;  %v1292_v8 = vmax.f32 %v1276_v43, 0.0 }
 0x53a   :  { %v1293_v24 = vmax.f32 %v1277_v20, 0.0  ;;  %v1294_v9 = vmax.f32 %v1278_v54, 0.0  ;;  %v1295_v40 = vmax.f32 %v1279_v35, 0.0  ;;  %v1296_v19 = vmax.f32 %v1280_v45, 0.0 }
 0x53b   :  { %v1305_v0 = vpack.c.bf16 %v1290_v6, %v1289_v32  ;;  %v1306_v22 = vpack.c.bf16 %v1292_v8, %v1291_v10  ;;  %v1281_v44 = vadd.f32 %v1272_v56, %v1258_v27  ;;  %v1282_v26 = vadd.f32 %v1272_v56, %v1259_v57 }
 0x53c   :  { %v1307_v34 = vpack.c.bf16 %v1294_v9, %v1293_v24  ;;  %v1308_v59 = vpack.c.bf16 %v1296_v19, %v1295_v40  ;;  %v1283_v1 = vadd.f32 %v1272_v56, %v1260_v29  ;;  %v1284_v61 = vadd.f32 %v1272_v56, %v1261_v46 }
 0x53d   :  { %4264 = vmatprep.mubr.bf16.mxu1 %v1305_v0  ;;  %v1297_v62 = vmax.f32 %v1281_v44, 0.0  ;;  %v1298_v63 = vmax.f32 %v1282_v26, 0.0  ;;  %v1285_v38 = vadd.f32 %v1272_v56, %v1262_v28  ;;  %v1286_v41 = vadd.f32 %v1272_v56, %v1263_v2  ;;  %v4665_v26 = vld [vmem:[%s6226_s0 + $0x8] sm:$0xff]  }
 0x53e   :  { %4265 = vmatmul.mubr.bf16.vlgmr.msra.gmra.mrb[32].mxu1 %v1306_v22  ;;  %v1299_v37 = vmax.f32 %v1283_v1, 0.0  ;;  %v1300_v42 = vmax.f32 %v1284_v61, 0.0  ;;  %v1264_v30 = vmul.f32 %v1249_v47, %v5285_v3  ;;  %v1265_v48 = vmul.f32 %v1249_v47, %v5294_v60  ;;  %v4668_v1 = vld [vmem:[%s6226_s0 + $0x20] sm:$0xff]   ;;  %v4669_v61 = vld [vmem:[%s6226_s0 + $0x28] sm:$0xff]  }
 0x53f   :  { %4268 = vmatprep.mubr.bf16.mxu1 %v1307_v34  ;;  %v1309_v5 = vpack.c.bf16 %v1298_v63, %v1297_v62  ;;  %v1301_v21 = vmax.f32 %v1285_v38, 0.0  ;;  %v1302_v33 = vmax.f32 %v1286_v41, 0.0  ;;  %v4666_v34 = vld [vmem:[%s6226_s0 + $0x10] sm:$0xff]   ;;  %v4671_v63 = vld [vmem:[%s6226_s0 + $0x38] sm:$0xff]   ;;  %v4597_v38 = vld [vmem:[%s6231_s7 + $0x40] sm:$0xff]  }
 0x540   :  { %v1310_v4 = vpack.c.bf16 %v1300_v42, %v1299_v37  ;;  %v1287_v17 = vadd.f32 %v1272_v56, %v1264_v30  ;;  %v1288_v27 = vadd.f32 %v1272_v56, %v1265_v48  ;;  %v4670_v62 = vld [vmem:[%s6226_s0 + $0x30] sm:$0xff]   ;;  %v4598_v41 = vld [vmem:[%s6231_s7] sm:$0xff]   ;;  %3910 = vmatprep.subr.bf16.mxu1 %v4597_v38  ;;  %v4599_v37 = vld [vmem:[%s6231_s7 + $0x48] sm:$0xff]  }
 0x541   :  { %v1311_v57 = vpack.c.bf16 %v1302_v33, %v1301_v21  ;;  %3911 = vmatpush3.bf16.msra.mxu1 %v4598_v41  ;;  %v4600_v42 = vld [vmem:[%s6231_s7 + $0x8] sm:$0xff]   ;;  %v4601_v30 = vld [vmem:[%s6231_s7 + $0x50] sm:$0xff]   ;;  %v4604_v21 = vld [vmem:[%s6231_s7 + $0x18] sm:$0xff]  }
 0x542   :  { %v1303_v29 = vmax.f32 %v1287_v17, 0.0  ;;  %v1304_v46 = vmax.f32 %v1288_v27, 0.0  ;;  %3912 = vmatprep.subr.bf16.mxu1 %v4599_v37  ;;  %v4602_v48 = vld [vmem:[%s6231_s7 + $0x10] sm:$0xff]   ;;  %v4605_v33 = vld [vmem:[%s6231_s7 + $0x60] sm:$0xff]   ;;  %v4607_v17 = vld [vmem:[%s6231_s7 + $0x68] sm:$0xff]  }
 0x543   :  { %v4608_v27 = vld [vmem:[%s6231_s7 + $0x28] sm:$0xff]  }
 0x544   :  { %v1312_v50 = vpack.c.bf16 %v1304_v46, %v1303_v29  ;;  %v4610_v29 = vld [vmem:[%s6231_s7 + $0x30] sm:$0xff]   ;;  %v4611_v46 = vld [vmem:[%s6231_s7 + $0x78] sm:$0xff]  }
 0x545   :  { %3913 = vmatpush3.bf16.msra.mxu1 %v4600_v42 }
 0x546   :  { %4269 = vmatmul.mubr.bf16.gmra.mrb[36].mxu1 %v1308_v59  ;;  %v4667_v59 = vld [vmem:[%s6226_s0 + $0x18] sm:$0xff]   ;;  %3914 = vmatprep.subr.bf16.mxu1 %v4601_v30 }
 0x547   :  { %4272 = vmatprep.mubr.bf16.mxu1 %v1309_v5  ;;  %v4603_v5 = vld [vmem:[%s6231_s7 + $0x58] sm:$0xff]  }
 0x549   :  { %3915 = vmatpush3.bf16.msra.mxu1 %v4602_v48 }
 0x54a   :  { %3916 = vmatprep.subr.bf16.mxu1 %v4603_v5 }
 0x54d   :  { %3917 = vmatpush3.bf16.msra.mxu1 %v4604_v21 }
 0x54e   :  { %4273 = vmatmul.mubr.bf16.gmra.mrb[40].mxu1 %v1310_v4  ;;  %v4606_v4 = vld [vmem:[%s6231_s7 + $0x20] sm:$0xff]   ;;  %3918 = vmatprep.subr.bf16.mxu1 %v4605_v33 }
 0x54f   :  { %4276 = vmatprep.mubr.bf16.mxu1 %v1311_v57  ;;  %v4609_v57 = vld [vmem:[%s6231_s7 + $0x70] sm:$0xff]  }
 0x551   :  { %3919 = vmatpush3.bf16.msra.mxu1 %v4606_v4  ;;  %v4615_v4 = vld [vmem:[%s6223_s6 + $0x110] sm:$0xff]  }
 0x552   :  { %3920 = vmatprep.subr.bf16.mxu1 %v4607_v17 }
 0x555   :  { %3921 = vmatpush3.bf16.msra.mxu1 %v4608_v27 }
 0x556   :  { %4277 = vmatmul.mubr.bf16.gmra.mrb[44].mxu1 %v1312_v50  ;;  %3922 = vmatprep.subr.bf16.mxu1 %v4609_v57  ;;  %v4612_v50 = vld [vmem:[%s6231_s7 + $0x38] sm:$0xff]  }
 0x559   :  { %3923 = vmatpush3.bf16.msra.mxu1 %v4610_v29 }
 0x55a   :  { %3924 = vmatprep.subr.bf16.mxu1 %v4611_v46 }
 0x55d   :  { %3925 = vmatpush3.bf16.msra.mxu1 %v4612_v50 }
 0x611   :  { %v4266_v2 = vpop.f32.mrb[32].mxu1 }
 0x612   :  { %v1412_v3 = vpop.f32.mrb[33].mxu1 }
 0x613   :  { %v4267_v28 = vpop.f32.mrb[34].mxu1 }
 0x614   :  { %v1476_v60 = vpack.c.bf16 %v4267_v28, %v4266_v2  ;;  %v1415_v47 = vpop.f32.mrb[35].mxu1  ;;  %v5396_v2 = vld [vmem:[%s6225_s8 + $0x3] ss:$0 sm:$0xff] }
 0x615   :  { %v1475_v52 = vpack.c.bf16 %v1415_v47, %v1412_v3  ;;  %v1488_v28 = vmul.f32 %v5396_v2, %v4994_v11  ;;  %v1490_v47 = vmul.f32 %v5396_v2, %v4996_v12  ;;  %v1498_v42 = vmul.f32 %v5396_v2, %v5059_v53 }
 0x616   :  { %v1496_v33 = vmul.f32 %v5396_v2, %v5029_v31  ;;  %v1499_v53 = vmul.f32 %v5396_v2, %v5066_v58  ;;  %v1497_v57 = vmul.f32 %v5396_v2, %v5039_v36 }
 0x617   :  { %4280 = vmatprep.subr.bf16.mxu0 %v1475_v52 }
 0x618   :  { %4281 = vmatpush3.bf16.msra.mxu0 %v1475_v52 }
 0x619   :  { %v4270_v55 = vpop.f32.mrb[36].mxu1  ;;  %4282 = vmatprep.subr.bf16.mxu0 %v1476_v60 }
 0x61a   :  { %v1428_v56 = vpop.f32.mrb[37].mxu1 }
 0x61b   :  { %v4271_v43 = vpop.f32.mrb[38].mxu1 }
 0x61c   :  { %v1478_v20 = vpack.c.bf16 %v4271_v43, %v4270_v55  ;;  %v1431_v54 = vpop.f32.mrb[39].mxu1  ;;  %4283 = vmatpush3.bf16.msra.mxu0 %v1476_v60 }
 0x61d   :  { %v1477_v35 = vpack.c.bf16 %v1431_v54, %v1428_v56  ;;  %v1489_v56 = vmul.f32 %v5396_v2, %v4998_v13  ;;  %v1491_v54 = vmul.f32 %v5396_v2, %v5000_v14  ;;  %v1494_v13 = vmul.f32 %v5396_v2, %v5011_v18 }
 0x61f   :  { %4284 = vmatprep.subr.bf16.mxu0 %v1477_v35 }
 0x620   :  { %4285 = vmatpush3.bf16.msra.mxu0 %v1477_v35 }
 0x621   :  { %v4274_v45 = vpop.f32.mrb[40].mxu1  ;;  %4286 = vmatprep.subr.bf16.mxu0 %v1478_v20 }
 0x622   :  { %v1444_v32 = vpop.f32.mrb[41].mxu1 }
 0x623   :  { %v4275_v6 = vpop.f32.mrb[42].mxu1 }
 0x624   :  { %v1480_v10 = vpack.c.bf16 %v4275_v6, %v4274_v45  ;;  %v1447_v8 = vpop.f32.mrb[43].mxu1  ;;  %4287 = vmatpush3.bf16.msra.mxu0 %v1478_v20 }
 0x625   :  { %v1479_v24 = vpack.c.bf16 %v1447_v8, %v1444_v32 }
 0x627   :  { %4288 = vmatprep.subr.bf16.mxu0 %v1479_v24 }
 0x628   :  { %4289 = vmatpush3.bf16.msra.mxu0 %v1479_v24  ;;  %v1492_v24 = vmul.f32 %v5396_v2, %v5002_v15 }
 0x629   :  { %v4278_v9 = vpop.f32.mrb[44].mxu1  ;;  %4290 = vmatprep.subr.bf16.mxu0 %v1480_v10 }
 0x62a   :  { %v1460_v40 = vpop.f32.mrb[45].mxu1 }
 0x62b   :  { %v4279_v19 = vpop.f32.mrb[46].mxu1 }
 0x62c   :  { %v1482_v0 = vpack.c.bf16 %v4279_v19, %v4278_v9  ;;  %v1463_v22 = vpop.f32.mrb[47].mxu1  ;;  %4291 = vmatpush3.bf16.msra.mxu0 %v1480_v10  ;;  %v1495_v19 = vmul.f32 %v5396_v2, %v5017_v23 }
 0x62d   :  { %v1481_v44 = vpack.c.bf16 %v1463_v22, %v1460_v40 }
 0x62f   :  { %4292 = vmatprep.subr.bf16.mxu0 %v1481_v44 }
 0x630   :  { %4293 = vmatpush3.bf16.msra.mxu0 %v1481_v44 }
 0x631   :  { %4294 = vmatprep.subr.bf16.mxu0 %v1482_v0 }
 0x634   :  { %4295 = vmatpush3.bf16.msra.mxu0 %v1482_v0  ;;  %v1493_v0 = vmul.f32 %v5396_v2, %v5004_v16  ;;  %v4613_v16 = vld [vmem:[%s6223_s6 + $0x100] sm:$0xff]  }
 0x635   :  { %4312 = vmatprep.subr.bf16.mxu0 %v4613_v16 }
 0x637   :  { %4297 = vmatmul.mubr.bf16.vlgmr.msra.gmra.mrb[48].mxu0 %v4665_v26 }
 0x638   :  { %4300 = vmatprep.mubr.bf16.mxu0 %v4666_v34  ;;  %4313 = vmatpush3.bf16.msra.mxu0 %v4613_v16 }
 0x63f   :  { %4301 = vmatmul.mubr.bf16.gmra.mrb[52].mxu0 %v4667_v59 }
 0x640   :  { %4304 = vmatprep.mubr.bf16.mxu0 %v4668_v1 }
 0x647   :  { %4305 = vmatmul.mubr.bf16.gmra.mrb[56].mxu0 %v4669_v61 }
 0x648   :  { %4308 = vmatprep.mubr.bf16.mxu0 %v4670_v62 }
 0x64f   :  { %4309 = vmatmul.mubr.bf16.gmra.mrb[60].mxu0 %v4671_v63  ;;  %v4614_v63 = vld [vmem:[%s6223_s6 + $0x108] sm:$0xff]  }
 0x650   :  { %4314 = vmatprep.subr.bf16.mxu0 %v4614_v63 }
 0x651   :  { %4315 = vmatpush3.bf16.msra.mxu0 %v4614_v63 }
 0x652   :  { %4316 = vmatprep.subr.bf16.mxu0 %v4615_v4 }
 0x655   :  { %4317 = vmatpush3.bf16.msra.mxu0 %v4615_v4 }
 0x70a   :  { %v4298_v3 = vpop.f32.mrb[48].mxu0 }
 0x70b   :  { %v1538_v60 = vpop.f32.mrb[49].mxu0  ;;  %v5406_v20 = vadd.f32 %v4298_v3, %v1490_v47 }
 0x70c   :  { %v5402_v52 = vadd.f32 %v1538_v60, %v1488_v28  ;;  %v4299_v55 = vpop.f32.mrb[50].mxu0 }
 0x70d   :  { %v1541_v43 = vpop.f32.mrb[51].mxu0  ;;  %v5414_v45 = vadd.f32 %v4299_v55, %v1491_v54  ;;  %v1625_v6 = vmul.f32 %v5406_v20, %v5406_v20 }
 0x70e   :  { %v5410_v35 = vadd.f32 %v1541_v43, %v1489_v56  ;;  %v1623_v11 = vmul.f32 %v5402_v52, %v5402_v52  ;;  %v4616_v56 = vld [vmem:[%s6223_s6 + $0x118] sm:$0xff]  }
 0x70f   :  { %v1626_v18 = vmul.f32 %v5414_v45, %v5414_v45  ;;  %4318 = vmatprep.subr.bf16.mxu0 %v4616_v56 }
 0x710   :  { %v1601_v12 = vadd.f32 %v5410_v35, %v5402_v52  ;;  %v1624_v32 = vmul.f32 %v5410_v35, %v5410_v35  ;;  %4319 = vmatpush3.bf16.msra.mxu0 %v4616_v56 }
 0x712   :  { %v1602_v14 = vadd.f32 %v1601_v12, %v5406_v20  ;;  %v1639_v10 = vadd.f32 %v1624_v32, %v1623_v11  ;;  %v4302_v8 = vpop.f32.mrb[52].mxu0  ;;  %v1502_v12 = vmul.f32 %v5396_v2, %v5105_v49  ;;  %v1501_v49 = vmul.f32 %v5396_v2, %v5093_v39 }
 0x713   :  { %v5427_v9 = vadd.f32 %v4302_v8, %v1494_v13  ;;  %v1554_v40 = vpop.f32.mrb[53].mxu0 }
 0x714   :  { %v1640_v22 = vadd.f32 %v1639_v10, %v1625_v6  ;;  %v5435_v44 = vadd.f32 %v1554_v40, %v1492_v24  ;;  %v1603_v26 = vadd.f32 %v1602_v14, %v5414_v45  ;;  %v4303_v34 = vpop.f32.mrb[54].mxu0  ;;  %v1500_v10 = vmul.f32 %v5396_v2, %v5082_v25 }
 0x715   :  { %v5438_v59 = vadd.f32 %v4303_v34, %v1495_v19  ;;  %v1557_v15 = vpop.f32.mrb[55].mxu0  ;;  %v1629_v30 = vmul.f32 %v5427_v9, %v5427_v9  ;;  %v1503_v40 = vmul.f32 %v5396_v2, %v5116_v7 }
 0x716   :  { %v1604_v1 = vadd.f32 %v1603_v26, %v5435_v44  ;;  %v1627_v23 = vmul.f32 %v5435_v44, %v5435_v44  ;;  %v1641_v61 = vadd.f32 %v1640_v22, %v1626_v18  ;;  %v5443_v62 = vadd.f32 %v1557_v15, %v1493_v0 }
 0x717   :  { %v1630_v29 = vmul.f32 %v5438_v59, %v5438_v59 }
 0x718   :  { %v1642_v38 = vadd.f32 %v1641_v61, %v1627_v23  ;;  %v1605_v41 = vadd.f32 %v1604_v1, %v5443_v62  ;;  %v1628_v37 = vmul.f32 %v5443_v62, %v5443_v62 }
 0x71a   :  { %v1606_v48 = vadd.f32 %v1605_v41, %v5427_v9  ;;  %v1643_v5 = vadd.f32 %v1642_v38, %v1628_v37  ;;  %v4306_v21 = vpop.f32.mrb[56].mxu0 }
 0x71b   :  { %v5464_v17 = vadd.f32 %v4306_v21, %v1498_v42  ;;  %v1570_v27 = vpop.f32.mrb[57].mxu0 }
 0x71c   :  { %v1644_v46 = vadd.f32 %v1643_v5, %v1629_v30  ;;  %v5472_v50 = vadd.f32 %v1570_v27, %v1496_v33  ;;  %v1607_v31 = vadd.f32 %v1606_v48, %v5438_v59  ;;  %v4307_v3 = vpop.f32.mrb[58].mxu0 }
 0x71d   :  { %v5475_v28 = vadd.f32 %v4307_v3, %v1499_v53  ;;  %v1573_v60 = vpop.f32.mrb[59].mxu0  ;;  %v1633_v32 = vmul.f32 %v5464_v17, %v5464_v17 }
 0x71e   :  { %v1608_v47 = vadd.f32 %v1607_v31, %v5472_v50  ;;  %v1631_v58 = vmul.f32 %v5472_v50, %v5472_v50  ;;  %v1645_v55 = vadd.f32 %v1644_v46, %v1630_v29  ;;  %v5480_v36 = vadd.f32 %v1573_v60, %v1497_v57 }
 0x71f   :  { %v1634_v19 = vmul.f32 %v5475_v28, %v5475_v28 }
 0x720   :  { %v1646_v43 = vadd.f32 %v1645_v55, %v1631_v58  ;;  %v1609_v54 = vadd.f32 %v1608_v47, %v5480_v36  ;;  %v1632_v11 = vmul.f32 %v5480_v36, %v5480_v36 }
 0x722   :  { %v1610_v13 = vadd.f32 %v1609_v54, %v5464_v17  ;;  %v1647_v6 = vadd.f32 %v1646_v43, %v1632_v11  ;;  %v4310_v14 = vpop.f32.mrb[60].mxu0  ;;  %v1664_v54 = vld [vmem:[%s6229_s9 + $0x2] sm:$0x1] }
 0x723   :  { %v5495_v8 = vadd.f32 %v4310_v14, %v1502_v12  ;;  %v1586_v24 = vpop.f32.mrb[61].mxu0 }
 0x724   :  { %v1648_v0 = vadd.f32 %v1647_v6, %v1633_v32  ;;  %v1587_v18 = vadd.f32 %v1586_v24, %v1500_v10  ;;  %v1611_v22 = vadd.f32 %v1610_v13, %v5475_v28  ;;  %v4311_v26 = vpop.f32.mrb[62].mxu0  ;;  %v1688_v32 = vld [vmem:[%s6230_s10 + $0x2] sm:$0x1] }
 0x725   :  { %v5504_v34 = vadd.f32 %v4311_v26, %v1503_v40  ;;  %v1589_v25 = vpop.f32.mrb[63].mxu0  ;;  %v1637_v39 = vmul.f32 %v5495_v8, %v5495_v8 }
 0x726   :  { %v1612_v15 = vadd.f32 %v1611_v22, %v1587_v18  ;;  %v1635_v1 = vmul.f32 %v1587_v18, %v1587_v18  ;;  %v1649_v23 = vadd.f32 %v1648_v0, %v1634_v19  ;;  %v1590_v61 = vadd.f32 %v1589_v25, %v1501_v49 }
 0x727   :  { %v1638_v41 = vmul.f32 %v5504_v34, %v5504_v34 }
 0x728   :  { %v1650_v7 = vadd.f32 %v1649_v23, %v1635_v1  ;;  %v1613_v16 = vadd.f32 %v1612_v15, %v1590_v61  ;;  %v1636_v63 = vmul.f32 %v1590_v61, %v1590_v61 }
 0x72a   :  { %v1614_v2 = vadd.f32 %v1613_v16, %v5495_v8  ;;  %v1651_v38 = vadd.f32 %v1650_v7, %v1636_v63 }
 0x72c   :  { %v1615_v37 = vadd.f32 %v1614_v2, %v5504_v34  ;;  %v1652_v42 = vadd.f32 %v1651_v38, %v1637_v39 }
 0x72e   :  { %v1616_v30 = vrot.slane %v1615_v37, 4  ;;  %v1653_v48 = vadd.f32 %v1652_v42, %v1638_v41 }
 0x730   :  { %v1617_v5 = vadd.f32 %v1616_v30, %v1615_v37  ;;  %v1654_v21 = vrot.slane %v1653_v48, 4 }
 0x732   :  { %v1618_v33 = vrot.slane %v1617_v5, 2  ;;  %v1655_v4 = vadd.f32 %v1654_v21, %v1653_v48 }
 0x734   :  { %v1619_v27 = vadd.f32 %v1618_v33, %v1617_v5  ;;  %v1656_v53 = vrot.slane %v1655_v4, 2 }
 0x736   :  { %v1620_v57 = vrot.slane %v1619_v27, 1  ;;  %v1657_v29 = vadd.f32 %v1656_v53, %v1655_v4 }
 0x738   :  { %v1621_v46 = vadd.f32 %v1620_v57, %v1619_v27  ;;  %v1658_v31 = vrot.slane %v1657_v29, 1  ;;  %v4672_v57 = vld [vmem:[%s6224_s4] sm:$0xff]  }
 0x73a   :  { %v1622_v3 = vmul.f32 0.0625, %v1621_v46  ;;  %v1659_v60 = vadd.f32 %v1658_v31, %v1657_v29 }
 0x73c   :  { %v1660_v47 = vmul.f32 0.0625, %v1659_v60  ;;  %v1661_v58 = vmul.f32 %v1622_v3, %v1622_v3 }
 0x73e   :  { %v1662_v55 = vsub.f32 %v1660_v47, %v1661_v58 }
 0x740   :  { %v1663_v56 = vmax.f32 %v1662_v55, 0.0 }
 0x742   :  { %v1665_v43 = vadd.f32 1e-05, %v1663_v56 }
 0x744   :  { %4657 = vrsqrt.f32 %v1665_v43 }
 0x74e   :  { %v4658_v11 = vpop.eup %4657 }
 0x74f   :  { %v1667_v12 = vmul.f32 %v4658_v11, %v1664_v54 }
 0x751   :  { %v1671_v13 = vrot.slane %v1667_v12, %v5141_v51  ;;  %v1689_v6 = vmul.f32 %v1667_v12, %v1622_v3 }
 0x753   :  { %v1685_v14 = vmul.f32 %v1671_v13, %v1590_v61  ;;  %v1690_v10 = vsub.f32 %v1688_v32, %v1689_v6  ;;  %v1672_v24 = vmul.f32 %v1671_v13, %v5402_v52  ;;  %v1673_v40 = vmul.f32 %v1671_v13, %v5410_v35  ;;  %v4673_v6 = vld [vmem:[%s6224_s4 + $0x8] sm:$0xff]  }
 0x754   :  { %v1674_v49 = vmul.f32 %v1671_v13, %v5406_v20  ;;  %v1675_v19 = vmul.f32 %v1671_v13, %v5414_v45  ;;  %v1676_v0 = vmul.f32 %v1671_v13, %v5435_v44  ;;  %v1677_v22 = vmul.f32 %v1671_v13, %v5443_v62 }
 0x755   :  { %v1694_v26 = vrot.slane %v1690_v10, %v5141_v51  ;;  %v1678_v25 = vmul.f32 %v1671_v13, %v5427_v9  ;;  %v1679_v15 = vmul.f32 %v1671_v13, %v5438_v59  ;;  %v1680_v1 = vmul.f32 %v1671_v13, %v5472_v50  ;;  %v4678_v10 = vld [vmem:[%s6224_s4 + $0x30] sm:$0xff]  }
 0x756   :  { %v1681_v52 = vmul.f32 %v1671_v13, %v5480_v36  ;;  %v1682_v35 = vmul.f32 %v1671_v13, %v5464_v17  ;;  %v1683_v20 = vmul.f32 %v1671_v13, %v5475_v28  ;;  %v1684_v23 = vmul.f32 %v1671_v13, %v1587_v18 }
 0x757   :  { %v1695_v45 = vadd.f32 %v1694_v26, %v1672_v24  ;;  %v1696_v61 = vadd.f32 %v1694_v26, %v1673_v40  ;;  %v1697_v44 = vadd.f32 %v1694_v26, %v1674_v49  ;;  %v1698_v7 = vadd.f32 %v1694_v26, %v1675_v19  ;;  %v4679_v24 = vld [vmem:[%s6224_s4 + $0x38] sm:$0xff]   ;;  %v4617_v40 = vld [vmem:[%s6223_s6 + $0x120] sm:$0xff]   ;;  %v4618_v49 = vld [vmem:[%s6223_s6 + $0x128] sm:$0xff]  }
 0x758   :  { %v1699_v62 = vadd.f32 %v1694_v26, %v1676_v0  ;;  %v1700_v16 = vadd.f32 %v1694_v26, %v1677_v22  ;;  %v1701_v63 = vadd.f32 %v1694_v26, %v1678_v25  ;;  %v1702_v39 = vadd.f32 %v1694_v26, %v1679_v15  ;;  %4320 = vmatprep.subr.bf16.mxu0 %v4617_v40  ;;  %v4619_v19 = vld [vmem:[%s6223_s6 + $0x130] sm:$0xff]   ;;  %v4620_v0 = vld [vmem:[%s6223_s6 + $0x138] sm:$0xff]  }
 0x759   :  { %v1711_v9 = vmax.f32 %v1695_v45, 0.0  ;;  %v1712_v2 = vmax.f32 %v1696_v61, 0.0  ;;  %v1713_v59 = vmax.f32 %v1697_v44, 0.0  ;;  %v1714_v38 = vmax.f32 %v1698_v7, 0.0  ;;  %4321 = vmatpush3.bf16.msra.mxu0 %v4617_v40 }
 0x75a   :  { %v1715_v50 = vmax.f32 %v1699_v62, 0.0  ;;  %v1716_v41 = vmax.f32 %v1700_v16, 0.0  ;;  %v1717_v36 = vmax.f32 %v1701_v63, 0.0  ;;  %v1718_v37 = vmax.f32 %v1702_v39, 0.0  ;;  %4322 = vmatprep.subr.bf16.mxu0 %v4618_v49 }
 0x75b   :  { %v1727_v17 = vpack.c.bf16 %v1712_v2, %v1711_v9  ;;  %v1728_v42 = vpack.c.bf16 %v1714_v38, %v1713_v59  ;;  %v1703_v28 = vadd.f32 %v1694_v26, %v1680_v1  ;;  %v1704_v18 = vadd.f32 %v1694_v26, %v1681_v52  ;;  %v5573_v1 = vld [vmem:[%s6225_s8 + $0x4] ss:$0 sm:$0xff] }
 0x75c   :  { %v1729_v30 = vpack.c.bf16 %v1716_v41, %v1715_v50  ;;  %v1730_v48 = vpack.c.bf16 %v1718_v37, %v1717_v36  ;;  %v1705_v5 = vadd.f32 %v1694_v26, %v1682_v35  ;;  %v1706_v21 = vadd.f32 %v1694_v26, %v1683_v20 }
 0x75d   :  { %1900 = vmatprep.mubr.bf16.mxu1 %v1727_v17  ;;  %v1719_v33 = vmax.f32 %v1703_v28, 0.0  ;;  %v1720_v4 = vmax.f32 %v1704_v18, 0.0  ;;  %v1707_v27 = vadd.f32 %v1694_v26, %v1684_v23  ;;  %v1708_v53 = vadd.f32 %v1694_v26, %v1685_v14  ;;  %v4677_v14 = vld [vmem:[%s6224_s4 + $0x28] sm:$0xff]   ;;  %4323 = vmatpush3.bf16.msra.mxu0 %v4618_v49 }
 0x75e   :  { %1901 = vmatmul.mubr.bf16.vlgmr.msra.gmra.mrb[48].mxu1 %v4672_v57  ;;  %v1721_v29 = vmax.f32 %v1705_v5, 0.0  ;;  %v1722_v46 = vmax.f32 %v1706_v21, 0.0  ;;  %v1686_v31 = vmul.f32 %v1671_v13, %v5495_v8  ;;  %v1687_v3 = vmul.f32 %v1671_v13, %v5504_v34  ;;  %v4674_v8 = vld [vmem:[%s6224_s4 + $0x10] sm:$0xff]   ;;  %v4675_v34 = vld [vmem:[%s6224_s4 + $0x18] sm:$0xff]   ;;  %v4676_v13 = vld [vmem:[%s6224_s4 + $0x20] sm:$0xff]   ;;  %4324 = vmatprep.subr.bf16.mxu0 %v4619_v19 }
 0x75f   :  { %1908 = vmatprep.mubr.bf16.mxu1 %v1728_v42  ;;  %v1731_v60 = vpack.c.bf16 %v1720_v4, %v1719_v33  ;;  %v1723_v47 = vmax.f32 %v1707_v27, 0.0  ;;  %v1724_v58 = vmax.f32 %v1708_v53, 0.0 }
 0x760   :  { %v1732_v55 = vpack.c.bf16 %v1722_v46, %v1721_v29  ;;  %v1709_v56 = vadd.f32 %v1694_v26, %v1686_v31  ;;  %v1710_v43 = vadd.f32 %v1694_v26, %v1687_v3 }
 0x761   :  { %v1733_v54 = vpack.c.bf16 %v1724_v58, %v1723_v47  ;;  %4325 = vmatpush3.bf16.msra.mxu0 %v4619_v19 }
 0x762   :  { %v1725_v11 = vmax.f32 %v1709_v56, 0.0  ;;  %v1726_v12 = vmax.f32 %v1710_v43, 0.0  ;;  %4326 = vmatprep.subr.bf16.mxu0 %v4620_v0 }
 0x764   :  { %v1734_v32 = vpack.c.bf16 %v1726_v12, %v1725_v11 }
 0x765   :  { %4327 = vmatpush3.bf16.msra.mxu0 %v4620_v0 }
 0x766   :  { %1909 = vmatmul.mubr.bf16.gmra.mrb[52].mxu1 %v4673_v6 }
 0x767   :  { %1916 = vmatprep.mubr.bf16.mxu1 %v1729_v30 }
 0x76e   :  { %1917 = vmatmul.mubr.bf16.gmra.mrb[56].mxu1 %v4674_v8 }
 0x76f   :  { %1924 = vmatprep.mubr.bf16.mxu1 %v1730_v48 }
 0x776   :  { %1925 = vmatmul.mubr.bf16.gmra.mrb[60].mxu1 %v4675_v34 }
 0x777   :  { %1932 = vmatprep.mubr.bf16.mxu1 %v1731_v60 }
 0x77e   :  { %1933 = vmatmul.mubr.bf16.gmra.mrb[64].mxu1 %v4676_v13 }
 0x77f   :  { %1940 = vmatprep.mubr.bf16.mxu1 %v1732_v55 }
 0x786   :  { %1941 = vmatmul.mubr.bf16.gmra.mrb[68].mxu1 %v4677_v14 }
 0x787   :  { %1948 = vmatprep.mubr.bf16.mxu1 %v1733_v54 }
 0x78e   :  { %1949 = vmatmul.mubr.bf16.gmra.mrb[72].mxu1 %v4678_v10 }
 0x78f   :  { %1956 = vmatprep.mubr.bf16.mxu1 %v1734_v32 }
 0x796   :  { %1957 = vmatmul.mubr.bf16.gmra.mrb[76].mxu1 %v4679_v24 }
 0x831   :  { %v3926_v22 = vpop.f32.mrb[48].mxu1 }
 0x832   :  { %v3927_v26 = vpop.f32.mrb[49].mxu1 }
 0x833   :  { %v3928_v25 = vadd.f32 %v3927_v26, %v3926_v22  ;;  %v3929_v15 = vpop.f32.mrb[50].mxu1 }
 0x834   :  { %v3930_v52 = vpop.f32.mrb[51].mxu1 }
 0x835   :  { %v3931_v35 = vadd.f32 %v3930_v52, %v3929_v15  ;;  %v1903_v20 = vadd.f32 %v3928_v25, %v5573_v1 }
 0x837   :  { %v1906_v23 = vadd.f32 %v3931_v35, %v5573_v1 }
 0x839   :  { %v3932_v45 = vpop.f32.mrb[52].mxu1  ;;  %v1965_v61 = vpack.c.bf16 %v1906_v23, %v1903_v20 }
 0x83a   :  { %v3933_v44 = vpop.f32.mrb[53].mxu1 }
 0x83b   :  { %v3934_v7 = vadd.f32 %v3933_v44, %v3932_v45  ;;  %v3935_v62 = vpop.f32.mrb[54].mxu1  ;;  %4328 = vmatprep.mubr.bf16.mxu0 %v1965_v61  ;;  %v5594_v44 = vld [vmem:[%s6232_s1] sm:$0xff]  }
 0x83c   :  { %v3936_v16 = vpop.f32.mrb[55].mxu1 }
 0x83d   :  { %v3937_v63 = vadd.f32 %v3936_v16, %v3935_v62  ;;  %v1911_v39 = vadd.f32 %v3934_v7, %v5573_v1 }
 0x83f   :  { %v1914_v9 = vadd.f32 %v3937_v63, %v5573_v1 }
 0x841   :  { %v1966_v2 = vpack.c.bf16 %v1914_v9, %v1911_v39  ;;  %v3938_v59 = vpop.f32.mrb[56].mxu1 }
 0x842   :  { %v3939_v38 = vpop.f32.mrb[57].mxu1 }
 0x843   :  { %v3940_v50 = vadd.f32 %v3939_v38, %v3938_v59  ;;  %v3941_v41 = vpop.f32.mrb[58].mxu1  ;;  %4329 = vmatmul.mubr.bf16.vlgmr.msra.gmra.mrb[64].mxu0 %v1966_v2 }
 0x844   :  { %v3942_v36 = vpop.f32.mrb[59].mxu1 }
 0x845   :  { %v3943_v37 = vadd.f32 %v3942_v36, %v3941_v41  ;;  %v1919_v17 = vadd.f32 %v3940_v50, %v5573_v1 }
 0x847   :  { %v1922_v42 = vadd.f32 %v3943_v37, %v5573_v1 }
 0x849   :  { %v3944_v28 = vpop.f32.mrb[60].mxu1  ;;  %v1967_v18 = vpack.c.bf16 %v1922_v42, %v1919_v17 }
 0x84a   :  { %v3945_v30 = vpop.f32.mrb[61].mxu1 }
 0x84b   :  { %v3946_v48 = vadd.f32 %v3945_v30, %v3944_v28  ;;  %v3947_v5 = vpop.f32.mrb[62].mxu1  ;;  %4332 = vmatprep.mubr.bf16.mxu0 %v1967_v18 }
 0x84c   :  { %v3948_v21 = vpop.f32.mrb[63].mxu1 }
 0x84d   :  { %v3949_v33 = vadd.f32 %v3948_v21, %v3947_v5  ;;  %v1927_v4 = vadd.f32 %v3946_v48, %v5573_v1 }
 0x84f   :  { %v1930_v27 = vadd.f32 %v3949_v33, %v5573_v1 }
 0x851   :  { %v3950_v53 = vpop.f32.mrb[64].mxu1  ;;  %v1968_v57 = vpack.c.bf16 %v1930_v27, %v1927_v4  ;;  %v5600_v27 = vld [vmem:[%s6232_s1 + $0x8] sm:$0xff]  }
 0x852   :  { %v3951_v29 = vpop.f32.mrb[65].mxu1 }
 0x853   :  { %v3952_v46 = vadd.f32 %v3951_v29, %v3950_v53  ;;  %v3953_v31 = vpop.f32.mrb[66].mxu1  ;;  %4333 = vmatmul.mubr.bf16.gmra.mrb[68].mxu0 %v1968_v57  ;;  %v5605_v53 = vld [vmem:[%s6232_s1 + $0x10] sm:$0xff]   ;;  %v5612_v57 = vld [vmem:[%s6232_s1 + $0x18] sm:$0xff]   ;;  %v5617_v29 = vld [vmem:[%s6232_s1 + $0x20] sm:$0xff]  }
 0x854   :  { %v3954_v3 = vpop.f32.mrb[67].mxu1 }
 0x855   :  { %v3955_v60 = vadd.f32 %v3954_v3, %v3953_v31  ;;  %v1935_v47 = vadd.f32 %v3952_v46, %v5573_v1  ;;  %v5624_v46 = vld [vmem:[%s6232_s1 + $0x28] sm:$0xff]   ;;  %v5629_v31 = vld [vmem:[%s6232_s1 + $0x30] sm:$0xff]   ;;  %v5636_v3 = vld [vmem:[%s6232_s1 + $0x38] sm:$0xff]  }
 0x857   :  { %v1938_v58 = vadd.f32 %v3955_v60, %v5573_v1  ;;  %v4629_v60 = vld [vmem:[%s6223_s6 + $0x140] sm:$0xff]  }
 0x858   :  { %4376 = vmatprep.subr.bf16.mxu1 %v4629_v60 }
 0x859   :  { %v3956_v55 = vpop.f32.mrb[68].mxu1  ;;  %v1969_v56 = vpack.c.bf16 %v1938_v58, %v1935_v47  ;;  %4377 = vmatpush3.bf16.msra.mxu1 %v4629_v60  ;;  %v4630_v47 = vld [vmem:[%s6223_s6 + $0x148] sm:$0xff]   ;;  %v4631_v58 = vld [vmem:[%s6223_s6 + $0x150] sm:$0xff]  }
 0x85a   :  { %v3957_v43 = vpop.f32.mrb[69].mxu1  ;;  %4378 = vmatprep.subr.bf16.mxu1 %v4630_v47 }
 0x85b   :  { %v3958_v54 = vadd.f32 %v3957_v43, %v3956_v55  ;;  %v3959_v11 = vpop.f32.mrb[70].mxu1  ;;  %4336 = vmatprep.mubr.bf16.mxu0 %v1969_v56  ;;  %v4632_v55 = vld [vmem:[%s6223_s6 + $0x158] sm:$0xff]   ;;  %v4633_v56 = vld [vmem:[%s6223_s6 + $0x160] sm:$0xff]   ;;  %v4634_v43 = vld [vmem:[%s6223_s6 + $0x168] sm:$0xff]  }
 0x85c   :  { %v3960_v12 = vpop.f32.mrb[71].mxu1 }
 0x85d   :  { %v3961_v32 = vadd.f32 %v3960_v12, %v3959_v11  ;;  %v1943_v6 = vadd.f32 %v3958_v54, %v5573_v1  ;;  %4379 = vmatpush3.bf16.msra.mxu1 %v4630_v47  ;;  %v4635_v54 = vld [vmem:[%s6223_s6 + $0x170] sm:$0xff]   ;;  %v4636_v11 = vld [vmem:[%s6223_s6 + $0x178] sm:$0xff]   ;;  %v5664_v12 = vpop.permute.xlu0 %2146 }
 0x85e   :  { %4380 = vmatprep.subr.bf16.mxu1 %v4631_v58 }
 0x85f   :  { %v1946_v8 = vadd.f32 %v3961_v32, %v5573_v1  ;;  %v5666_v32 = vpop.permute.xlu1 %2151 }
 0x861   :  { %v3962_v34 = vpop.f32.mrb[72].mxu1  ;;  %v1970_v13 = vpack.c.bf16 %v1946_v8, %v1943_v6  ;;  %4381 = vmatpush3.bf16.msra.mxu1 %v4631_v58  ;;  %v5668_v6 = vpop.permute.xlu0 %2156 }
 0x862   :  { %v3963_v14 = vpop.f32.mrb[73].mxu1  ;;  %4382 = vmatprep.subr.bf16.mxu1 %v4632_v55 }
 0x863   :  { %v3964_v10 = vadd.f32 %v3963_v14, %v3962_v34  ;;  %v3965_v24 = vpop.f32.mrb[74].mxu1  ;;  %4337 = vmatmul.mubr.bf16.gmra.mrb[72].mxu0 %v1970_v13  ;;  %v5670_v8 = vpop.permute.xlu1 %2161  ;;  %v5679_v14 = vld [vmem:[%s6225_s8 + $0x5] ss:$0 sm:$0xff] }
 0x864   :  { %v3966_v40 = vpop.f32.mrb[75].mxu1 }
 0x865   :  { %v3967_v49 = vadd.f32 %v3966_v40, %v3965_v24  ;;  %v1951_v19 = vadd.f32 %v3964_v10, %v5573_v1  ;;  %4383 = vmatpush3.bf16.msra.mxu1 %v4632_v55  ;;  %v5672_v34 = vpop.permute.xlu0 %2166 }
 0x866   :  { %4384 = vmatprep.subr.bf16.mxu1 %v4633_v56 }
 0x867   :  { %v1954_v0 = vadd.f32 %v3967_v49, %v5573_v1  ;;  %v5674_v13 = vpop.permute.xlu1 %2171  ;;  %v2228_v49 = vmul.f32 %v5679_v14, %v5664_v12 }
 0x869   :  { %v3968_v22 = vpop.f32.mrb[76].mxu1  ;;  %v1971_v26 = vpack.c.bf16 %v1954_v0, %v1951_v19  ;;  %4385 = vmatpush3.bf16.msra.mxu1 %v4633_v56  ;;  %v5681_v10 = vpop.permute.xlu0 %2176  ;;  %v2230_v0 = vmul.f32 %v5679_v14, %v5668_v6 }
 0x86a   :  { %v3969_v25 = vpop.f32.mrb[77].mxu1  ;;  %4386 = vmatprep.subr.bf16.mxu1 %v4634_v43 }
 0x86b   :  { %v3970_v15 = vadd.f32 %v3969_v25, %v3968_v22  ;;  %v3971_v52 = vpop.f32.mrb[78].mxu1  ;;  %4340 = vmatprep.mubr.bf16.mxu0 %v1971_v26  ;;  %v5683_v24 = vpop.permute.xlu1 %2181  ;;  %v2229_v25 = vmul.f32 %v5679_v14, %v5666_v32 }
 0x86c   :  { %v3972_v35 = vpop.f32.mrb[79].mxu1 }
 0x86d   :  { %v3973_v20 = vadd.f32 %v3972_v35, %v3971_v52  ;;  %v1959_v23 = vadd.f32 %v3970_v15, %v5573_v1  ;;  %4387 = vmatpush3.bf16.msra.mxu1 %v4634_v43  ;;  %v5693_v52 = vpop.permute.xlu0 %2186 }
 0x86e   :  { %4388 = vmatprep.subr.bf16.mxu1 %v4635_v54 }
 0x86f   :  { %v1962_v45 = vadd.f32 %v3973_v20, %v5573_v1  ;;  %v2231_v20 = vmul.f32 %v5679_v14, %v5670_v8 }
 0x871   :  { %v1972_v61 = vpack.c.bf16 %v1962_v45, %v1959_v23  ;;  %4389 = vmatpush3.bf16.msra.mxu1 %v4635_v54  ;;  %v5701_v45 = vpop.permute.xlu1 %2191 }
 0x872   :  { %4390 = vmatprep.subr.bf16.mxu1 %v4636_v11 }
 0x873   :  { %4341 = vmatmul.mubr.bf16.gmra.mrb[76].mxu0 %v1972_v61 }
 0x874   :  { %4360 = vmatprep.mubr.bf16.mxu0 %v5594_v44 }
 0x875   :  { %4391 = vmatpush3.bf16.msra.mxu1 %v4636_v11 }
 0x916   :  { %v4330_v7 = vpop.f32.mrb[64].mxu0 }
 0x917   :  { %v2072_v62 = vpop.f32.mrb[65].mxu0 }
 0x918   :  { %v4331_v16 = vpop.f32.mrb[66].mxu0 }
 0x919   :  { %v2136_v63 = vpack.c.bf16 %v4331_v16, %v4330_v7  ;;  %v2075_v39 = vpop.f32.mrb[67].mxu0 }
 0x91a   :  { %v2135_v9 = vpack.c.bf16 %v2075_v39, %v2072_v62 }
 0x91c   :  { %4344 = vmatprep.subr.bf16.mxu0 %v2135_v9 }
 0x91d   :  { %4345 = vmatpush3.bf16.msra.mxu0 %v2135_v9 }
 0x91e   :  { %4346 = vmatprep.subr.bf16.mxu0 %v2136_v63 }
 0x921   :  { %4347 = vmatpush3.bf16.msra.mxu0 %v2136_v63 }
 0x926   :  { %v4334_v1 = vpop.f32.mrb[68].mxu0 }
 0x927   :  { %v2088_v2 = vpop.f32.mrb[69].mxu0 }
 0x928   :  { %v4335_v59 = vpop.f32.mrb[70].mxu0 }
 0x929   :  { %v2138_v38 = vpack.c.bf16 %v4335_v59, %v4334_v1  ;;  %v2091_v50 = vpop.f32.mrb[71].mxu0  ;;  %v2234_v59 = vmul.f32 %v5679_v14, %v5681_v10 }
 0x92a   :  { %v2137_v41 = vpack.c.bf16 %v2091_v50, %v2088_v2  ;;  %v2232_v2 = vmul.f32 %v5679_v14, %v5672_v34  ;;  %v2233_v50 = vmul.f32 %v5679_v14, %v5674_v13 }
 0x92c   :  { %4348 = vmatprep.subr.bf16.mxu0 %v2137_v41 }
 0x92d   :  { %4349 = vmatpush3.bf16.msra.mxu0 %v2137_v41  ;;  %v5720_v41 = vpop.permute.xlu0 %2196 }
 0x92e   :  { %4350 = vmatprep.subr.bf16.mxu0 %v2138_v38 }
 0x931   :  { %4351 = vmatpush3.bf16.msra.mxu0 %v2138_v38  ;;  %v5743_v43 = vpop.permute.xlu0 %2206 }
 0x932   :  { %6244 = vst [vmem:[#allocation3_spill] sm:$0xff] %v5743_v43 }
 0x936   :  { %v4338_v36 = vpop.f32.mrb[72].mxu0 }
 0x937   :  { %v2104_v37 = vpop.f32.mrb[73].mxu0 }
 0x938   :  { %v4339_v17 = vpop.f32.mrb[74].mxu0 }
 0x939   :  { %v2140_v42 = vpack.c.bf16 %v4339_v17, %v4338_v36  ;;  %v2107_v28 = vpop.f32.mrb[75].mxu0 }
 0x93a   :  { %v2139_v18 = vpack.c.bf16 %v2107_v28, %v2104_v37 }
 0x93c   :  { %4352 = vmatprep.subr.bf16.mxu0 %v2139_v18 }
 0x93d   :  { %4353 = vmatpush3.bf16.msra.mxu0 %v2139_v18 }
 0x93e   :  { %4354 = vmatprep.subr.bf16.mxu0 %v2140_v42 }
 0x941   :  { %4355 = vmatpush3.bf16.msra.mxu0 %v2140_v42 }
 0x946   :  { %v4342_v30 = vpop.f32.mrb[76].mxu0 }
 0x947   :  { %v2120_v48 = vpop.f32.mrb[77].mxu0 }
 0x948   :  { %v4343_v5 = vpop.f32.mrb[78].mxu0 }
 0x949   :  { %v2142_v21 = vpack.c.bf16 %v4343_v5, %v4342_v30  ;;  %v2123_v33 = vpop.f32.mrb[79].mxu0  ;;  %v2235_v30 = vmul.f32 %v5679_v14, %v5683_v24  ;;  %v5731_v5 = vpop.permute.xlu1 %2201 }
 0x94a   :  { %v2141_v4 = vpack.c.bf16 %v2123_v33, %v2120_v48 }
 0x94c   :  { %4356 = vmatprep.subr.bf16.mxu0 %v2141_v4 }
 0x94d   :  { %4357 = vmatpush3.bf16.msra.mxu0 %v2141_v4 }
 0x94e   :  { %4358 = vmatprep.subr.bf16.mxu0 %v2142_v21 }
 0x951   :  { %4359 = vmatpush3.bf16.msra.mxu0 %v2142_v21 }
 0x954   :  { %4361 = vmatmul.mubr.bf16.vlgmr.msra.gmra.mrb[80].mxu0 %v5600_v27 }
 0x955   :  { %4364 = vmatprep.mubr.bf16.mxu0 %v5605_v53 }
 0x95c   :  { %4365 = vmatmul.mubr.bf16.gmra.mrb[84].mxu0 %v5612_v57 }
 0x95d   :  { %4368 = vmatprep.mubr.bf16.mxu0 %v5617_v29 }
 0x964   :  { %4369 = vmatmul.mubr.bf16.gmra.mrb[88].mxu0 %v5624_v46 }
 0x965   :  { %4372 = vmatprep.mubr.bf16.mxu0 %v5629_v31 }
 0x96c   :  { %4373 = vmatmul.mubr.bf16.gmra.mrb[92].mxu0 %v5636_v3 }
 0x96d   :  { %4424 = vmatprep.mubr.bf16.mxu0 %v5594_v44 }
 0xa27   :  { %v4362_v40 = vpop.f32.mrb[80].mxu0 }
 0xa28   :  { %v2326_v19 = vpop.f32.mrb[81].mxu0  ;;  %v5695_v35 = vadd.f32 %v4362_v40, %v2230_v0  ;;  %v2238_v0 = vmul.f32 %v5679_v14, %v5720_v41 }
 0xa29   :  { %v5689_v22 = vadd.f32 %v2326_v19, %v2228_v49  ;;  %v4363_v26 = vpop.f32.mrb[82].mxu0  ;;  %v2236_v19 = vmul.f32 %v5679_v14, %v5693_v52 }
 0xa2a   :  { %v2329_v15 = vpop.f32.mrb[83].mxu0  ;;  %v5705_v7 = vadd.f32 %v4363_v26, %v2231_v20  ;;  %v2413_v63 = vmul.f32 %v5695_v35, %v5695_v35 }
 0xa2b   :  { %v5699_v23 = vadd.f32 %v2329_v15, %v2229_v25  ;;  %v2411_v61 = vmul.f32 %v5689_v22, %v5689_v22  ;;  %v2237_v25 = vmul.f32 %v5679_v14, %v5701_v45  ;;  %v5754_v15 = vpop.permute.xlu1 %2211 }
 0xa2c   :  { %v2414_v36 = vmul.f32 %v5705_v7, %v5705_v7  ;;  %6245 = vst [vmem:[#allocation4_spill] sm:$0xff] %v5754_v15 }
 0xa2d   :  { %v2389_v62 = vadd.f32 %v5699_v23, %v5689_v22  ;;  %v2412_v16 = vmul.f32 %v5699_v23, %v5699_v23 }
 0xa2f   :  { %v2390_v39 = vadd.f32 %v2389_v62, %v5695_v35  ;;  %v2427_v9 = vadd.f32 %v2412_v16, %v2411_v61  ;;  %v4366_v1 = vpop.f32.mrb[84].mxu0 }
 0xa30   :  { %v2342_v38 = vpop.f32.mrb[85].mxu0  ;;  %v5727_v18 = vadd.f32 %v4366_v1, %v2234_v59 }
 0xa31   :  { %v2428_v37 = vadd.f32 %v2427_v9, %v2413_v63  ;;  %v5724_v17 = vadd.f32 %v2342_v38, %v2232_v2  ;;  %v2391_v42 = vadd.f32 %v2390_v39, %v5705_v7  ;;  %v4367_v28 = vpop.f32.mrb[86].mxu0  ;;  %v2239_v9 = vmul.f32 %v5679_v14, %v5731_v5 }
 0xa32   :  { %v2345_v48 = vpop.f32.mrb[87].mxu0  ;;  %v5738_v58 = vadd.f32 %v4367_v28, %v2235_v30  ;;  %v2417_v54 = vmul.f32 %v5727_v18, %v5727_v18 }
 0xa33   :  { %v2392_v21 = vadd.f32 %v2391_v42, %v5724_v17  ;;  %v2415_v33 = vmul.f32 %v5724_v17, %v5724_v17  ;;  %v2429_v4 = vadd.f32 %v2428_v37, %v2414_v36  ;;  %v5736_v60 = vadd.f32 %v2345_v48, %v2233_v50  ;;  %v5770_v36 = vpop.permute.xlu0 %2216  ;;  %v5777_v48 = vpop.permute.xlu1 %2221 }
 0xa34   :  { %v2418_v20 = vmul.f32 %v5738_v58, %v5738_v58  ;;  %6246 = vst [vmem:[#allocation5_spill] sm:$0xff] %v5777_v48 }
 0xa35   :  { %v2430_v47 = vadd.f32 %v2429_v4, %v2415_v33  ;;  %v2393_v55 = vadd.f32 %v2392_v21, %v5736_v60  ;;  %v2416_v56 = vmul.f32 %v5736_v60, %v5736_v60 }
 0xa37   :  { %v2394_v11 = vadd.f32 %v2393_v55, %v5727_v18  ;;  %v2431_v40 = vadd.f32 %v2430_v47, %v2416_v56  ;;  %v4370_v49 = vpop.f32.mrb[88].mxu0  ;;  %v2240_v55 = vmul.f32 %v5679_v14, %v5743_v43  ;;  %v2242_v56 = vmul.f32 %v5679_v14, %v5770_v36 }
 0xa38   :  { %v2358_v26 = vpop.f32.mrb[89].mxu0  ;;  %v5761_v39 = vadd.f32 %v4370_v49, %v2238_v0 }
 0xa39   :  { %v2432_v61 = vadd.f32 %v2431_v40, %v2417_v54  ;;  %v5758_v62 = vadd.f32 %v2358_v26, %v2236_v19  ;;  %v2395_v16 = vadd.f32 %v2394_v11, %v5738_v58  ;;  %v4371_v63 = vpop.f32.mrb[90].mxu0  ;;  %v2241_v11 = vmul.f32 %v5679_v14, %v5754_v15 }
 0xa3a   :  { %v2361_v1 = vpop.f32.mrb[91].mxu0  ;;  %v5772_v42 = vadd.f32 %v4371_v63, %v2239_v9  ;;  %v2421_v21 = vmul.f32 %v5761_v39, %v5761_v39 }
 0xa3b   :  { %v2396_v2 = vadd.f32 %v2395_v16, %v5758_v62  ;;  %v2419_v59 = vmul.f32 %v5758_v62, %v5758_v62  ;;  %v2433_v38 = vadd.f32 %v2432_v61, %v2418_v20  ;;  %v5768_v50 = vadd.f32 %v2361_v1, %v2237_v25 }
 0xa3c   :  { %v2422_v40 = vmul.f32 %v5772_v42, %v5772_v42  ;;  %v2243_v25 = vmul.f32 %v5679_v14, %v5777_v48 }
 0xa3d   :  { %v2434_v37 = vadd.f32 %v2433_v38, %v2419_v59  ;;  %v2397_v28 = vadd.f32 %v2396_v2, %v5768_v50  ;;  %v2420_v30 = vmul.f32 %v5768_v50, %v5768_v50 }
 0xa3f   :  { %v2398_v33 = vadd.f32 %v2397_v28, %v5761_v39  ;;  %v2435_v4 = vadd.f32 %v2434_v37, %v2420_v30  ;;  %v4374_v47 = vpop.f32.mrb[92].mxu0 }
 0xa40   :  { %v2374_v54 = vpop.f32.mrb[93].mxu0  ;;  %v5793_v20 = vadd.f32 %v4374_v47, %v2242_v56 }
 0xa41   :  { %v2436_v49 = vadd.f32 %v2435_v4, %v2421_v21  ;;  %v2375_v19 = vadd.f32 %v2374_v54, %v2240_v55  ;;  %v2399_v0 = vadd.f32 %v2398_v33, %v5772_v42  ;;  %v4375_v26 = vpop.f32.mrb[94].mxu0 }
 0xa42   :  { %v2377_v61 = vpop.f32.mrb[95].mxu0  ;;  %v5795_v59 = vadd.f32 %v4375_v26, %v2243_v25  ;;  %v2425_v28 = vmul.f32 %v5793_v20, %v5793_v20 }
 0xa43   :  { %v2400_v16 = vadd.f32 %v2399_v0, %v2375_v19  ;;  %v2423_v63 = vmul.f32 %v2375_v19, %v2375_v19  ;;  %v2437_v9 = vadd.f32 %v2436_v49, %v2422_v40  ;;  %v2378_v1 = vadd.f32 %v2377_v61, %v2241_v11 }
 0xa44   :  { %v2426_v14 = vmul.f32 %v5795_v59, %v5795_v59 }
 0xa45   :  { %v2438_v2 = vadd.f32 %v2437_v9, %v2423_v63  ;;  %v2401_v38 = vadd.f32 %v2400_v16, %v2378_v1  ;;  %v2424_v37 = vmul.f32 %v2378_v1, %v2378_v1 }
 0xa47   :  { %v2402_v30 = vadd.f32 %v2401_v38, %v5793_v20  ;;  %v2439_v21 = vadd.f32 %v2438_v2, %v2424_v37 }
 0xa49   :  { %v2403_v33 = vadd.f32 %v2402_v30, %v5795_v59  ;;  %v2440_v4 = vadd.f32 %v2439_v21, %v2425_v28  ;;  %v2452_v28 = vld [vmem:[%s6229_s9 + $0x3] sm:$0x1] }
 0xa4b   :  { %v2404_v47 = vrot.slane %v2403_v33, 4  ;;  %v2441_v55 = vadd.f32 %v2440_v4, %v2426_v14 }
 0xa4d   :  { %v2405_v56 = vadd.f32 %v2404_v47, %v2403_v33  ;;  %v2442_v54 = vrot.slane %v2441_v55, 4  ;;  %v2476_v33 = vld [vmem:[%s6230_s10 + $0x3] sm:$0x1] }
 0xa4f   :  { %v2406_v11 = vrot.slane %v2405_v56, 2  ;;  %v2443_v40 = vadd.f32 %v2442_v54, %v2441_v55 }
 0xa51   :  { %v2407_v49 = vadd.f32 %v2406_v11, %v2405_v56  ;;  %v2444_v0 = vrot.slane %v2443_v40, 2 }
 0xa53   :  { %v2408_v26 = vrot.slane %v2407_v49, 1  ;;  %v2445_v25 = vadd.f32 %v2444_v0, %v2443_v40 }
 0xa55   :  { %v2409_v61 = vadd.f32 %v2408_v26, %v2407_v49  ;;  %v2446_v16 = vrot.slane %v2445_v25, 1 }
 0xa57   :  { %v2410_v63 = vmul.f32 0.0625, %v2409_v61  ;;  %v2447_v9 = vadd.f32 %v2446_v16, %v2445_v25 }
 0xa59   :  { %v2448_v2 = vmul.f32 0.0625, %v2447_v9  ;;  %v2449_v38 = vmul.f32 %v2410_v63, %v2410_v63 }
 0xa5b   :  { %v2450_v37 = vsub.f32 %v2448_v2, %v2449_v38 }
 0xa5d   :  { %v2451_v15 = vmax.f32 %v2450_v37, 0.0 }
 0xa5f   :  { %v2453_v30 = vadd.f32 1e-05, %v2451_v15 }
 0xa61   :  { %4659 = vrsqrt.f32 %v2453_v30 }
 0xa6b   :  { %v4660_v21 = vpop.eup %4659 }
 0xa6c   :  { %v2455_v14 = vmul.f32 %v4660_v21, %v2452_v28 }
 0xa6e   :  { %v5810_v4 = vrot.slane %v2455_v14, %v5141_v51  ;;  %v2477_v47 = vmul.f32 %v2455_v14, %v2410_v63 }
 0xa70   :  { %v2473_v55 = vmul.f32 %v5810_v4, %v2378_v1  ;;  %v2478_v56 = vsub.f32 %v2476_v33, %v2477_v47  ;;  %v2460_v15 = vmul.f32 %v5810_v4, %v5689_v22  ;;  %v2461_v54 = vmul.f32 %v5810_v4, %v5699_v23 }
 0xa71   :  { %v2462_v11 = vmul.f32 %v5810_v4, %v5695_v35  ;;  %v2463_v40 = vmul.f32 %v5810_v4, %v5705_v7  ;;  %v2464_v49 = vmul.f32 %v5810_v4, %v5724_v17  ;;  %v2465_v0 = vmul.f32 %v5810_v4, %v5736_v60 }
 0xa72   :  { %v2482_v1 = vrot.slane %v2478_v56, %v5141_v51  ;;  %v2466_v22 = vmul.f32 %v5810_v4, %v5727_v18  ;;  %v2467_v23 = vmul.f32 %v5810_v4, %v5738_v58  ;;  %v2468_v35 = vmul.f32 %v5810_v4, %v5758_v62 }
 0xa73   :  { %v2469_v7 = vmul.f32 %v5810_v4, %v5768_v50  ;;  %v2470_v17 = vmul.f32 %v5810_v4, %v5761_v39  ;;  %v2471_v60 = vmul.f32 %v5810_v4, %v5772_v42  ;;  %v2472_v26 = vmul.f32 %v5810_v4, %v2375_v19 }
 0xa74   :  { %v2496_v25 = vadd.f32 %v2482_v1, %v2473_v55  ;;  %v2483_v61 = vadd.f32 %v2482_v1, %v2460_v15  ;;  %v2484_v18 = vadd.f32 %v2482_v1, %v2461_v54  ;;  %v2485_v16 = vadd.f32 %v2482_v1, %v2462_v11 }
 0xa75   :  { %v2486_v63 = vadd.f32 %v2482_v1, %v2463_v40  ;;  %v2487_v58 = vadd.f32 %v2482_v1, %v2464_v49  ;;  %v2488_v9 = vadd.f32 %v2482_v1, %v2465_v0  ;;  %v2489_v2 = vadd.f32 %v2482_v1, %v2466_v22 }
 0xa76   :  { %v2499_v62 = vmul.f32 0.1, %v2483_v61  ;;  %v2500_v38 = vmul.f32 0.1, %v2484_v18  ;;  %v2501_v37 = vmul.f32 0.1, %v2485_v16  ;;  %v2490_v50 = vadd.f32 %v2482_v1, %v2467_v23 }
 0xa77   :  { %v2502_v30 = vmul.f32 0.1, %v2486_v63  ;;  %v2503_v28 = vmul.f32 0.1, %v2487_v58  ;;  %v2504_v39 = vmul.f32 0.1, %v2488_v9  ;;  %v2491_v21 = vadd.f32 %v2482_v1, %v2468_v35 }
 0xa78   :  { %v2515_v14 = vmax.f32 %v2483_v61, %v2499_v62  ;;  %v2516_v42 = vmax.f32 %v2484_v18, %v2500_v38  ;;  %v2517_v33 = vmax.f32 %v2485_v16, %v2501_v37  ;;  %v2505_v19 = vmul.f32 0.1, %v2489_v2 }
 0xa79   :  { %v2518_v47 = vmax.f32 %v2486_v63, %v2502_v30  ;;  %v2519_v55 = vmax.f32 %v2487_v58, %v2503_v28  ;;  %v2520_v56 = vmax.f32 %v2488_v9, %v2504_v39  ;;  %v2506_v15 = vmul.f32 0.1, %v2490_v50 }
 0xa7a   :  { %v2531_v54 = vpack.c.bf16 %v2516_v42, %v2515_v14  ;;  %v2521_v11 = vmax.f32 %v2489_v2, %v2505_v19  ;;  %v2492_v40 = vadd.f32 %v2482_v1, %v2469_v7  ;;  %v2507_v49 = vmul.f32 0.1, %v2491_v21 }
 0xa7b   :  { %v2532_v0 = vpack.c.bf16 %v2518_v47, %v2517_v33  ;;  %v2533_v22 = vpack.c.bf16 %v2520_v56, %v2519_v55  ;;  %v2522_v51 = vmax.f32 %v2490_v50, %v2506_v15  ;;  %v2493_v23 = vadd.f32 %v2482_v1, %v2470_v17 }
 0xa7c   :  { %4392 = vmatprep.mubr.bf16.mxu1 %v2531_v54  ;;  %v2508_v48 = vmul.f32 0.1, %v2492_v40  ;;  %v2523_v43 = vmax.f32 %v2491_v21, %v2507_v49  ;;  %v2494_v35 = vadd.f32 %v2482_v1, %v2471_v60  ;;  %v2495_v61 = vadd.f32 %v2482_v1, %v2472_v26 }
 0xa7d   :  { %4393 = vmatmul.mubr.bf16.vlgmr.msra.gmra.mrb[80].mxu1 %v2532_v0  ;;  %v2534_v18 = vpack.c.bf16 %v2522_v51, %v2521_v11  ;;  %v2509_v16 = vmul.f32 0.1, %v2493_v23  ;;  %v2512_v63 = vmul.f32 0.1, %v2496_v25  ;;  %v2474_v58 = vmul.f32 %v5810_v4, %v5793_v20 }
 0xa7e   :  { %4396 = vmatprep.mubr.bf16.mxu1 %v2533_v22  ;;  %v2524_v9 = vmax.f32 %v2492_v40, %v2508_v48  ;;  %v2510_v7 = vmul.f32 0.1, %v2494_v35  ;;  %v2511_v2 = vmul.f32 0.1, %v2495_v61  ;;  %v2475_v62 = vmul.f32 %v5810_v4, %v5795_v59 }
 0xa7f   :  { %v2525_v17 = vmax.f32 %v2493_v23, %v2509_v16  ;;  %v2528_v38 = vmax.f32 %v2496_v25, %v2512_v63  ;;  %v2497_v37 = vadd.f32 %v2482_v1, %v2474_v58  ;;  %v4637_v58 = vld [vmem:[%s6223_s6 + $0x180] sm:$0xff]  }
 0xa80   :  { %v2535_v50 = vpack.c.bf16 %v2524_v9, %v2523_v43  ;;  %v2526_v60 = vmax.f32 %v2494_v35, %v2510_v7  ;;  %v2527_v26 = vmax.f32 %v2495_v61, %v2511_v2  ;;  %v2498_v30 = vadd.f32 %v2482_v1, %v2475_v62  ;;  %4440 = vmatprep.subr.bf16.mxu1 %v4637_v58 }
 0xa81   :  { %v2513_v51 = vmul.f32 0.1, %v2497_v37  ;;  %4441 = vmatpush3.bf16.msra.mxu1 %v4637_v58 }
 0xa82   :  { %v2536_v28 = vpack.c.bf16 %v2526_v60, %v2525_v17  ;;  %v2537_v39 = vpack.c.bf16 %v2528_v38, %v2527_v26  ;;  %v2514_v21 = vmul.f32 0.1, %v2498_v30 }
 0xa83   :  { %v2529_v14 = vmax.f32 %v2497_v37, %v2513_v51 }
 0xa84   :  { %v2530_v20 = vmax.f32 %v2498_v30, %v2514_v21 }
 0xa85   :  { %4397 = vmatmul.mubr.bf16.gmra.mrb[84].mxu1 %v2534_v18 }
 0xa86   :  { %4400 = vmatprep.mubr.bf16.mxu1 %v2535_v50  ;;  %v2538_v48 = vpack.c.bf16 %v2530_v20, %v2529_v14 }
 0xa8d   :  { %4401 = vmatmul.mubr.bf16.gmra.mrb[88].mxu1 %v2536_v28 }
 0xa8e   :  { %4404 = vmatprep.mubr.bf16.mxu1 %v2537_v39 }
 0xa95   :  { %4405 = vmatmul.mubr.bf16.gmra.mrb[92].mxu1 %v2538_v48 }
 0xb50   :  { %v4394_v59 = vpop.f32.mrb[80].mxu1 }
 0xb51   :  { %v2638_v4 = vpop.f32.mrb[81].mxu1 }
 0xb52   :  { %v4395_v25 = vpop.f32.mrb[82].mxu1 }
 0xb53   :  { %v2702_v42 = vpack.c.bf16 %v4395_v25, %v4394_v59  ;;  %v2641_v43 = vpop.f32.mrb[83].mxu1 }
 0xb54   :  { %v2701_v33 = vpack.c.bf16 %v2641_v43, %v2638_v4 }
 0xb56   :  { %4408 = vmatprep.subr.bf16.mxu0 %v2701_v33 }
 0xb57   :  { %4409 = vmatpush3.bf16.msra.mxu0 %v2701_v33 }
 0xb58   :  { %v4398_v1 = vpop.f32.mrb[84].mxu1  ;;  %4410 = vmatprep.subr.bf16.mxu0 %v2702_v42 }
 0xb59   :  { %v2654_v19 = vpop.f32.mrb[85].mxu1 }
 0xb5a   :  { %v4399_v47 = vpop.f32.mrb[86].mxu1 }
 0xb5b   :  { %v2704_v55 = vpack.c.bf16 %v4399_v47, %v4398_v1  ;;  %v2657_v56 = vpop.f32.mrb[87].mxu1  ;;  %4411 = vmatpush3.bf16.msra.mxu0 %v2702_v42 }
 0xb5c   :  { %v2703_v15 = vpack.c.bf16 %v2657_v56, %v2654_v19 }
 0xb5e   :  { %4412 = vmatprep.subr.bf16.mxu0 %v2703_v15 }
 0xb5f   :  { %4413 = vmatpush3.bf16.msra.mxu0 %v2703_v15 }
 0xb60   :  { %v4402_v54 = vpop.f32.mrb[88].mxu1  ;;  %4414 = vmatprep.subr.bf16.mxu0 %v2704_v55 }
 0xb61   :  { %v2670_v11 = vpop.f32.mrb[89].mxu1 }
 0xb62   :  { %v4403_v40 = vpop.f32.mrb[90].mxu1 }
 0xb63   :  { %v2706_v49 = vpack.c.bf16 %v4403_v40, %v4402_v54  ;;  %v2673_v0 = vpop.f32.mrb[91].mxu1  ;;  %4415 = vmatpush3.bf16.msra.mxu0 %v2704_v55 }
 0xb64   :  { %v2705_v22 = vpack.c.bf16 %v2673_v0, %v2670_v11 }
 0xb66   :  { %4416 = vmatprep.subr.bf16.mxu0 %v2705_v22 }
 0xb67   :  { %4417 = vmatpush3.bf16.msra.mxu0 %v2705_v22 }
 0xb68   :  { %v4406_v23 = vpop.f32.mrb[92].mxu1  ;;  %4418 = vmatprep.subr.bf16.mxu0 %v2706_v49 }
 0xb69   :  { %v2686_v35 = vpop.f32.mrb[93].mxu1 }
 0xb6a   :  { %v4407_v61 = vpop.f32.mrb[94].mxu1 }
 0xb6b   :  { %v2708_v18 = vpack.c.bf16 %v4407_v61, %v4406_v23  ;;  %v2689_v16 = vpop.f32.mrb[95].mxu1  ;;  %4419 = vmatpush3.bf16.msra.mxu0 %v2706_v49 }
 0xb6c   :  { %v2707_v63 = vpack.c.bf16 %v2689_v16, %v2686_v35 }
 0xb6e   :  { %4420 = vmatprep.subr.bf16.mxu0 %v2707_v63 }
 0xb6f   :  { %4421 = vmatpush3.bf16.msra.mxu0 %v2707_v63 }
 0xb70   :  { %4422 = vmatprep.subr.bf16.mxu0 %v2708_v18 }
 0xb73   :  { %4423 = vmatpush3.bf16.msra.mxu0 %v2708_v18 }
 0xb76   :  { %4425 = vmatmul.mubr.bf16.vlgmr.msra.gmra.mrb[96].mxu0 %v5600_v27  ;;  %v4638_v27 = vld [vmem:[%s6223_s6 + $0x188] sm:$0xff]  }
 0xb77   :  { %4428 = vmatprep.mubr.bf16.mxu0 %v5605_v53  ;;  %4442 = vmatprep.subr.bf16.mxu1 %v4638_v27  ;;  %v4639_v53 = vld [vmem:[%s6223_s6 + $0x190] sm:$0xff]  }
 0xb78   :  { %4443 = vmatpush3.bf16.msra.mxu1 %v4638_v27 }
 0xb79   :  { %4444 = vmatprep.subr.bf16.mxu1 %v4639_v53 }
 0xb7c   :  { %4445 = vmatpush3.bf16.msra.mxu1 %v4639_v53 }
 0xb7e   :  { %4429 = vmatmul.mubr.bf16.gmra.mrb[100].mxu0 %v5612_v57  ;;  %v4641_v57 = vld [vmem:[%s6223_s6 + $0x1a0] sm:$0xff]  }
 0xb7f   :  { %4432 = vmatprep.mubr.bf16.mxu0 %v5617_v29  ;;  %v4642_v29 = vld [vmem:[%s6223_s6 + $0x1a8] sm:$0xff]  }
 0xb86   :  { %4433 = vmatmul.mubr.bf16.gmra.mrb[104].mxu0 %v5624_v46  ;;  %v4643_v46 = vld [vmem:[%s6223_s6 + $0x1b0] sm:$0xff]  }
 0xb87   :  { %4436 = vmatprep.mubr.bf16.mxu0 %v5629_v31  ;;  %v4644_v31 = vld [vmem:[%s6223_s6 + $0x1b8] sm:$0xff]  }
 0xb8e   :  { %4437 = vmatmul.mubr.bf16.gmra.mrb[108].mxu0 %v5636_v3  ;;  %v5878_v3 = vld [vmem:[%s6225_s8 + $0x6] ss:$0 sm:$0xff] }
 0xb8f   :  { %4488 = vmatprep.mubr.bf16.mxu0 %v5594_v44  ;;  %v4640_v44 = vld [vmem:[%s6223_s6 + $0x198] sm:$0xff]   ;;  %v2716_v9 = vmul.f32 %v5878_v3, %v5668_v6  ;;  %v2714_v2 = vmul.f32 %v5878_v3, %v5664_v12  ;;  %v2717_v38 = vmul.f32 %v5878_v3, %v5670_v8  ;;  %v2715_v60 = vmul.f32 %v5878_v3, %v5666_v32 }
 0xb90   :  { %4446 = vmatprep.subr.bf16.mxu1 %v4640_v44  ;;  %v2720_v14 = vmul.f32 %v5878_v3, %v5681_v10  ;;  %v2718_v25 = vmul.f32 %v5878_v3, %v5672_v34  ;;  %v2721_v33 = vmul.f32 %v5878_v3, %v5683_v24  ;;  %v2719_v1 = vmul.f32 %v5878_v3, %v5674_v13 }
 0xb91   :  { %4447 = vmatpush3.bf16.msra.mxu1 %v4640_v44  ;;  %v2724_v18 = vmul.f32 %v5878_v3, %v5720_v41  ;;  %v2722_v53 = vmul.f32 %v5878_v3, %v5693_v52 }
 0xb92   :  { %4448 = vmatprep.subr.bf16.mxu1 %v4641_v57 }
 0xb95   :  { %4449 = vmatpush3.bf16.msra.mxu1 %v4641_v57 }
 0xb96   :  { %4450 = vmatprep.subr.bf16.mxu1 %v4642_v29 }
 0xb99   :  { %4451 = vmatpush3.bf16.msra.mxu1 %v4642_v29  ;;  %v2725_v29 = vmul.f32 %v5878_v3, %v5731_v5 }
 0xb9a   :  { %4452 = vmatprep.subr.bf16.mxu1 %v4643_v46 }
 0xb9d   :  { %4453 = vmatpush3.bf16.msra.mxu1 %v4643_v46  ;;  %v2723_v46 = vmul.f32 %v5878_v3, %v5701_v45 }
 0xb9e   :  { %4454 = vmatprep.subr.bf16.mxu1 %v4644_v31 }
 0xba1   :  { %4455 = vmatpush3.bf16.msra.mxu1 %v4644_v31 }
 0xc49   :  { %v4426_v7 = vpop.f32.mrb[96].mxu0 }
 0xc4a   :  { %v5884_v62 = vadd.f32 %v4426_v7, %v2716_v9  ;;  %v2764_v17 = vpop.f32.mrb[97].mxu0 }
 0xc4b   :  { %v5888_v37 = vadd.f32 %v2764_v17, %v2714_v2  ;;  %v4427_v50 = vpop.f32.mrb[98].mxu0 }
 0xc4c   :  { %v5892_v26 = vadd.f32 %v4427_v50, %v2717_v38  ;;  %v2767_v30 = vpop.f32.mrb[99].mxu0  ;;  %v2851_v20 = vmul.f32 %v5884_v62, %v5884_v62 }
 0xc4d   :  { %v5894_v51 = vadd.f32 %v2767_v30, %v2715_v60  ;;  %v2849_v28 = vmul.f32 %v5888_v37, %v5888_v37 }
 0xc4e   :  { %v2852_v19 = vmul.f32 %v5892_v26, %v5892_v26 }
 0xc4f   :  { %v2827_v39 = vadd.f32 %v5894_v51, %v5888_v37  ;;  %v2850_v21 = vmul.f32 %v5894_v51, %v5894_v51 }
 0xc51   :  { %v2828_v48 = vadd.f32 %v2827_v39, %v5884_v62  ;;  %v2865_v59 = vadd.f32 %v2850_v21, %v2849_v28  ;;  %v4430_v4 = vpop.f32.mrb[100].mxu0 }
 0xc52   :  { %v5909_v42 = vadd.f32 %v4430_v4, %v2720_v14  ;;  %v2780_v43 = vpop.f32.mrb[101].mxu0 }
 0xc53   :  { %v2866_v47 = vadd.f32 %v2865_v59, %v2851_v20  ;;  %v5917_v55 = vadd.f32 %v2780_v43, %v2718_v25  ;;  %v2829_v56 = vadd.f32 %v2828_v48, %v5892_v26  ;;  %v4431_v15 = vpop.f32.mrb[102].mxu0  ;;  %v2728_v48 = vmul.f32 %v5878_v3, %v5770_v36 }
 0xc54   :  { %v5920_v54 = vadd.f32 %v4431_v15, %v2721_v33  ;;  %v2783_v11 = vpop.f32.mrb[103].mxu0  ;;  %v2855_v16 = vmul.f32 %v5909_v42, %v5909_v42  ;;  %v6247_v33 = vld [vmem:[#allocation3_spill] sm:$0xff] }
 0xc55   :  { %v2830_v40 = vadd.f32 %v2829_v56, %v5917_v55  ;;  %v2853_v49 = vmul.f32 %v5917_v55, %v5917_v55  ;;  %v2867_v0 = vadd.f32 %v2866_v47, %v2852_v19  ;;  %v5925_v22 = vadd.f32 %v2783_v11, %v2719_v1  ;;  %v6248_v19 = vld [vmem:[#allocation5_spill] sm:$0xff]  ;;  %v6249_v11 = vld [vmem:[#allocation4_spill] sm:$0xff] }
 0xc56   :  { %v2856_v31 = vmul.f32 %v5920_v54, %v5920_v54  ;;  %v2726_v1 = vmul.f32 %v5878_v3, %v6247_v33  ;;  %v2729_v47 = vmul.f32 %v5878_v3, %v6248_v19 }
 0xc57   :  { %v2868_v23 = vadd.f32 %v2867_v0, %v2853_v49  ;;  %v2831_v35 = vadd.f32 %v2830_v40, %v5925_v22  ;;  %v2854_v61 = vmul.f32 %v5925_v22, %v5925_v22  ;;  %v2727_v40 = vmul.f32 %v5878_v3, %v6249_v11 }
 0xc59   :  { %v2832_v63 = vadd.f32 %v2831_v35, %v5909_v42  ;;  %v2869_v58 = vadd.f32 %v2868_v23, %v2854_v61  ;;  %v4434_v27 = vpop.f32.mrb[104].mxu0 }
 0xc5a   :  { %v5937_v44 = vadd.f32 %v4434_v27, %v2724_v18  ;;  %v2796_v57 = vpop.f32.mrb[105].mxu0 }
 0xc5b   :  { %v2870_v9 = vadd.f32 %v2869_v58, %v2855_v16  ;;  %v5945_v7 = vadd.f32 %v2796_v57, %v2722_v53  ;;  %v2833_v2 = vadd.f32 %v2832_v63, %v5920_v54  ;;  %v4435_v17 = vpop.f32.mrb[106].mxu0 }
 0xc5c   :  { %v5948_v38 = vadd.f32 %v4435_v17, %v2725_v29  ;;  %v2799_v50 = vpop.f32.mrb[107].mxu0  ;;  %v2859_v59 = vmul.f32 %v5937_v44, %v5937_v44 }
 0xc5d   :  { %v2834_v60 = vadd.f32 %v2833_v2, %v5945_v7  ;;  %v2857_v30 = vmul.f32 %v5945_v7, %v5945_v7  ;;  %v2871_v28 = vadd.f32 %v2870_v9, %v2856_v31  ;;  %v5953_v39 = vadd.f32 %v2799_v50, %v2723_v46 }
 0xc5e   :  { %v2860_v49 = vmul.f32 %v5948_v38, %v5948_v38 }
 0xc5f   :  { %v2872_v21 = vadd.f32 %v2871_v28, %v2857_v30  ;;  %v2835_v14 = vadd.f32 %v2834_v60, %v5953_v39  ;;  %v2858_v20 = vmul.f32 %v5953_v39, %v5953_v39 }
 0xc61   :  { %v2836_v4 = vadd.f32 %v2835_v14, %v5937_v44  ;;  %v2873_v25 = vadd.f32 %v2872_v21, %v2858_v20  ;;  %v4438_v43 = vpop.f32.mrb[108].mxu0 }
 0xc62   :  { %v5967_v56 = vadd.f32 %v4438_v43, %v2728_v48  ;;  %v2812_v15 = vpop.f32.mrb[109].mxu0 }
 0xc63   :  { %v2874_v0 = vadd.f32 %v2873_v25, %v2859_v59  ;;  %v2813_v23 = vadd.f32 %v2812_v15, %v2726_v1  ;;  %v2837_v35 = vadd.f32 %v2836_v4, %v5948_v38  ;;  %v4439_v61 = vpop.f32.mrb[110].mxu0 }
 0xc64   :  { %v5974_v18 = vadd.f32 %v4439_v61, %v2729_v47  ;;  %v2815_v16 = vpop.f32.mrb[111].mxu0  ;;  %v2863_v3 = vmul.f32 %v5967_v56, %v5967_v56 }
 0xc65   :  { %v2838_v63 = vadd.f32 %v2837_v35, %v2813_v23  ;;  %v2861_v58 = vmul.f32 %v2813_v23, %v2813_v23  ;;  %v2875_v27 = vadd.f32 %v2874_v0, %v2860_v49  ;;  %v2816_v53 = vadd.f32 %v2815_v16, %v2727_v40  ;;  %v2890_v16 = vld [vmem:[%s6229_s9 + $0x4] sm:$0x1] }
 0xc66   :  { %v2864_v2 = vmul.f32 %v5974_v18, %v5974_v18 }
 0xc67   :  { %v2876_v57 = vadd.f32 %v2875_v27, %v2861_v58  ;;  %v2839_v29 = vadd.f32 %v2838_v63, %v2816_v53  ;;  %v2862_v46 = vmul.f32 %v2816_v53, %v2816_v53  ;;  %v2914_v27 = vld [vmem:[%s6230_s10 + $0x4] sm:$0x1] }
 0xc69   :  { %v2840_v31 = vadd.f32 %v2839_v29, %v5967_v56  ;;  %v2877_v9 = vadd.f32 %v2876_v57, %v2862_v46  ;;  %v6250_v57 = vld [vmem:[#allocation2_spill] sm:$0xff] }
 0xc6b   :  { %v2841_v17 = vadd.f32 %v2840_v31, %v5974_v18  ;;  %v2878_v50 = vadd.f32 %v2877_v9, %v2863_v3 }
 0xc6d   :  { %v2842_v60 = vrot.slane %v2841_v17, 4  ;;  %v2879_v30 = vadd.f32 %v2878_v50, %v2864_v2 }
 0xc6f   :  { %v2843_v28 = vadd.f32 %v2842_v60, %v2841_v17  ;;  %v2880_v21 = vrot.slane %v2879_v30, 4 }
 0xc71   :  { %v2844_v14 = vrot.slane %v2843_v28, 2  ;;  %v2881_v20 = vadd.f32 %v2880_v21, %v2879_v30 }
 0xc73   :  { %v2845_v48 = vadd.f32 %v2844_v14, %v2843_v28  ;;  %v2882_v59 = vrot.slane %v2881_v20, 2 }
 0xc75   :  { %v2846_v4 = vrot.slane %v2845_v48, 1  ;;  %v2883_v25 = vadd.f32 %v2882_v59, %v2881_v20 }
 0xc77   :  { %v2847_v43 = vadd.f32 %v2846_v4, %v2845_v48  ;;  %v2884_v1 = vrot.slane %v2883_v25, 1 }
 0xc79   :  { %v2848_v47 = vmul.f32 0.0625, %v2847_v43  ;;  %v2885_v15 = vadd.f32 %v2884_v1, %v2883_v25 }
 0xc7b   :  { %v2886_v40 = vmul.f32 0.0625, %v2885_v15  ;;  %v2887_v49 = vmul.f32 %v2848_v47, %v2848_v47 }
 0xc7d   :  { %v2888_v0 = vsub.f32 %v2886_v40, %v2887_v49 }
 0xc7f   :  { %v2889_v35 = vmax.f32 %v2888_v0, 0.0 }
 0xc81   :  { %v2891_v61 = vadd.f32 1e-05, %v2889_v35 }
 0xc83   :  { %4661 = vrsqrt.f32 %v2891_v61 }
 0xc8d   :  { %v4662_v63 = vpop.eup %4661 }
 0xc8e   :  { %v2893_v58 = vmul.f32 %v4662_v63, %v2890_v16 }
 0xc90   :  { %v5989_v29 = vrot.slane %v2893_v58, %v6250_v57  ;;  %v2915_v46 = vmul.f32 %v2893_v58, %v2848_v47 }
 0xc92   :  { %v2911_v3 = vmul.f32 %v5989_v29, %v2816_v53  ;;  %v2916_v31 = vsub.f32 %v2914_v27, %v2915_v46  ;;  %v2898_v9 = vmul.f32 %v5989_v29, %v5888_v37  ;;  %v2899_v2 = vmul.f32 %v5989_v29, %v5894_v51 }
 0xc93   :  { %v2900_v17 = vmul.f32 %v5989_v29, %v5884_v62  ;;  %v2901_v50 = vmul.f32 %v5989_v29, %v5892_v26  ;;  %v2902_v60 = vmul.f32 %v5989_v29, %v5917_v55  ;;  %v2903_v30 = vmul.f32 %v5989_v29, %v5925_v22 }
 0xc94   :  { %v2920_v53 = vrot.slane %v2916_v31, %v6250_v57  ;;  %v2904_v37 = vmul.f32 %v5989_v29, %v5909_v42  ;;  %v2905_v51 = vmul.f32 %v5989_v29, %v5920_v54  ;;  %v2906_v62 = vmul.f32 %v5989_v29, %v5945_v7 }
 0xc95   :  { %v2907_v26 = vmul.f32 %v5989_v29, %v5953_v39  ;;  %v2908_v55 = vmul.f32 %v5989_v29, %v5937_v44  ;;  %v2909_v22 = vmul.f32 %v5989_v29, %v5948_v38  ;;  %v2910_v28 = vmul.f32 %v5989_v29, %v2813_v23 }
 0xc96   :  { %v2934_v21 = vadd.f32 %v2920_v53, %v2911_v3  ;;  %v2921_v14 = vadd.f32 %v2920_v53, %v2898_v9  ;;  %v2922_v42 = vadd.f32 %v2920_v53, %v2899_v2  ;;  %v2923_v20 = vadd.f32 %v2920_v53, %v2900_v17 }
 0xc97   :  { %v2924_v48 = vadd.f32 %v2920_v53, %v2901_v50  ;;  %v2925_v54 = vadd.f32 %v2920_v53, %v2902_v60  ;;  %v2926_v59 = vadd.f32 %v2920_v53, %v2903_v30  ;;  %v2927_v4 = vadd.f32 %v2920_v53, %v2904_v37 }
 0xc98   :  { %v2937_v7 = vmul.f32 0.1, %v2921_v14  ;;  %v2938_v25 = vmul.f32 0.1, %v2922_v42  ;;  %v2939_v43 = vmul.f32 0.1, %v2923_v20  ;;  %v2928_v39 = vadd.f32 %v2920_v53, %v2905_v51 }
 0xc99   :  { %v2940_v1 = vmul.f32 0.1, %v2924_v48  ;;  %v2941_v47 = vmul.f32 0.1, %v2925_v54  ;;  %v2942_v44 = vmul.f32 0.1, %v2926_v59  ;;  %v2929_v15 = vadd.f32 %v2920_v53, %v2906_v62 }
 0xc9a   :  { %v2953_v40 = vmax.f32 %v2921_v14, %v2937_v7  ;;  %v2954_v38 = vmax.f32 %v2922_v42, %v2938_v25  ;;  %v2955_v49 = vmax.f32 %v2923_v20, %v2939_v43  ;;  %v2943_v23 = vmul.f32 0.1, %v2927_v4 }
 0xc9b   :  { %v2956_v0 = vmax.f32 %v2924_v48, %v2940_v1  ;;  %v2957_v35 = vmax.f32 %v2925_v54, %v2941_v47  ;;  %v2958_v61 = vmax.f32 %v2926_v59, %v2942_v44  ;;  %v2944_v16 = vmul.f32 0.1, %v2928_v39 }
 0xc9c   :  { %v2969_v63 = vpack.c.bf16 %v2954_v38, %v2953_v40  ;;  %v2959_v58 = vmax.f32 %v2927_v4, %v2943_v23  ;;  %v2930_v27 = vadd.f32 %v2920_v53, %v2907_v26  ;;  %v2945_v46 = vmul.f32 0.1, %v2929_v15 }
 0xc9d   :  { %v2970_v3 = vpack.c.bf16 %v2956_v0, %v2955_v49  ;;  %v2971_v31 = vpack.c.bf16 %v2958_v61, %v2957_v35  ;;  %v2960_v9 = vmax.f32 %v2928_v39, %v2944_v16  ;;  %v2931_v2 = vadd.f32 %v2920_v53, %v2908_v55 }
 0xc9e   :  { %4456 = vmatprep.mubr.bf16.mxu1 %v2969_v63  ;;  %v2946_v17 = vmul.f32 0.1, %v2930_v27  ;;  %v2961_v50 = vmax.f32 %v2929_v15, %v2945_v46  ;;  %v2932_v60 = vadd.f32 %v2920_v53, %v2909_v22  ;;  %v2933_v30 = vadd.f32 %v2920_v53, %v2910_v28 }
 0xc9f   :  { %4457 = vmatmul.mubr.bf16.vlgmr.msra.gmra.mrb[96].mxu1 %v2970_v3  ;;  %v2972_v37 = vpack.c.bf16 %v2960_v9, %v2959_v58  ;;  %v2947_v51 = vmul.f32 0.1, %v2931_v2  ;;  %v2950_v62 = vmul.f32 0.1, %v2934_v21  ;;  %v2912_v14 = vmul.f32 %v5989_v29, %v5967_v56 }
 0xca0   :  { %4460 = vmatprep.mubr.bf16.mxu1 %v2971_v31  ;;  %v2962_v42 = vmax.f32 %v2930_v27, %v2946_v17  ;;  %v2948_v26 = vmul.f32 0.1, %v2932_v60  ;;  %v2949_v20 = vmul.f32 0.1, %v2933_v30  ;;  %v2913_v48 = vmul.f32 %v5989_v29, %v5974_v18 }
 0xca1   :  { %v2963_v55 = vmax.f32 %v2931_v2, %v2947_v51  ;;  %v2966_v54 = vmax.f32 %v2934_v21, %v2950_v62  ;;  %v2935_v59 = vadd.f32 %v2920_v53, %v2912_v14  ;;  %v4682_v51 = vld [vmem:[%s6232_s1 + $0x18] sm:$0xff]   ;;  %v4683_v62 = vld [vmem:[%s6232_s1 + $0x20] sm:$0xff]   ;;  %v4684_v14 = vld [vmem:[%s6232_s1 + $0x28] sm:$0xff]  }
 0xca2   :  { %v2973_v4 = vpack.c.bf16 %v2962_v42, %v2961_v50  ;;  %v2964_v22 = vmax.f32 %v2932_v60, %v2948_v26  ;;  %v2965_v28 = vmax.f32 %v2933_v30, %v2949_v20  ;;  %v2936_v7 = vadd.f32 %v2920_v53, %v2913_v48  ;;  %v4680_v30 = vld [vmem:[%s6232_s1 + $0x8] sm:$0xff]   ;;  %v4685_v42 = vld [vmem:[%s6232_s1 + $0x30] sm:$0xff]   ;;  %v4686_v26 = vld [vmem:[%s6232_s1 + $0x38] sm:$0xff]  }
 0xca3   :  { %v2951_v25 = vmul.f32 0.1, %v2935_v59  ;;  %v4688_v20 = vmov 0.0   ;;  %v4645_v48 = vld [vmem:[%s6223_s6 + $0x1c0] sm:$0xff]  }
 0xca4   :  { %v2974_v43 = vpack.c.bf16 %v2964_v22, %v2963_v55  ;;  %v2975_v39 = vpack.c.bf16 %v2966_v54, %v2965_v28  ;;  %v2952_v1 = vmul.f32 0.1, %v2936_v7  ;;  %4504 = vmatprep.subr.bf16.mxu1 %v4688_v20  ;;  %v4646_v55 = vld [vmem:[%s6223_s6 + $0x1c8] sm:$0xff]   ;;  %v4647_v54 = vld [vmem:[%s6223_s6 + $0x1d0] sm:$0xff]  }
 0xca5   :  { %v2967_v47 = vmax.f32 %v2935_v59, %v2951_v25  ;;  %v6061_v59 = vld [vmem:[%s6225_s8 + $0x7] ss:$0 sm:$0xff] }
 0xca6   :  { %v2968_v56 = vmax.f32 %v2936_v7, %v2952_v1  ;;  %v3154_v22 = vmul.f32 %v6061_v59, %v5668_v6  ;;  %v3152_v7 = vmul.f32 %v6061_v59, %v5664_v12  ;;  %v4649_v6 = vld [vmem:[%s6223_s6 + $0x1e0] sm:$0xff]  }
 0xca7   :  { %4461 = vmatmul.mubr.bf16.gmra.mrb[100].mxu1 %v2972_v37  ;;  %v4681_v37 = vld [vmem:[%s6232_s1 + $0x10] sm:$0xff]  }
 0xca8   :  { %4464 = vmatprep.mubr.bf16.mxu1 %v2973_v4  ;;  %v2976_v44 = vpack.c.bf16 %v2968_v56, %v2967_v47  ;;  %v4648_v4 = vld [vmem:[%s6223_s6 + $0x1d8] sm:$0xff]   ;;  %v3153_v56 = vmul.f32 %v6061_v59, %v5666_v32 }
 0xcaf   :  { %4465 = vmatmul.mubr.bf16.gmra.mrb[104].mxu1 %v2974_v43 }
 0xcb0   :  { %4468 = vmatprep.mubr.bf16.mxu1 %v2975_v39  ;;  %v3155_v39 = vmul.f32 %v6061_v59, %v5670_v8 }
 0xcb7   :  { %4469 = vmatmul.mubr.bf16.gmra.mrb[108].mxu1 %v2976_v44 }
 0xcb8   :  { %4520 = vmatprep.mubr.msk.bf16.mxu1 %vm4689_vm0, %v4688_v20 }
 0xd72   :  { %v4458_v18 = vpop.f32.mrb[96].mxu1 }
 0xd73   :  { %v3076_v29 = vpop.f32.mrb[97].mxu1 }
 0xd74   :  { %v4459_v21 = vpop.f32.mrb[98].mxu1 }
 0xd75   :  { %v3140_v15 = vpack.c.bf16 %v4459_v21, %v4458_v18  ;;  %v3079_v40 = vpop.f32.mrb[99].mxu1  ;;  %v4650_v21 = vld [vmem:[%s6223_s6 + $0x1e8] sm:$0xff]  }
 0xd76   :  { %v3139_v38 = vpack.c.bf16 %v3079_v40, %v3076_v29 }
 0xd78   :  { %4472 = vmatprep.subr.bf16.mxu0 %v3139_v38 }
 0xd79   :  { %4473 = vmatpush3.bf16.msra.mxu0 %v3139_v38 }
 0xd7a   :  { %v4462_v53 = vpop.f32.mrb[100].mxu1  ;;  %4474 = vmatprep.subr.bf16.mxu0 %v3140_v15 }
 0xd7b   :  { %v3092_v49 = vpop.f32.mrb[101].mxu1 }
 0xd7c   :  { %v4463_v23 = vpop.f32.mrb[102].mxu1 }
 0xd7d   :  { %v3142_v0 = vpack.c.bf16 %v4463_v23, %v4462_v53  ;;  %v3095_v35 = vpop.f32.mrb[103].mxu1  ;;  %4475 = vmatpush3.bf16.msra.mxu0 %v3140_v15  ;;  %v3158_v15 = vmul.f32 %v6061_v59, %v5681_v10  ;;  %v3156_v23 = vmul.f32 %v6061_v59, %v5672_v34  ;;  %v3157_v10 = vmul.f32 %v6061_v59, %v5674_v13  ;;  %v4651_v34 = vld [vmem:[%s6223_s6 + $0x1f0] sm:$0xff]  }
 0xd7e   :  { %v3141_v61 = vpack.c.bf16 %v3095_v35, %v3092_v49 }
 0xd80   :  { %4476 = vmatprep.subr.bf16.mxu0 %v3141_v61 }
 0xd81   :  { %4477 = vmatpush3.bf16.msra.mxu0 %v3141_v61  ;;  %v3159_v61 = vmul.f32 %v6061_v59, %v5683_v24 }
 0xd82   :  { %v4466_v16 = vpop.f32.mrb[104].mxu1  ;;  %4478 = vmatprep.subr.bf16.mxu0 %v3142_v0 }
 0xd83   :  { %v3108_v63 = vpop.f32.mrb[105].mxu1 }
 0xd84   :  { %v4467_v58 = vpop.f32.mrb[106].mxu1 }
 0xd85   :  { %v3144_v27 = vpack.c.bf16 %v4467_v58, %v4466_v16  ;;  %v3111_v46 = vpop.f32.mrb[107].mxu1  ;;  %4479 = vmatpush3.bf16.msra.mxu0 %v3142_v0 }
 0xd86   :  { %v3143_v3 = vpack.c.bf16 %v3111_v46, %v3108_v63 }
 0xd88   :  { %4480 = vmatprep.subr.bf16.mxu0 %v3143_v3 }
 0xd89   :  { %4481 = vmatpush3.bf16.msra.mxu0 %v3143_v3 }
 0xd8a   :  { %v4470_v31 = vpop.f32.mrb[108].mxu1  ;;  %4482 = vmatprep.subr.bf16.mxu0 %v3144_v27 }
 0xd8b   :  { %v3124_v9 = vpop.f32.mrb[109].mxu1 }
 0xd8c   :  { %v4471_v2 = vpop.f32.mrb[110].mxu1 }
 0xd8d   :  { %v3146_v17 = vpack.c.bf16 %v4471_v2, %v4470_v31  ;;  %v3127_v50 = vpop.f32.mrb[111].mxu1  ;;  %4483 = vmatpush3.bf16.msra.mxu0 %v3144_v27 }
 0xd8e   :  { %v3145_v60 = vpack.c.bf16 %v3127_v50, %v3124_v9 }
 0xd90   :  { %4484 = vmatprep.subr.bf16.mxu0 %v3145_v60 }
 0xd91   :  { %4485 = vmatpush3.bf16.msra.mxu0 %v3145_v60 }
 0xd92   :  { %4486 = vmatprep.subr.bf16.mxu0 %v3146_v17 }
 0xd95   :  { %4487 = vmatpush3.bf16.msra.mxu0 %v3146_v17 }
 0xd96   :  { %4524 = vmatprep.subr.bf16.mxu0 %v4688_v20 }
 0xd98   :  { %4489 = vmatmul.mubr.bf16.vlgmr.msra.gmra.mrb[112].mxu0 %v4680_v30  ;;  %v3162_v30 = vmul.f32 %v6061_v59, %v5720_v41  ;;  %v3161_v41 = vmul.f32 %v6061_v59, %v5701_v45 }
 0xd99   :  { %4492 = vmatprep.mubr.bf16.mxu0 %v4681_v37  ;;  %4525 = vmatpush3.bf16.msra.mxu0 %v4645_v48 }
 0xd9a   :  { %4526 = vmatprep.subr.bf16.mxu0 %v4688_v20 }
 0xd9d   :  { %4527 = vmatpush3.bf16.msra.mxu0 %v4646_v55  ;;  %v3163_v55 = vmul.f32 %v6061_v59, %v5731_v5 }
 0xd9e   :  { %4528 = vmatprep.subr.bf16.mxu0 %v4688_v20 }
 0xda0   :  { %4493 = vmatmul.mubr.bf16.gmra.mrb[116].mxu0 %v4682_v51 }
 0xda1   :  { %4496 = vmatprep.mubr.bf16.mxu0 %v4683_v62  ;;  %4529 = vmatpush3.bf16.msra.mxu0 %v4647_v54 }
 0xda2   :  { %4530 = vmatprep.subr.bf16.mxu0 %v4688_v20 }
 0xda5   :  { %4531 = vmatpush3.bf16.msra.mxu0 %v4648_v4 }
 0xda6   :  { %4532 = vmatprep.subr.bf16.mxu0 %v4688_v20 }
 0xda8   :  { %4497 = vmatmul.mubr.bf16.gmra.mrb[120].mxu0 %v4684_v14 }
 0xda9   :  { %4500 = vmatprep.mubr.bf16.mxu0 %v4685_v42  ;;  %4533 = vmatpush3.bf16.msra.mxu0 %v4649_v6  ;;  %v3160_v42 = vmul.f32 %v6061_v59, %v5693_v52 }
 0xdaa   :  { %4534 = vmatprep.subr.bf16.mxu0 %v4688_v20 }
 0xdad   :  { %4535 = vmatpush3.bf16.msra.mxu0 %v4650_v21 }
 0xdae   :  { %4536 = vmatprep.subr.bf16.mxu0 %v4688_v20 }
 0xdb0   :  { %4501 = vmatmul.mubr.bf16.gmra.mrb[124].mxu0 %v4686_v26 }
 0xdb1   :  { %4540 = vmatprep.mubr.msk.bf16.mxu0 %vm4689_vm0, %v4688_v20  ;;  %4537 = vmatpush3.bf16.msra.mxu0 %v4651_v34 }
 0xdb2   :  { %4538 = vmatprep.subr.bf16.mxu0 %v4688_v20 }
 0xe6b   :  { %v4490_v28 = vpop.f32.mrb[112].mxu0 }
 0xe6c   :  { %v6071_v25 = vadd.f32 %v4490_v28, %v3154_v22  ;;  %v3202_v43 = vpop.f32.mrb[113].mxu0 }
 0xe6d   :  { %v6075_v1 = vadd.f32 %v3202_v43, %v3152_v7  ;;  %v4491_v47 = vpop.f32.mrb[114].mxu0 }
 0xe6e   :  { %v6082_v44 = vadd.f32 %v4491_v47, %v3155_v39  ;;  %v3205_v12 = vpop.f32.mrb[115].mxu0  ;;  %v3289_v40 = vmul.f32 %v6071_v25, %v6071_v25 }
 0xe6f   :  { %v6085_v18 = vadd.f32 %v3205_v12, %v3153_v56  ;;  %v3287_v8 = vmul.f32 %v6075_v1, %v6075_v1 }
 0xe70   :  { %v3290_v16 = vmul.f32 %v6082_v44, %v6082_v44 }
 0xe71   :  { %v3265_v29 = vadd.f32 %v6085_v18, %v6075_v1  ;;  %v3288_v32 = vmul.f32 %v6085_v18, %v6085_v18 }
 0xe73   :  { %v3266_v38 = vadd.f32 %v3265_v29, %v6071_v25  ;;  %v3303_v53 = vadd.f32 %v3288_v32, %v3287_v8  ;;  %v4494_v49 = vpop.f32.mrb[116].mxu0  ;;  %v3166_v8 = vmul.f32 %v6061_v59, %v5770_v36 }
 0xe74   :  { %v6104_v0 = vadd.f32 %v4494_v49, %v3158_v15  ;;  %v3218_v35 = vpop.f32.mrb[117].mxu0 }
 0xe75   :  { %v3304_v63 = vadd.f32 %v3303_v53, %v3289_v40  ;;  %v6112_v58 = vadd.f32 %v3218_v35, %v3156_v23  ;;  %v3267_v27 = vadd.f32 %v3266_v38, %v6082_v44  ;;  %v4495_v46 = vpop.f32.mrb[118].mxu0  ;;  %v3164_v40 = vmul.f32 %v6061_v59, %v6247_v33 }
 0xe76   :  { %v6118_v3 = vadd.f32 %v4495_v46, %v3159_v61  ;;  %v3221_v24 = vpop.f32.mrb[119].mxu0  ;;  %v3293_v37 = vmul.f32 %v6104_v0, %v6104_v0  ;;  %v3167_v38 = vmul.f32 %v6061_v59, %v6248_v19  ;;  %v3165_v23 = vmul.f32 %v6061_v59, %v6249_v11 }
 0xe77   :  { %v3268_v13 = vadd.f32 %v3267_v27, %v6112_v58  ;;  %v3291_v31 = vmul.f32 %v6112_v58, %v6112_v58  ;;  %v3305_v9 = vadd.f32 %v3304_v63, %v3290_v16  ;;  %v6124_v2 = vadd.f32 %v3221_v24, %v3157_v10 }
 0xe78   :  { %v3294_v54 = vmul.f32 %v6118_v3, %v6118_v3 }
 0xe79   :  { %v3306_v17 = vadd.f32 %v3305_v9, %v3291_v31  ;;  %v3269_v50 = vadd.f32 %v3268_v13, %v6124_v2  ;;  %v3292_v60 = vmul.f32 %v6124_v2, %v6124_v2 }
 0xe7b   :  { %v3270_v51 = vadd.f32 %v3269_v50, %v6104_v0  ;;  %v3307_v62 = vadd.f32 %v3306_v17, %v3292_v60  ;;  %v4498_v14 = vpop.f32.mrb[120].mxu0 }
 0xe7c   :  { %v6137_v26 = vadd.f32 %v4498_v14, %v3162_v30  ;;  %v3234_v48 = vpop.f32.mrb[121].mxu0 }
 0xe7d   :  { %v3308_v4 = vadd.f32 %v3307_v62, %v3293_v37  ;;  %v6145_v22 = vadd.f32 %v3234_v48, %v3160_v42  ;;  %v3271_v28 = vadd.f32 %v3270_v51, %v6118_v3  ;;  %v4499_v7 = vpop.f32.mrb[122].mxu0 }
 0xe7e   :  { %v6148_v43 = vadd.f32 %v4499_v7, %v3163_v55  ;;  %v3237_v52 = vpop.f32.mrb[123].mxu0  ;;  %v3297_v29 = vmul.f32 %v6137_v26, %v6137_v26 }
 0xe7f   :  { %v3272_v39 = vadd.f32 %v3271_v28, %v6145_v22  ;;  %v3295_v5 = vmul.f32 %v6145_v22, %v6145_v22  ;;  %v3309_v47 = vadd.f32 %v3308_v4, %v3294_v54  ;;  %v6153_v56 = vadd.f32 %v3237_v52, %v3161_v41 }
 0xe80   :  { %v3298_v36 = vmul.f32 %v6148_v43, %v6148_v43 }
 0xe81   :  { %v3310_v45 = vadd.f32 %v3309_v47, %v3295_v5  ;;  %v3273_v6 = vadd.f32 %v3272_v39, %v6153_v56  ;;  %v3296_v12 = vmul.f32 %v6153_v56, %v6153_v56 }
 0xe83   :  { %v3274_v32 = vadd.f32 %v3273_v6, %v6137_v26  ;;  %v3311_v21 = vadd.f32 %v3310_v45, %v3296_v12  ;;  %v4502_v15 = vpop.f32.mrb[124].mxu0  ;;  %v3328_v12 = vld [vmem:[%s6229_s9 + $0x5] sm:$0x1] }
 0xe84   :  { %v6167_v53 = vadd.f32 %v4502_v15, %v3166_v8  ;;  %v3250_v49 = vpop.f32.mrb[125].mxu0 }
 0xe85   :  { %v3312_v35 = vadd.f32 %v3311_v21, %v3297_v29  ;;  %v3251_v61 = vadd.f32 %v3250_v49, %v3164_v40  ;;  %v3275_v10 = vadd.f32 %v3274_v32, %v6148_v43  ;;  %v4503_v16 = vpop.f32.mrb[126].mxu0  ;;  %v3352_v32 = vld [vmem:[%s6230_s10 + $0x5] sm:$0x1] }
 0xe86   :  { %v6174_v63 = vadd.f32 %v4503_v16, %v3167_v38  ;;  %v3253_v33 = vpop.f32.mrb[127].mxu0  ;;  %v3301_v11 = vmul.f32 %v6167_v53, %v6167_v53 }
 0xe87   :  { %v3276_v27 = vadd.f32 %v3275_v10, %v3251_v61  ;;  %v3299_v46 = vmul.f32 %v3251_v61, %v3251_v61  ;;  %v3313_v19 = vadd.f32 %v3312_v35, %v3298_v36  ;;  %v3254_v34 = vadd.f32 %v3253_v33, %v3165_v23 }
 0xe88   :  { %v3302_v17 = vmul.f32 %v6174_v63, %v6174_v63 }
 0xe89   :  { %v3314_v24 = vadd.f32 %v3313_v19, %v3299_v46  ;;  %v3277_v13 = vadd.f32 %v3276_v27, %v3254_v34  ;;  %v3300_v31 = vmul.f32 %v3254_v34, %v3254_v34 }
 0xe8b   :  { %v3278_v59 = vadd.f32 %v3277_v13, %v6167_v53  ;;  %v3315_v9 = vadd.f32 %v3314_v24, %v3300_v31 }
 0xe8d   :  { %v3279_v50 = vadd.f32 %v3278_v59, %v6174_v63  ;;  %v3316_v60 = vadd.f32 %v3315_v9, %v3301_v11 }
 0xe8f   :  { %v3280_v30 = vrot.slane %v3279_v50, 4  ;;  %v3317_v37 = vadd.f32 %v3316_v60, %v3302_v17 }
 0xe91   :  { %v3281_v51 = vadd.f32 %v3280_v30, %v3279_v50  ;;  %v3318_v62 = vrot.slane %v3317_v37, 4 }
 0xe93   :  { %v3282_v14 = vrot.slane %v3281_v51, 2  ;;  %v3319_v42 = vadd.f32 %v3318_v62, %v3317_v37 }
 0xe95   :  { %v3283_v48 = vadd.f32 %v3282_v14, %v3281_v51  ;;  %v3320_v55 = vrot.slane %v3319_v42, 2 }
 0xe97   :  { %v3284_v41 = vrot.slane %v3283_v48, 1  ;;  %v3321_v54 = vadd.f32 %v3320_v55, %v3319_v42 }
 0xe99   :  { %v3285_v4 = vadd.f32 %v3284_v41, %v3283_v48  ;;  %v3322_v28 = vrot.slane %v3321_v54, 1 }
 0xe9b   :  { %v3286_v7 = vmul.f32 0.0625, %v3285_v4  ;;  %v3323_v52 = vadd.f32 %v3322_v28, %v3321_v54 }
 0xe9d   :  { %v3324_v39 = vmul.f32 0.0625, %v3323_v52  ;;  %v3325_v5 = vmul.f32 %v3286_v7, %v3286_v7 }
 0xe9f   :  { %v3326_v47 = vsub.f32 %v3324_v39, %v3325_v5 }
 0xea1   :  { %v3327_v45 = vmax.f32 %v3326_v47, 0.0 }
 0xea3   :  { %v3329_v6 = vadd.f32 1e-05, %v3327_v45 }
 0xea5   :  { %4663 = vrsqrt.f32 %v3329_v6 }
 0xeaf   :  { %v4664_v8 = vpop.eup %4663 }
 0xeb0   :  { %v3331_v29 = vmul.f32 %v4664_v8, %v3328_v12 }
 0xeb2   :  { %v3335_v21 = vrot.slane %v3331_v29, %v6250_v57  ;;  %v3353_v15 = vmul.f32 %v3331_v29, %v3286_v7 }
 0xeb4   :  { %v3349_v40 = vmul.f32 %v3335_v21, %v3254_v34  ;;  %v3354_v38 = vsub.f32 %v3352_v32, %v3353_v15  ;;  %v3336_v49 = vmul.f32 %v3335_v21, %v6075_v1  ;;  %v3337_v23 = vmul.f32 %v3335_v21, %v6085_v18 }
 0xeb5   :  { %v3338_v36 = vmul.f32 %v3335_v21, %v6071_v25  ;;  %v3339_v35 = vmul.f32 %v3335_v21, %v6082_v44  ;;  %v3340_v10 = vmul.f32 %v3335_v21, %v6112_v58  ;;  %v3341_v16 = vmul.f32 %v3335_v21, %v6124_v2 }
 0xeb6   :  { %v3358_v33 = vrot.slane %v3354_v38, %v6250_v57  ;;  %v3342_v27 = vmul.f32 %v3335_v21, %v6104_v0  ;;  %v3343_v46 = vmul.f32 %v3335_v21, %v6118_v3  ;;  %v3344_v19 = vmul.f32 %v3335_v21, %v6145_v22 }
 0xeb7   :  { %v3345_v1 = vmul.f32 %v3335_v21, %v6153_v56  ;;  %v3346_v18 = vmul.f32 %v3335_v21, %v6137_v26  ;;  %v3347_v25 = vmul.f32 %v3335_v21, %v6148_v43  ;;  %v3348_v34 = vmul.f32 %v3335_v21, %v3251_v61 }
 0xeb8   :  { %v3372_v44 = vadd.f32 %v3358_v33, %v3349_v40  ;;  %v3359_v24 = vadd.f32 %v3358_v33, %v3336_v49  ;;  %v3360_v58 = vadd.f32 %v3358_v33, %v3337_v23  ;;  %v3361_v13 = vadd.f32 %v3358_v33, %v3338_v36 }
 0xeb9   :  { %v3362_v2 = vadd.f32 %v3358_v33, %v3339_v35  ;;  %v3363_v31 = vadd.f32 %v3358_v33, %v3340_v10  ;;  %v3364_v57 = vadd.f32 %v3358_v33, %v3341_v16  ;;  %v3365_v11 = vadd.f32 %v3358_v33, %v3342_v27 }
 0xeba   :  { %v3375_v0 = vmul.f32 0.1, %v3359_v24  ;;  %v3376_v59 = vmul.f32 0.1, %v3360_v58  ;;  %v3366_v3 = vadd.f32 %v3358_v33, %v3343_v46  ;;  %v3377_v9 = vmul.f32 0.1, %v3361_v13 }
 0xebb   :  { %v3378_v22 = vmul.f32 0.1, %v3362_v2  ;;  %v3379_v17 = vmul.f32 0.1, %v3363_v31  ;;  %v3367_v56 = vadd.f32 %v3358_v33, %v3344_v19  ;;  %v3388_v50 = vmul.f32 0.1, %v3372_v44 }
 0xebc   :  { %v3391_v26 = vmax.f32 %v3359_v24, %v3375_v0  ;;  %v3392_v60 = vmax.f32 %v3360_v58, %v3376_v59  ;;  %v3380_v43 = vmul.f32 0.1, %v3364_v57  ;;  %v3393_v61 = vmax.f32 %v3361_v13, %v3377_v9 }
 0xebd   :  { %v3394_v30 = vmax.f32 %v3362_v2, %v3378_v22  ;;  %v3395_v37 = vmax.f32 %v3363_v31, %v3379_v17  ;;  %v3381_v51 = vmul.f32 0.1, %v3365_v11  ;;  %v3382_v42 = vmul.f32 0.1, %v3366_v3 }
 0xebe   :  { %v3407_v62 = vpack.c.bf16 %v3392_v60, %v3391_v26  ;;  %v3396_v14 = vmax.f32 %v3364_v57, %v3380_v43  ;;  %v3368_v48 = vadd.f32 %v3358_v33, %v3345_v1  ;;  %v3383_v54 = vmul.f32 0.1, %v3367_v56 }
 0xebf   :  { %v3408_v55 = vpack.c.bf16 %v3394_v30, %v3393_v61  ;;  %v3397_v41 = vmax.f32 %v3365_v11, %v3381_v51  ;;  %v3369_v4 = vadd.f32 %v3358_v33, %v3346_v18  ;;  %v3398_v7 = vmax.f32 %v3366_v3, %v3382_v42 }
 0xec0   :  { %4505 = vmatpush3.bf16.msra.mxu1 %v3407_v62  ;;  %v3409_v28 = vpack.c.bf16 %v3396_v14, %v3395_v37  ;;  %v3384_v52 = vmul.f32 0.1, %v3368_v48  ;;  %v3370_v39 = vadd.f32 %v3358_v33, %v3347_v25  ;;  %v3399_v5 = vmax.f32 %v3367_v56, %v3383_v54 }
 0xec1   :  { %4506 = vmatprep.subr.bf16.mxu1 %v4688_v20  ;;  %v3385_v47 = vmul.f32 0.1, %v3369_v4  ;;  %v3371_v45 = vadd.f32 %v3358_v33, %v3348_v34  ;;  %v3350_v6 = vmul.f32 %v3335_v21, %v6167_v53  ;;  %v3410_v12 = vpack.c.bf16 %v3398_v7, %v3397_v41 }
 0xec2   :  { %v3400_v8 = vmax.f32 %v3368_v48, %v3384_v52  ;;  %v3386_v29 = vmul.f32 0.1, %v3370_v39  ;;  %v3351_v32 = vmul.f32 %v3335_v21, %v6174_v63  ;;  %v3404_v15 = vmax.f32 %v3372_v44, %v3388_v50  ;;  %v3415_v21 = vld [vmem:[%s6233_s5] sm:$0xf] }
 0xec3   :  { %v3401_v40 = vmax.f32 %v3369_v4, %v3385_v47  ;;  %v3387_v38 = vmul.f32 0.1, %v3371_v45  ;;  %v3373_v49 = vadd.f32 %v3358_v33, %v3350_v6 }
 0xec4   :  { %4507 = vmatpush3.bf16.msra.mxu1 %v3408_v55  ;;  %v3411_v23 = vpack.c.bf16 %v3400_v8, %v3399_v5  ;;  %v3402_v36 = vmax.f32 %v3370_v39, %v3386_v29  ;;  %v3374_v35 = vadd.f32 %v3358_v33, %v3351_v32  ;;  %v4652_v33 = vld [vmem:[%s6223_s6 + $0x1f8] sm:$0xff]  }
 0xec5   :  { %4508 = vmatprep.subr.bf16.mxu1 %v4688_v20  ;;  %v3403_v10 = vmax.f32 %v3371_v45, %v3387_v38  ;;  %v3389_v16 = vmul.f32 0.1, %v3373_v49  ;;  %4539 = vmatpush3.bf16.msra.mxu0 %v4652_v33 }
 0xec6   :  { %v3412_v27 = vpack.c.bf16 %v3402_v36, %v3401_v40  ;;  %v3390_v46 = vmul.f32 0.1, %v3374_v35 }
 0xec7   :  { %v3413_v53 = vpack.c.bf16 %v3404_v15, %v3403_v10  ;;  %v3405_v19 = vmax.f32 %v3373_v49, %v3389_v16 }
 0xec8   :  { %4509 = vmatpush3.bf16.msra.mxu1 %v3409_v28  ;;  %v3406_v1 = vmax.f32 %v3374_v35, %v3390_v46 }
 0xec9   :  { %4510 = vmatprep.subr.bf16.mxu1 %v4688_v20 }
 0xeca   :  { %v3414_v63 = vpack.c.bf16 %v3406_v1, %v3405_v19 }
 0xecc   :  { %4511 = vmatpush3.bf16.msra.mxu1 %v3410_v12 }
 0xecd   :  { %4512 = vmatprep.subr.bf16.mxu1 %v4688_v20 }
 0xed0   :  { %4513 = vmatpush3.bf16.msra.mxu1 %v3411_v23 }
 0xed1   :  { %4514 = vmatprep.subr.bf16.mxu1 %v4688_v20 }
 0xed4   :  { %4515 = vmatpush3.bf16.msra.mxu1 %v3412_v27 }
 0xed5   :  { %4516 = vmatprep.subr.bf16.mxu1 %v4688_v20 }
 0xed8   :  { %4517 = vmatpush3.bf16.msra.mxu1 %v3413_v53 }
 0xed9   :  { %4518 = vmatprep.subr.bf16.mxu1 %v4688_v20  ;;  %v3789_v20 = vld [vmem:[%s6225_s8 + $0x8] ss:$0 sm:$0xff] }
 0xedc   :  { %4519 = vmatpush3.bf16.msra.mxu1 %v3414_v63 }
 0xedf   :  { %4521 = vmatmul.mubr.bf16.vlgmr.msra.gmra.mrb[112].mxu1 %v3415_v21 }
 0xfb2   :  { %v3450_v18 = vpop.f32.mrb[112].mxu1 }
 0xfb3   :  { %v3456_v25 = vmul.f32 0.125, %v3450_v18  ;;  %v4522_v34 = vpop.f32.mrb[113].mxu1 }
 0xfb4   :  { %v3453_v44 = vpop.f32.mrb[114].mxu1 }
 0xfb5   :  { %v3457_v24 = vpack.c.bf16 %v3456_v25, %v3456_v25  ;;  %v4523_v58 = vpop.f32.mrb[115].mxu1 }
 0xfb7   :  { %4541 = vmatmul.mubr.bf16.vlgmr.msra.gmra.mrb[128].mxu0 %v3457_v24 }
0x108a   :  { %v3562_v13 = vpop.f32.mrb[128].mxu0 }
0x108b   :  { %v3563_v2 = vadd.f32 %v3789_v20, %v3562_v13  ;;  %v4542_v31 = vpop.f32.mrb[129].mxu0 }
0x108c   :  { %v3565_v57 = vpop.f32.mrb[130].mxu0 }
0x108d   :  { %3568 = vst [vmem:[%s6234_s11] sm:$0xff] %v3563_v2  ;;  %v4543_v11 = vpop.f32.mrb[131].mxu0 }

</bundles_post_ra>
